<compile_context>
chip_gen: v6e
topology: v6e:2x2x1
jax: 0.10.0
libtpu: 0.0.40
codegen_flags: <defaults>
</compile_context>

<pallas_src>
import jax
import jax.numpy as jnp
from jax.experimental import pallas as pl
from jax.experimental.pallas import tpu as pltpu


CLS_PAD = 128  # pad num_classes to one full lane tile for a lane-dense store


def _vmem_spec():
    return pl.BlockSpec(memory_space=pltpu.MemorySpace.VMEM)


# ---------------------------------------------------------------------------
# Fused kernel: 3x(Conv1d + BN + ReLU) -> 2-layer LSTM -> fc1+ReLU+LN+fc2
# ---------------------------------------------------------------------------
def fused_cnn_lstm_kernel(
        xpad_ref,                          # (B, L + K1 - 1, Cin)        f32
        cw1_ref, cs1_ref, cb1_ref,         # (K1*Cin, C1) bf16, (1,1,C1) f32 x2
        cw2_ref, cs2_ref, cb2_ref,         # (K2*C1,  C2) bf16, (1,1,C2) f32 x2
        cw3_ref, cs3_ref, cb3_ref,         # (K3*C2,  C3) bf16, (1,1,C3) f32 x2
        wih1_ref, bih1_ref,                # (D, 4H) bf16, (1, 4H) f32 (b_ih1+b_hh1)
        whh1_ref,                          # (H, 4H) f32
        wcat2_ref, b2_ref,                 # (2H, 4H) f32 = [W_ih2; W_hh2], (1, 4H) f32
        fw1_ref, fb1_ref,                  # (H, H/2) f32, (1, H/2) f32
        lng_ref, lnb_ref,                  # (1, H/2) f32
        fw2_ref, fb2_ref,                  # (H/2, CLS_PAD) f32, (1, CLS_PAD) f32
        out_ref):                          # (B, CLS_PAD) f32
    f32 = jnp.float32

    # ------ conv stack: per layer one im2col matmul + folded BN + ReLU -----
    def conv_bn_relu(xpad, w_ref, s_ref, b_ref):
        b, lp, cin = xpad.shape
        k = w_ref.shape[0] // cin
        lo = lp - (k - 1)
        # im2col: K statically-shifted time windows packed along the lane dim.
        cols = jnp.concatenate([xpad[:, i:i + lo, :] for i in range(k)], axis=2)
        y = jax.lax.dot_general(
            cols.astype(jnp.bfloat16), w_ref[...],
            dimension_numbers=(((2,), (0,)), ((), ())),
            preferred_element_type=f32)                       # (B, Lo, Cout)
        return jnp.maximum(y * s_ref[...] + b_ref[...], 0.0)  # folded BN + ReLU

    def pad_time(y, pad):
        b, lo, c = y.shape
        z = jnp.zeros((b, pad, c), f32)
        return jnp.concatenate([z, y, z], axis=1)             # "same" padding

    k2 = cw2_ref.shape[0] // cw1_ref.shape[1]
    k3 = cw3_ref.shape[0] // cw2_ref.shape[1]

    h = conv_bn_relu(xpad_ref[...], cw1_ref, cs1_ref, cb1_ref)          # (B,T,C1)
    h = conv_bn_relu(pad_time(h, k2 // 2), cw2_ref, cs2_ref, cb2_ref)   # (B,T,C2)
    h = conv_bn_relu(pad_time(h, k3 // 2), cw3_ref, cs3_ref, cb3_ref)   # (B,T,D)

    B, T, D = h.shape
    H = whh1_ref.shape[0]
    H4 = 4 * H

    # ------ LSTM: hoisted layer-1 input projection (one matmul for all T) --
    xproj = jax.lax.dot_general(
        h.astype(jnp.bfloat16), wih1_ref[...],
        dimension_numbers=(((2,), (0,)), ((), ())),
        preferred_element_type=f32) + bih1_ref[...]           # (B, T, 4H)

    # Hoisted out of the recurrence: weights, bias broadcast, gate lane mask.
    whh1 = whh1_ref[...]
    wcat2 = wcat2_ref[...]
    b2 = jnp.broadcast_to(b2_ref[...], (B, H4))
    lane = jax.lax.broadcasted_iota(jnp.int32, (B, H4), 1)
    sig_mask = jnp.logical_or(lane < 2 * H, lane >= 3 * H)    # i,f,o sigmoid; g tanh

    def cell_update(gates, c):
        # Full-width activation of the 4H=128-lane gate vector, then slice.
        act = jnp.where(sig_mask, jax.nn.sigmoid(gates), jnp.tanh(gates))
        i = act[:, 0:H]
        f = act[:, H:2 * H]
        g = act[:, 2 * H:3 * H]
        o = act[:, 3 * H:4 * H]
        c_new = f * c + i * g
        return o * jnp.tanh(c_new), c_new

    h1 = c1 = h2 = c2 = jnp.zeros((B, H), f32)
    # T is static & small -> fully unrolled time loop (== fori_loop unroll=True),
    # with static slices of the hoisted projection. 2 matmuls per step total.
    for t in range(T):
        g1 = xproj[:, t, :] + jnp.dot(h1, whh1, preferred_element_type=f32)
        h1, c1 = cell_update(g1, c1)
        g2 = jnp.dot(jnp.concatenate([h1, h2], axis=1), wcat2,
                     preferred_element_type=f32) + b2
        h2, c2 = cell_update(g2, c2)

    # ------ head: fc1 + ReLU + LayerNorm + fc2 (lane-dense padded output) --
    xh = jnp.maximum(
        jnp.dot(h2, fw1_ref[...], preferred_element_type=f32) + fb1_ref[...], 0.0)
    mu = jnp.mean(xh, axis=-1, keepdims=True)
    var = jnp.mean(jnp.square(xh - mu), axis=-1, keepdims=True)
    xn = (xh - mu) * jax.lax.rsqrt(var + 1e-5)
    xn = xn * lng_ref[...] + lnb_ref[...]
    out_ref[...] = jnp.dot(xn, fw2_ref[...], preferred_element_type=f32) + fb2_ref[...]


# ---------------------------------------------------------------------------
# Raw parameters (PyTorch layout) -- deterministic init
# ---------------------------------------------------------------------------
def init_params(key, input_channels=4, conv_channels=(8, 16, 32),
                kernel_sizes=(3, 5, 7), lstm_hidden=32, num_classes=3):
    # TODO(synk): kaiming/orthogonal/xavier inits approximated with scaled
    # normals; shapes and forward math match the PyTorch module.
    params = {"convs": [], "lstm": {}, "head": {}}
    prev = input_channels
    for cout, k in zip(conv_channels, kernel_sizes):
        key, kw = jax.random.split(key)
        std = (2.0 / (cout * k)) ** 0.5
        params["convs"].append(dict(
            w=jax.random.normal(kw, (cout, prev, k), jnp.float32) * std,
            b=jnp.zeros((cout,), jnp.float32),
            gamma=jnp.ones((cout,), jnp.float32),
            beta=jnp.zeros((cout,), jnp.float32),
            mean=jnp.zeros((cout,), jnp.float32),
            var=jnp.ones((cout,), jnp.float32)))
        prev = cout

    H, D = lstm_hidden, conv_channels[-1]
    key, k1, k2, k3, k4 = jax.random.split(key, 5)
    params["lstm"] = dict(
        w_ih1=jax.random.normal(k1, (4 * H, D), jnp.float32) * 0.1,
        w_hh1=jax.random.normal(k2, (4 * H, H), jnp.float32) * 0.1,
        b_ih1=jnp.zeros((4 * H,), jnp.float32),
        b_hh1=jnp.zeros((4 * H,), jnp.float32),
        w_ih2=jax.random.normal(k3, (4 * H, H), jnp.float32) * 0.1,
        w_hh2=jax.random.normal(k4, (4 * H, H), jnp.float32) * 0.1,
        b_ih2=jnp.zeros((4 * H,), jnp.float32),
        b_hh2=jnp.zeros((4 * H,), jnp.float32))

    Hh = H // 2
    key, k5, k6 = jax.random.split(key, 3)
    params["head"] = dict(
        w1=jax.random.normal(k5, (Hh, H), jnp.float32) * (2.0 / (H + Hh)) ** 0.5,
        b1=jnp.zeros((Hh,), jnp.float32),
        ln_g=jnp.ones((Hh,), jnp.float32),
        ln_b=jnp.zeros((Hh,), jnp.float32),
        w2=jax.random.normal(k6, (num_classes, Hh), jnp.float32)
           * (2.0 / (Hh + num_classes)) ** 0.5,
        b2=jnp.zeros((num_classes,), jnp.float32))
    return params


# ---------------------------------------------------------------------------
# One-time weight prep: BN folding, transposes, gate stacking, bf16 casts.
# Runs outside the measured forward path.
# ---------------------------------------------------------------------------
def prepare_params(params):
    prepped = {"convs": []}
    for cp in params["convs"]:
        cout, cin, k = cp["w"].shape
        scale = cp["gamma"] * jax.lax.rsqrt(cp["var"] + 1e-5)
        bias = (cp["b"] - cp["mean"]) * scale + cp["beta"]
        # (Cout, Cin, K) -> (K*Cin, Cout); row index = k*Cin + c (im2col order).
        w_flat = jnp.transpose(cp["w"], (2, 1, 0)).reshape(k * cin, cout)
        prepped["convs"].append(dict(
            w=w_flat.astype(jnp.bfloat16),
            scale=scale.reshape(1, 1, cout).astype(jnp.float32),
            bias=bias.reshape(1, 1, cout).astype(jnp.float32)))

    lp = params["lstm"]
    prepped["lstm"] = dict(
        wih1=jnp.transpose(lp["w_ih1"]).astype(jnp.bfloat16),      # (D, 4H)
        b1=(lp["b_ih1"] + lp["b_hh1"]).reshape(1, -1).astype(jnp.float32),
        whh1=jnp.transpose(lp["w_hh1"]).astype(jnp.float32),       # (H, 4H)
        wcat2=jnp.concatenate([jnp.transpose(lp["w_ih2"]),
                               jnp.transpose(lp["w_hh2"])],
                              axis=0).astype(jnp.float32),         # (2H, 4H)
        b2=(lp["b_ih2"] + lp["b_hh2"]).reshape(1, -1).astype(jnp.float32))

    hp = params["head"]
    ncls, hh = hp["w2"].shape
    w2p = jnp.zeros((hh, CLS_PAD), jnp.float32).at[:, :ncls].set(jnp.transpose(hp["w2"]))
    b2p = jnp.zeros((1, CLS_PAD), jnp.float32).at[0, :ncls].set(hp["b2"])
    prepped["head"] = dict(
        w1=jnp.transpose(hp["w1"]).astype(jnp.float32),            # (H, H/2)
        b1=hp["b1"].reshape(1, -1),
        ln_g=hp["ln_g"].reshape(1, -1),
        ln_b=hp["ln_b"].reshape(1, -1),
        w2p=w2p,
        b2p=b2p)
    return prepped


# ---------------------------------------------------------------------------
# Forward wrapper: single fused pallas_call (wrapper only does NCL->NLC + pad)
# ---------------------------------------------------------------------------
@jax.jit
def forward(prepped, x):
    # x: (B, C_in, L) -- PyTorch NCL layout. Returns (B, CLS_PAD) padded logits.
    B, Cin, L = x.shape
    k1 = prepped["convs"][0]["w"].shape[0] // Cin
    pad1 = k1 // 2
    xpad = jnp.pad(jnp.transpose(x, (0, 2, 1)).astype(jnp.float32),
                   ((0, 0), (pad1, pad1), (0, 0)))               # (B, L+K1-1, Cin)

    args = [xpad]
    for cp in prepped["convs"]:
        args += [cp["w"], cp["scale"], cp["bias"]]
    lp, hp = prepped["lstm"], prepped["head"]
    args += [lp["wih1"], lp["b1"], lp["whh1"], lp["wcat2"], lp["b2"]]
    args += [hp["w1"], hp["b1"], hp["ln_g"], hp["ln_b"], hp["w2p"], hp["b2p"]]

    return pl.pallas_call(
        fused_cnn_lstm_kernel,
        out_shape=jax.ShapeDtypeStruct((B, hp["w2p"].shape[1]), jnp.float32),
        in_specs=[_vmem_spec()] * len(args),
        out_specs=_vmem_spec(),
    )(*args)


if __name__ == "__main__":
    NUM_CLASSES = 3
    key = jax.random.PRNGKey(0)
    kp, kx = jax.random.split(key)
    # Small shapes: batch=2, input_channels=4, seq_len=16,
    # conv_channels=(8,16,32), kernel_sizes=(3,5,7), lstm_hidden=32, classes=3.
    params = init_params(kp, input_channels=4, conv_channels=(8, 16, 32),
                         kernel_sizes=(3, 5, 7), lstm_hidden=32,
                         num_classes=NUM_CLASSES)
    prepped = prepare_params(params)
    x = jax.random.normal(kx, (2, 4, 16), jnp.float32)           # (B, C_in, L)
    logits = forward(prepped, x)[:, :NUM_CLASSES]                # strip lane padding
    logits = jax.block_until_ready(logits)
    assert logits.shape == (2, NUM_CLASSES)
    print("KERNEL_OK")
</pallas_src>

<mosaic_0001>
module attributes {stable_mosaic.version = 11 : i64} {
  func.func @fused_cnn_lstm_kernel(%arg0: memref<2x18x4xf32, #tpu.memory_space<vmem>>, %arg1: memref<12x8xbf16, #tpu.memory_space<vmem>>, %arg2: memref<1x1x8xf32, #tpu.memory_space<vmem>>, %arg3: memref<1x1x8xf32, #tpu.memory_space<vmem>>, %arg4: memref<40x16xbf16, #tpu.memory_space<vmem>>, %arg5: memref<1x1x16xf32, #tpu.memory_space<vmem>>, %arg6: memref<1x1x16xf32, #tpu.memory_space<vmem>>, %arg7: memref<112x32xbf16, #tpu.memory_space<vmem>>, %arg8: memref<1x1x32xf32, #tpu.memory_space<vmem>>, %arg9: memref<1x1x32xf32, #tpu.memory_space<vmem>>, %arg10: memref<32x128xbf16, #tpu.memory_space<vmem>>, %arg11: memref<1x128xf32, #tpu.memory_space<vmem>>, %arg12: memref<32x128xf32, #tpu.memory_space<vmem>>, %arg13: memref<64x128xf32, #tpu.memory_space<vmem>>, %arg14: memref<1x128xf32, #tpu.memory_space<vmem>>, %arg15: memref<32x16xf32, #tpu.memory_space<vmem>>, %arg16: memref<1x16xf32, #tpu.memory_space<vmem>>, %arg17: memref<1x16xf32, #tpu.memory_space<vmem>>, %arg18: memref<1x16xf32, #tpu.memory_space<vmem>>, %arg19: memref<16x128xf32, #tpu.memory_space<vmem>>, %arg20: memref<1x128xf32, #tpu.memory_space<vmem>>, %arg21: memref<2x128xf32, #tpu.memory_space<vmem>>) attributes {dimension_semantics = [], scalar_prefetch = 0 : i64, scratch_operands = 0 : i64, tpu.core_type = #tpu.core_type<tc>} {
    %c0 = arith.constant 0 : index
    %c0_0 = arith.constant 0 : index
    %c0_1 = arith.constant 0 : index
    %0 = vector.load %arg0[%c0, %c0_0, %c0_1] : memref<2x18x4xf32, #tpu.memory_space<vmem>>, vector<2x18x4xf32>
    %1 = vector.extract_strided_slice %0 {offsets = [0, 0, 0], sizes = [2, 16, 4], strides = [1, 1, 1]} : vector<2x18x4xf32> to vector<2x16x4xf32>
    %2 = vector.extract_strided_slice %0 {offsets = [0, 1, 0], sizes = [2, 16, 4], strides = [1, 1, 1]} : vector<2x18x4xf32> to vector<2x16x4xf32>
    %3 = vector.extract_strided_slice %0 {offsets = [0, 2, 0], sizes = [2, 16, 4], strides = [1, 1, 1]} : vector<2x18x4xf32> to vector<2x16x4xf32>
    %4 = tpu.concatenate %1, %2, %3 in 2 : vector<2x16x4xf32>, vector<2x16x4xf32>, vector<2x16x4xf32> -> vector<2x16x12xf32>
    %5 = arith.truncf %4 : vector<2x16x12xf32> to vector<2x16x12xbf16>
    %c0_2 = arith.constant 0 : index
    %c0_3 = arith.constant 0 : index
    %6 = vector.load %arg1[%c0_2, %c0_3] : memref<12x8xbf16, #tpu.memory_space<vmem>>, vector<12x8xbf16>
    %cst = arith.constant dense<0.000000e+00> : vector<2x16x8xf32>
    %7 = tpu.matmul %5, %6, %cst {dimension_numbers = #tpu.dot_dimension_numbers<[2], [0], [0, 1], [1], [0, 0, 0, 1, 1, 1], [], []>} : vector<2x16x12xbf16>, vector<12x8xbf16>, vector<2x16x8xf32> -> vector<2x16x8xf32>
    %c0_4 = arith.constant 0 : index
    %c0_5 = arith.constant 0 : index
    %c0_6 = arith.constant 0 : index
    %8 = vector.load %arg2[%c0_4, %c0_5, %c0_6] : memref<1x1x8xf32, #tpu.memory_space<vmem>>, vector<1x1x8xf32>
    %9 = vector.broadcast %8 : vector<1x1x8xf32> to vector<2x16x8xf32>
    %10 = arith.mulf %7, %9 : vector<2x16x8xf32>
    %c0_7 = arith.constant 0 : index
    %c0_8 = arith.constant 0 : index
    %c0_9 = arith.constant 0 : index
    %11 = vector.load %arg3[%c0_7, %c0_8, %c0_9] : memref<1x1x8xf32, #tpu.memory_space<vmem>>, vector<1x1x8xf32>
    %12 = vector.broadcast %11 : vector<1x1x8xf32> to vector<2x16x8xf32>
    %13 = arith.addf %10, %12 : vector<2x16x8xf32>
    %cst_10 = arith.constant 0.000000e+00 : f32
    %14 = vector.broadcast %cst_10 : f32 to vector<2x16x8xf32>
    %15 = arith.maximumf %13, %14 : vector<2x16x8xf32>
    %cst_11 = arith.constant 0.000000e+00 : f32
    %16 = vector.broadcast %cst_11 : f32 to vector<2x2x8xf32>
    %17 = tpu.concatenate %16, %15, %16 in 1 : vector<2x2x8xf32>, vector<2x16x8xf32>, vector<2x2x8xf32> -> vector<2x20x8xf32>
    %18 = vector.extract_strided_slice %17 {offsets = [0, 0, 0], sizes = [2, 16, 8], strides = [1, 1, 1]} : vector<2x20x8xf32> to vector<2x16x8xf32>
    %19 = vector.extract_strided_slice %17 {offsets = [0, 1, 0], sizes = [2, 16, 8], strides = [1, 1, 1]} : vector<2x20x8xf32> to vector<2x16x8xf32>
    %20 = vector.extract_strided_slice %17 {offsets = [0, 2, 0], sizes = [2, 16, 8], strides = [1, 1, 1]} : vector<2x20x8xf32> to vector<2x16x8xf32>
    %21 = vector.extract_strided_slice %17 {offsets = [0, 3, 0], sizes = [2, 16, 8], strides = [1, 1, 1]} : vector<2x20x8xf32> to vector<2x16x8xf32>
    %22 = vector.extract_strided_slice %17 {offsets = [0, 4, 0], sizes = [2, 16, 8], strides = [1, 1, 1]} : vector<2x20x8xf32> to vector<2x16x8xf32>
    %23 = tpu.concatenate %18, %19, %20, %21, %22 in 2 : vector<2x16x8xf32>, vector<2x16x8xf32>, vector<2x16x8xf32>, vector<2x16x8xf32>, vector<2x16x8xf32> -> vector<2x16x40xf32>
    %24 = arith.truncf %23 : vector<2x16x40xf32> to vector<2x16x40xbf16>
    %c0_12 = arith.constant 0 : index
    %c0_13 = arith.constant 0 : index
    %25 = vector.load %arg4[%c0_12, %c0_13] : memref<40x16xbf16, #tpu.memory_space<vmem>>, vector<40x16xbf16>
    %cst_14 = arith.constant dense<0.000000e+00> : vector<2x16x16xf32>
    %26 = tpu.matmul %24, %25, %cst_14 {dimension_numbers = #tpu.dot_dimension_numbers<[2], [0], [0, 1], [1], [0, 0, 0, 1, 1, 1], [], []>} : vector<2x16x40xbf16>, vector<40x16xbf16>, vector<2x16x16xf32> -> vector<2x16x16xf32>
    %c0_15 = arith.constant 0 : index
    %c0_16 = arith.constant 0 : index
    %c0_17 = arith.constant 0 : index
    %27 = vector.load %arg5[%c0_15, %c0_16, %c0_17] : memref<1x1x16xf32, #tpu.memory_space<vmem>>, vector<1x1x16xf32>
    %28 = vector.broadcast %27 : vector<1x1x16xf32> to vector<2x16x16xf32>
    %29 = arith.mulf %26, %28 : vector<2x16x16xf32>
    %c0_18 = arith.constant 0 : index
    %c0_19 = arith.constant 0 : index
    %c0_20 = arith.constant 0 : index
    %30 = vector.load %arg6[%c0_18, %c0_19, %c0_20] : memref<1x1x16xf32, #tpu.memory_space<vmem>>, vector<1x1x16xf32>
    %31 = vector.broadcast %30 : vector<1x1x16xf32> to vector<2x16x16xf32>
    %32 = arith.addf %29, %31 : vector<2x16x16xf32>
    %cst_21 = arith.constant 0.000000e+00 : f32
    %33 = vector.broadcast %cst_21 : f32 to vector<2x16x16xf32>
    %34 = arith.maximumf %32, %33 : vector<2x16x16xf32>
    %cst_22 = arith.constant 0.000000e+00 : f32
    %35 = vector.broadcast %cst_22 : f32 to vector<2x3x16xf32>
    %36 = tpu.concatenate %35, %34, %35 in 1 : vector<2x3x16xf32>, vector<2x16x16xf32>, vector<2x3x16xf32> -> vector<2x22x16xf32>
    %37 = vector.extract_strided_slice %36 {offsets = [0, 0, 0], sizes = [2, 16, 16], strides = [1, 1, 1]} : vector<2x22x16xf32> to vector<2x16x16xf32>
    %38 = vector.extract_strided_slice %36 {offsets = [0, 1, 0], sizes = [2, 16, 16], strides = [1, 1, 1]} : vector<2x22x16xf32> to vector<2x16x16xf32>
    %39 = vector.extract_strided_slice %36 {offsets = [0, 2, 0], sizes = [2, 16, 16], strides = [1, 1, 1]} : vector<2x22x16xf32> to vector<2x16x16xf32>
    %40 = vector.extract_strided_slice %36 {offsets = [0, 3, 0], sizes = [2, 16, 16], strides = [1, 1, 1]} : vector<2x22x16xf32> to vector<2x16x16xf32>
    %41 = vector.extract_strided_slice %36 {offsets = [0, 4, 0], sizes = [2, 16, 16], strides = [1, 1, 1]} : vector<2x22x16xf32> to vector<2x16x16xf32>
    %42 = vector.extract_strided_slice %36 {offsets = [0, 5, 0], sizes = [2, 16, 16], strides = [1, 1, 1]} : vector<2x22x16xf32> to vector<2x16x16xf32>
    %43 = vector.extract_strided_slice %36 {offsets = [0, 6, 0], sizes = [2, 16, 16], strides = [1, 1, 1]} : vector<2x22x16xf32> to vector<2x16x16xf32>
    %44 = tpu.concatenate %37, %38, %39, %40, %41, %42, %43 in 2 : vector<2x16x16xf32>, vector<2x16x16xf32>, vector<2x16x16xf32>, vector<2x16x16xf32>, vector<2x16x16xf32>, vector<2x16x16xf32>, vector<2x16x16xf32> -> vector<2x16x112xf32>
    %45 = arith.truncf %44 : vector<2x16x112xf32> to vector<2x16x112xbf16>
    %c0_23 = arith.constant 0 : index
    %c0_24 = arith.constant 0 : index
    %46 = vector.load %arg7[%c0_23, %c0_24] : memref<112x32xbf16, #tpu.memory_space<vmem>>, vector<112x32xbf16>
    %cst_25 = arith.constant dense<0.000000e+00> : vector<2x16x32xf32>
    %47 = tpu.matmul %45, %46, %cst_25 {dimension_numbers = #tpu.dot_dimension_numbers<[2], [0], [0, 1], [1], [0, 0, 0, 1, 1, 1], [], []>} : vector<2x16x112xbf16>, vector<112x32xbf16>, vector<2x16x32xf32> -> vector<2x16x32xf32>
    %c0_26 = arith.constant 0 : index
    %c0_27 = arith.constant 0 : index
    %c0_28 = arith.constant 0 : index
    %48 = vector.load %arg8[%c0_26, %c0_27, %c0_28] : memref<1x1x32xf32, #tpu.memory_space<vmem>>, vector<1x1x32xf32>
    %49 = vector.broadcast %48 : vector<1x1x32xf32> to vector<2x16x32xf32>
    %50 = arith.mulf %47, %49 : vector<2x16x32xf32>
    %c0_29 = arith.constant 0 : index
    %c0_30 = arith.constant 0 : index
    %c0_31 = arith.constant 0 : index
    %51 = vector.load %arg9[%c0_29, %c0_30, %c0_31] : memref<1x1x32xf32, #tpu.memory_space<vmem>>, vector<1x1x32xf32>
    %52 = vector.broadcast %51 : vector<1x1x32xf32> to vector<2x16x32xf32>
    %53 = arith.addf %50, %52 : vector<2x16x32xf32>
    %cst_32 = arith.constant 0.000000e+00 : f32
    %54 = vector.broadcast %cst_32 : f32 to vector<2x16x32xf32>
    %55 = arith.maximumf %53, %54 : vector<2x16x32xf32>
    %56 = arith.truncf %55 : vector<2x16x32xf32> to vector<2x16x32xbf16>
    %c0_33 = arith.constant 0 : index
    %c0_34 = arith.constant 0 : index
    %57 = vector.load %arg10[%c0_33, %c0_34] : memref<32x128xbf16, #tpu.memory_space<vmem>>, vector<32x128xbf16>
    %cst_35 = arith.constant dense<0.000000e+00> : vector<2x16x128xf32>
    %58 = tpu.matmul %56, %57, %cst_35 {dimension_numbers = #tpu.dot_dimension_numbers<[2], [0], [0, 1], [1], [0, 0, 0, 1, 1, 1], [], []>} : vector<2x16x32xbf16>, vector<32x128xbf16>, vector<2x16x128xf32> -> vector<2x16x128xf32>
    %c0_36 = arith.constant 0 : index
    %c0_37 = arith.constant 0 : index
    %59 = vector.load %arg11[%c0_36, %c0_37] : memref<1x128xf32, #tpu.memory_space<vmem>>, vector<1x128xf32>
    %60 = vector.shape_cast %59 : vector<1x128xf32> to vector<1x1x128xf32>
    %61 = vector.broadcast %60 : vector<1x1x128xf32> to vector<2x16x128xf32>
    %62 = arith.addf %58, %61 : vector<2x16x128xf32>
    %c0_38 = arith.constant 0 : index
    %c0_39 = arith.constant 0 : index
    %63 = vector.load %arg12[%c0_38, %c0_39] : memref<32x128xf32, #tpu.memory_space<vmem>>, vector<32x128xf32>
    %c0_40 = arith.constant 0 : index
    %c0_41 = arith.constant 0 : index
    %64 = vector.load %arg13[%c0_40, %c0_41] : memref<64x128xf32, #tpu.memory_space<vmem>>, vector<64x128xf32>
    %c0_42 = arith.constant 0 : index
    %c0_43 = arith.constant 0 : index
    %65 = vector.load %arg14[%c0_42, %c0_43] : memref<1x128xf32, #tpu.memory_space<vmem>>, vector<1x128xf32>
    %66 = vector.shape_cast %65 : vector<1x128xf32> to vector<1x128xf32>
    %67 = vector.broadcast %66 : vector<1x128xf32> to vector<2x128xf32>
    %68 = tpu.iota {dimensions = array<i32: 1>} : vector<2x128xi32>
    %c64_i32 = arith.constant 64 : i32
    %69 = vector.broadcast %c64_i32 : i32 to vector<2x128xi32>
    %70 = arith.cmpi slt, %68, %69 : vector<2x128xi32>
    %c96_i32 = arith.constant 96 : i32
    %71 = vector.broadcast %c96_i32 : i32 to vector<2x128xi32>
    %72 = arith.cmpi sge, %68, %71 : vector<2x128xi32>
    %73 = arith.ori %70, %72 : vector<2x128xi1>
    %cst_44 = arith.constant 0.000000e+00 : f32
    %74 = vector.broadcast %cst_44 : f32 to vector<2x32xf32>
    %75 = vector.extract_strided_slice %62 {offsets = [0, 0, 0], sizes = [2, 1, 128], strides = [1, 1, 1]} : vector<2x16x128xf32> to vector<2x1x128xf32>
    %76 = vector.shape_cast %75 : vector<2x1x128xf32> to vector<2x128xf32>
    %cst_45 = arith.constant dense<0.000000e+00> : vector<2x128xf32>
    %77 = tpu.matmul %74, %63, %cst_45 {dimension_numbers = #tpu.dot_dimension_numbers<[1], [0], [0], [1], [0, 0, 1, 1], [], []>} : vector<2x32xf32>, vector<32x128xf32>, vector<2x128xf32> -> vector<2x128xf32>
    %78 = arith.addf %76, %77 : vector<2x128xf32>
    %79 = arith.negf %78 : vector<2x128xf32>
    %80 = math.exp %79 : vector<2x128xf32>
    %cst_46 = arith.constant 1.000000e+00 : f32
    %81 = vector.broadcast %cst_46 : f32 to vector<2x128xf32>
    %82 = arith.addf %81, %80 : vector<2x128xf32>
    %83 = arith.divf %81, %82 : vector<2x128xf32>
    %84 = math.tanh %78 : vector<2x128xf32>
    %85 = arith.select %73, %83, %84 : vector<2x128xi1>, vector<2x128xf32>
    %86 = vector.extract_strided_slice %85 {offsets = [0, 0], sizes = [2, 32], strides = [1, 1]} : vector<2x128xf32> to vector<2x32xf32>
    %87 = vector.extract_strided_slice %85 {offsets = [0, 32], sizes = [2, 32], strides = [1, 1]} : vector<2x128xf32> to vector<2x32xf32>
    %88 = vector.extract_strided_slice %85 {offsets = [0, 64], sizes = [2, 32], strides = [1, 1]} : vector<2x128xf32> to vector<2x32xf32>
    %89 = vector.extract_strided_slice %85 {offsets = [0, 96], sizes = [2, 32], strides = [1, 1]} : vector<2x128xf32> to vector<2x32xf32>
    %90 = arith.mulf %87, %74 : vector<2x32xf32>
    %91 = arith.mulf %86, %88 : vector<2x32xf32>
    %92 = arith.addf %90, %91 : vector<2x32xf32>
    %93 = math.tanh %92 : vector<2x32xf32>
    %94 = arith.mulf %89, %93 : vector<2x32xf32>
    %95 = tpu.concatenate %94, %74 in 1 : vector<2x32xf32>, vector<2x32xf32> -> vector<2x64xf32>
    %cst_47 = arith.constant dense<0.000000e+00> : vector<2x128xf32>
    %96 = tpu.matmul %95, %64, %cst_47 {dimension_numbers = #tpu.dot_dimension_numbers<[1], [0], [0], [1], [0, 0, 1, 1], [], []>} : vector<2x64xf32>, vector<64x128xf32>, vector<2x128xf32> -> vector<2x128xf32>
    %97 = arith.addf %96, %67 : vector<2x128xf32>
    %98 = arith.negf %97 : vector<2x128xf32>
    %99 = math.exp %98 : vector<2x128xf32>
    %cst_48 = arith.constant 1.000000e+00 : f32
    %100 = vector.broadcast %cst_48 : f32 to vector<2x128xf32>
    %101 = arith.addf %100, %99 : vector<2x128xf32>
    %102 = arith.divf %100, %101 : vector<2x128xf32>
    %103 = math.tanh %97 : vector<2x128xf32>
    %104 = arith.select %73, %102, %103 : vector<2x128xi1>, vector<2x128xf32>
    %105 = vector.extract_strided_slice %104 {offsets = [0, 0], sizes = [2, 32], strides = [1, 1]} : vector<2x128xf32> to vector<2x32xf32>
    %106 = vector.extract_strided_slice %104 {offsets = [0, 32], sizes = [2, 32], strides = [1, 1]} : vector<2x128xf32> to vector<2x32xf32>
    %107 = vector.extract_strided_slice %104 {offsets = [0, 64], sizes = [2, 32], strides = [1, 1]} : vector<2x128xf32> to vector<2x32xf32>
    %108 = vector.extract_strided_slice %104 {offsets = [0, 96], sizes = [2, 32], strides = [1, 1]} : vector<2x128xf32> to vector<2x32xf32>
    %109 = arith.mulf %106, %74 : vector<2x32xf32>
    %110 = arith.mulf %105, %107 : vector<2x32xf32>
    %111 = arith.addf %109, %110 : vector<2x32xf32>
    %112 = math.tanh %111 : vector<2x32xf32>
    %113 = arith.mulf %108, %112 : vector<2x32xf32>
    %114 = vector.extract_strided_slice %62 {offsets = [0, 1, 0], sizes = [2, 1, 128], strides = [1, 1, 1]} : vector<2x16x128xf32> to vector<2x1x128xf32>
    %115 = vector.shape_cast %114 : vector<2x1x128xf32> to vector<2x128xf32>
    %cst_49 = arith.constant dense<0.000000e+00> : vector<2x128xf32>
    %116 = tpu.matmul %94, %63, %cst_49 {dimension_numbers = #tpu.dot_dimension_numbers<[1], [0], [0], [1], [0, 0, 1, 1], [], []>} : vector<2x32xf32>, vector<32x128xf32>, vector<2x128xf32> -> vector<2x128xf32>
    %117 = arith.addf %115, %116 : vector<2x128xf32>
    %118 = arith.negf %117 : vector<2x128xf32>
    %119 = math.exp %118 : vector<2x128xf32>
    %cst_50 = arith.constant 1.000000e+00 : f32
    %120 = vector.broadcast %cst_50 : f32 to vector<2x128xf32>
    %121 = arith.addf %120, %119 : vector<2x128xf32>
    %122 = arith.divf %120, %121 : vector<2x128xf32>
    %123 = math.tanh %117 : vector<2x128xf32>
    %124 = arith.select %73, %122, %123 : vector<2x128xi1>, vector<2x128xf32>
    %125 = vector.extract_strided_slice %124 {offsets = [0, 0], sizes = [2, 32], strides = [1, 1]} : vector<2x128xf32> to vector<2x32xf32>
    %126 = vector.extract_strided_slice %124 {offsets = [0, 32], sizes = [2, 32], strides = [1, 1]} : vector<2x128xf32> to vector<2x32xf32>
    %127 = vector.extract_strided_slice %124 {offsets = [0, 64], sizes = [2, 32], strides = [1, 1]} : vector<2x128xf32> to vector<2x32xf32>
    %128 = vector.extract_strided_slice %124 {offsets = [0, 96], sizes = [2, 32], strides = [1, 1]} : vector<2x128xf32> to vector<2x32xf32>
    %129 = arith.mulf %126, %92 : vector<2x32xf32>
    %130 = arith.mulf %125, %127 : vector<2x32xf32>
    %131 = arith.addf %129, %130 : vector<2x32xf32>
    %132 = math.tanh %131 : vector<2x32xf32>
    %133 = arith.mulf %128, %132 : vector<2x32xf32>
    %134 = tpu.concatenate %133, %113 in 1 : vector<2x32xf32>, vector<2x32xf32> -> vector<2x64xf32>
    %cst_51 = arith.constant dense<0.000000e+00> : vector<2x128xf32>
    %135 = tpu.matmul %134, %64, %cst_51 {dimension_numbers = #tpu.dot_dimension_numbers<[1], [0], [0], [1], [0, 0, 1, 1], [], []>} : vector<2x64xf32>, vector<64x128xf32>, vector<2x128xf32> -> vector<2x128xf32>
    %136 = arith.addf %135, %67 : vector<2x128xf32>
    %137 = arith.negf %136 : vector<2x128xf32>
    %138 = math.exp %137 : vector<2x128xf32>
    %cst_52 = arith.constant 1.000000e+00 : f32
    %139 = vector.broadcast %cst_52 : f32 to vector<2x128xf32>
    %140 = arith.addf %139, %138 : vector<2x128xf32>
    %141 = arith.divf %139, %140 : vector<2x128xf32>
    %142 = math.tanh %136 : vector<2x128xf32>
    %143 = arith.select %73, %141, %142 : vector<2x128xi1>, vector<2x128xf32>
    %144 = vector.extract_strided_slice %143 {offsets = [0, 0], sizes = [2, 32], strides = [1, 1]} : vector<2x128xf32> to vector<2x32xf32>
    %145 = vector.extract_strided_slice %143 {offsets = [0, 32], sizes = [2, 32], strides = [1, 1]} : vector<2x128xf32> to vector<2x32xf32>
    %146 = vector.extract_strided_slice %143 {offsets = [0, 64], sizes = [2, 32], strides = [1, 1]} : vector<2x128xf32> to vector<2x32xf32>
    %147 = vector.extract_strided_slice %143 {offsets = [0, 96], sizes = [2, 32], strides = [1, 1]} : vector<2x128xf32> to vector<2x32xf32>
    %148 = arith.mulf %145, %111 : vector<2x32xf32>
    %149 = arith.mulf %144, %146 : vector<2x32xf32>
    %150 = arith.addf %148, %149 : vector<2x32xf32>
    %151 = math.tanh %150 : vector<2x32xf32>
    %152 = arith.mulf %147, %151 : vector<2x32xf32>
    %153 = vector.extract_strided_slice %62 {offsets = [0, 2, 0], sizes = [2, 1, 128], strides = [1, 1, 1]} : vector<2x16x128xf32> to vector<2x1x128xf32>
    %154 = vector.shape_cast %153 : vector<2x1x128xf32> to vector<2x128xf32>
    %cst_53 = arith.constant dense<0.000000e+00> : vector<2x128xf32>
    %155 = tpu.matmul %133, %63, %cst_53 {dimension_numbers = #tpu.dot_dimension_numbers<[1], [0], [0], [1], [0, 0, 1, 1], [], []>} : vector<2x32xf32>, vector<32x128xf32>, vector<2x128xf32> -> vector<2x128xf32>
    %156 = arith.addf %154, %155 : vector<2x128xf32>
    %157 = arith.negf %156 : vector<2x128xf32>
    %158 = math.exp %157 : vector<2x128xf32>
    %cst_54 = arith.constant 1.000000e+00 : f32
    %159 = vector.broadcast %cst_54 : f32 to vector<2x128xf32>
    %160 = arith.addf %159, %158 : vector<2x128xf32>
    %161 = arith.divf %159, %160 : vector<2x128xf32>
    %162 = math.tanh %156 : vector<2x128xf32>
    %163 = arith.select %73, %161, %162 : vector<2x128xi1>, vector<2x128xf32>
    %164 = vector.extract_strided_slice %163 {offsets = [0, 0], sizes = [2, 32], strides = [1, 1]} : vector<2x128xf32> to vector<2x32xf32>
    %165 = vector.extract_strided_slice %163 {offsets = [0, 32], sizes = [2, 32], strides = [1, 1]} : vector<2x128xf32> to vector<2x32xf32>
    %166 = vector.extract_strided_slice %163 {offsets = [0, 64], sizes = [2, 32], strides = [1, 1]} : vector<2x128xf32> to vector<2x32xf32>
    %167 = vector.extract_strided_slice %163 {offsets = [0, 96], sizes = [2, 32], strides = [1, 1]} : vector<2x128xf32> to vector<2x32xf32>
    %168 = arith.mulf %165, %131 : vector<2x32xf32>
    %169 = arith.mulf %164, %166 : vector<2x32xf32>
    %170 = arith.addf %168, %169 : vector<2x32xf32>
    %171 = math.tanh %170 : vector<2x32xf32>
    %172 = arith.mulf %167, %171 : vector<2x32xf32>
    %173 = tpu.concatenate %172, %152 in 1 : vector<2x32xf32>, vector<2x32xf32> -> vector<2x64xf32>
    %cst_55 = arith.constant dense<0.000000e+00> : vector<2x128xf32>
    %174 = tpu.matmul %173, %64, %cst_55 {dimension_numbers = #tpu.dot_dimension_numbers<[1], [0], [0], [1], [0, 0, 1, 1], [], []>} : vector<2x64xf32>, vector<64x128xf32>, vector<2x128xf32> -> vector<2x128xf32>
    %175 = arith.addf %174, %67 : vector<2x128xf32>
    %176 = arith.negf %175 : vector<2x128xf32>
    %177 = math.exp %176 : vector<2x128xf32>
    %cst_56 = arith.constant 1.000000e+00 : f32
    %178 = vector.broadcast %cst_56 : f32 to vector<2x128xf32>
    %179 = arith.addf %178, %177 : vector<2x128xf32>
    %180 = arith.divf %178, %179 : vector<2x128xf32>
    %181 = math.tanh %175 : vector<2x128xf32>
    %182 = arith.select %73, %180, %181 : vector<2x128xi1>, vector<2x128xf32>
    %183 = vector.extract_strided_slice %182 {offsets = [0, 0], sizes = [2, 32], strides = [1, 1]} : vector<2x128xf32> to vector<2x32xf32>
    %184 = vector.extract_strided_slice %182 {offsets = [0, 32], sizes = [2, 32], strides = [1, 1]} : vector<2x128xf32> to vector<2x32xf32>
    %185 = vector.extract_strided_slice %182 {offsets = [0, 64], sizes = [2, 32], strides = [1, 1]} : vector<2x128xf32> to vector<2x32xf32>
    %186 = vector.extract_strided_slice %182 {offsets = [0, 96], sizes = [2, 32], strides = [1, 1]} : vector<2x128xf32> to vector<2x32xf32>
    %187 = arith.mulf %184, %150 : vector<2x32xf32>
    %188 = arith.mulf %183, %185 : vector<2x32xf32>
    %189 = arith.addf %187, %188 : vector<2x32xf32>
    %190 = math.tanh %189 : vector<2x32xf32>
    %191 = arith.mulf %186, %190 : vector<2x32xf32>
    %192 = vector.extract_strided_slice %62 {offsets = [0, 3, 0], sizes = [2, 1, 128], strides = [1, 1, 1]} : vector<2x16x128xf32> to vector<2x1x128xf32>
    %193 = vector.shape_cast %192 : vector<2x1x128xf32> to vector<2x128xf32>
    %cst_57 = arith.constant dense<0.000000e+00> : vector<2x128xf32>
    %194 = tpu.matmul %172, %63, %cst_57 {dimension_numbers = #tpu.dot_dimension_numbers<[1], [0], [0], [1], [0, 0, 1, 1], [], []>} : vector<2x32xf32>, vector<32x128xf32>, vector<2x128xf32> -> vector<2x128xf32>
    %195 = arith.addf %193, %194 : vector<2x128xf32>
    %196 = arith.negf %195 : vector<2x128xf32>
    %197 = math.exp %196 : vector<2x128xf32>
    %cst_58 = arith.constant 1.000000e+00 : f32
    %198 = vector.broadcast %cst_58 : f32 to vector<2x128xf32>
    %199 = arith.addf %198, %197 : vector<2x128xf32>
    %200 = arith.divf %198, %199 : vector<2x128xf32>
    %201 = math.tanh %195 : vector<2x128xf32>
    %202 = arith.select %73, %200, %201 : vector<2x128xi1>, vector<2x128xf32>
    %203 = vector.extract_strided_slice %202 {offsets = [0, 0], sizes = [2, 32], strides = [1, 1]} : vector<2x128xf32> to vector<2x32xf32>
    %204 = vector.extract_strided_slice %202 {offsets = [0, 32], sizes = [2, 32], strides = [1, 1]} : vector<2x128xf32> to vector<2x32xf32>
    %205 = vector.extract_strided_slice %202 {offsets = [0, 64], sizes = [2, 32], strides = [1, 1]} : vector<2x128xf32> to vector<2x32xf32>
    %206 = vector.extract_strided_slice %202 {offsets = [0, 96], sizes = [2, 32], strides = [1, 1]} : vector<2x128xf32> to vector<2x32xf32>
    %207 = arith.mulf %204, %170 : vector<2x32xf32>
    %208 = arith.mulf %203, %205 : vector<2x32xf32>
    %209 = arith.addf %207, %208 : vector<2x32xf32>
    %210 = math.tanh %209 : vector<2x32xf32>
    %211 = arith.mulf %206, %210 : vector<2x32xf32>
    %212 = tpu.concatenate %211, %191 in 1 : vector<2x32xf32>, vector<2x32xf32> -> vector<2x64xf32>
    %cst_59 = arith.constant dense<0.000000e+00> : vector<2x128xf32>
    %213 = tpu.matmul %212, %64, %cst_59 {dimension_numbers = #tpu.dot_dimension_numbers<[1], [0], [0], [1], [0, 0, 1, 1], [], []>} : vector<2x64xf32>, vector<64x128xf32>, vector<2x128xf32> -> vector<2x128xf32>
    %214 = arith.addf %213, %67 : vector<2x128xf32>
    %215 = arith.negf %214 : vector<2x128xf32>
    %216 = math.exp %215 : vector<2x128xf32>
    %cst_60 = arith.constant 1.000000e+00 : f32
    %217 = vector.broadcast %cst_60 : f32 to vector<2x128xf32>
    %218 = arith.addf %217, %216 : vector<2x128xf32>
    %219 = arith.divf %217, %218 : vector<2x128xf32>
    %220 = math.tanh %214 : vector<2x128xf32>
    %221 = arith.select %73, %219, %220 : vector<2x128xi1>, vector<2x128xf32>
    %222 = vector.extract_strided_slice %221 {offsets = [0, 0], sizes = [2, 32], strides = [1, 1]} : vector<2x128xf32> to vector<2x32xf32>
    %223 = vector.extract_strided_slice %221 {offsets = [0, 32], sizes = [2, 32], strides = [1, 1]} : vector<2x128xf32> to vector<2x32xf32>
    %224 = vector.extract_strided_slice %221 {offsets = [0, 64], sizes = [2, 32], strides = [1, 1]} : vector<2x128xf32> to vector<2x32xf32>
    %225 = vector.extract_strided_slice %221 {offsets = [0, 96], sizes = [2, 32], strides = [1, 1]} : vector<2x128xf32> to vector<2x32xf32>
    %226 = arith.mulf %223, %189 : vector<2x32xf32>
    %227 = arith.mulf %222, %224 : vector<2x32xf32>
    %228 = arith.addf %226, %227 : vector<2x32xf32>
    %229 = math.tanh %228 : vector<2x32xf32>
    %230 = arith.mulf %225, %229 : vector<2x32xf32>
    %231 = vector.extract_strided_slice %62 {offsets = [0, 4, 0], sizes = [2, 1, 128], strides = [1, 1, 1]} : vector<2x16x128xf32> to vector<2x1x128xf32>
    %232 = vector.shape_cast %231 : vector<2x1x128xf32> to vector<2x128xf32>
    %cst_61 = arith.constant dense<0.000000e+00> : vector<2x128xf32>
    %233 = tpu.matmul %211, %63, %cst_61 {dimension_numbers = #tpu.dot_dimension_numbers<[1], [0], [0], [1], [0, 0, 1, 1], [], []>} : vector<2x32xf32>, vector<32x128xf32>, vector<2x128xf32> -> vector<2x128xf32>
    %234 = arith.addf %232, %233 : vector<2x128xf32>
    %235 = arith.negf %234 : vector<2x128xf32>
    %236 = math.exp %235 : vector<2x128xf32>
    %cst_62 = arith.constant 1.000000e+00 : f32
    %237 = vector.broadcast %cst_62 : f32 to vector<2x128xf32>
    %238 = arith.addf %237, %236 : vector<2x128xf32>
    %239 = arith.divf %237, %238 : vector<2x128xf32>
    %240 = math.tanh %234 : vector<2x128xf32>
    %241 = arith.select %73, %239, %240 : vector<2x128xi1>, vector<2x128xf32>
    %242 = vector.extract_strided_slice %241 {offsets = [0, 0], sizes = [2, 32], strides = [1, 1]} : vector<2x128xf32> to vector<2x32xf32>
    %243 = vector.extract_strided_slice %241 {offsets = [0, 32], sizes = [2, 32], strides = [1, 1]} : vector<2x128xf32> to vector<2x32xf32>
    %244 = vector.extract_strided_slice %241 {offsets = [0, 64], sizes = [2, 32], strides = [1, 1]} : vector<2x128xf32> to vector<2x32xf32>
    %245 = vector.extract_strided_slice %241 {offsets = [0, 96], sizes = [2, 32], strides = [1, 1]} : vector<2x128xf32> to vector<2x32xf32>
    %246 = arith.mulf %243, %209 : vector<2x32xf32>
    %247 = arith.mulf %242, %244 : vector<2x32xf32>
    %248 = arith.addf %246, %247 : vector<2x32xf32>
    %249 = math.tanh %248 : vector<2x32xf32>
    %250 = arith.mulf %245, %249 : vector<2x32xf32>
    %251 = tpu.concatenate %250, %230 in 1 : vector<2x32xf32>, vector<2x32xf32> -> vector<2x64xf32>
    %cst_63 = arith.constant dense<0.000000e+00> : vector<2x128xf32>
    %252 = tpu.matmul %251, %64, %cst_63 {dimension_numbers = #tpu.dot_dimension_numbers<[1], [0], [0], [1], [0, 0, 1, 1], [], []>} : vector<2x64xf32>, vector<64x128xf32>, vector<2x128xf32> -> vector<2x128xf32>
    %253 = arith.addf %252, %67 : vector<2x128xf32>
    %254 = arith.negf %253 : vector<2x128xf32>
    %255 = math.exp %254 : vector<2x128xf32>
    %cst_64 = arith.constant 1.000000e+00 : f32
    %256 = vector.broadcast %cst_64 : f32 to vector<2x128xf32>
    %257 = arith.addf %256, %255 : vector<2x128xf32>
    %258 = arith.divf %256, %257 : vector<2x128xf32>
    %259 = math.tanh %253 : vector<2x128xf32>
    %260 = arith.select %73, %258, %259 : vector<2x128xi1>, vector<2x128xf32>
    %261 = vector.extract_strided_slice %260 {offsets = [0, 0], sizes = [2, 32], strides = [1, 1]} : vector<2x128xf32> to vector<2x32xf32>
    %262 = vector.extract_strided_slice %260 {offsets = [0, 32], sizes = [2, 32], strides = [1, 1]} : vector<2x128xf32> to vector<2x32xf32>
    %263 = vector.extract_strided_slice %260 {offsets = [0, 64], sizes = [2, 32], strides = [1, 1]} : vector<2x128xf32> to vector<2x32xf32>
    %264 = vector.extract_strided_slice %260 {offsets = [0, 96], sizes = [2, 32], strides = [1, 1]} : vector<2x128xf32> to vector<2x32xf32>
    %265 = arith.mulf %262, %228 : vector<2x32xf32>
    %266 = arith.mulf %261, %263 : vector<2x32xf32>
    %267 = arith.addf %265, %266 : vector<2x32xf32>
    %268 = math.tanh %267 : vector<2x32xf32>
    %269 = arith.mulf %264, %268 : vector<2x32xf32>
    %270 = vector.extract_strided_slice %62 {offsets = [0, 5, 0], sizes = [2, 1, 128], strides = [1, 1, 1]} : vector<2x16x128xf32> to vector<2x1x128xf32>
    %271 = vector.shape_cast %270 : vector<2x1x128xf32> to vector<2x128xf32>
    %cst_65 = arith.constant dense<0.000000e+00> : vector<2x128xf32>
    %272 = tpu.matmul %250, %63, %cst_65 {dimension_numbers = #tpu.dot_dimension_numbers<[1], [0], [0], [1], [0, 0, 1, 1], [], []>} : vector<2x32xf32>, vector<32x128xf32>, vector<2x128xf32> -> vector<2x128xf32>
    %273 = arith.addf %271, %272 : vector<2x128xf32>
    %274 = arith.negf %273 : vector<2x128xf32>
    %275 = math.exp %274 : vector<2x128xf32>
    %cst_66 = arith.constant 1.000000e+00 : f32
    %276 = vector.broadcast %cst_66 : f32 to vector<2x128xf32>
    %277 = arith.addf %276, %275 : vector<2x128xf32>
    %278 = arith.divf %276, %277 : vector<2x128xf32>
    %279 = math.tanh %273 : vector<2x128xf32>
    %280 = arith.select %73, %278, %279 : vector<2x128xi1>, vector<2x128xf32>
    %281 = vector.extract_strided_slice %280 {offsets = [0, 0], sizes = [2, 32], strides = [1, 1]} : vector<2x128xf32> to vector<2x32xf32>
    %282 = vector.extract_strided_slice %280 {offsets = [0, 32], sizes = [2, 32], strides = [1, 1]} : vector<2x128xf32> to vector<2x32xf32>
    %283 = vector.extract_strided_slice %280 {offsets = [0, 64], sizes = [2, 32], strides = [1, 1]} : vector<2x128xf32> to vector<2x32xf32>
    %284 = vector.extract_strided_slice %280 {offsets = [0, 96], sizes = [2, 32], strides = [1, 1]} : vector<2x128xf32> to vector<2x32xf32>
    %285 = arith.mulf %282, %248 : vector<2x32xf32>
    %286 = arith.mulf %281, %283 : vector<2x32xf32>
    %287 = arith.addf %285, %286 : vector<2x32xf32>
    %288 = math.tanh %287 : vector<2x32xf32>
    %289 = arith.mulf %284, %288 : vector<2x32xf32>
    %290 = tpu.concatenate %289, %269 in 1 : vector<2x32xf32>, vector<2x32xf32> -> vector<2x64xf32>
    %cst_67 = arith.constant dense<0.000000e+00> : vector<2x128xf32>
    %291 = tpu.matmul %290, %64, %cst_67 {dimension_numbers = #tpu.dot_dimension_numbers<[1], [0], [0], [1], [0, 0, 1, 1], [], []>} : vector<2x64xf32>, vector<64x128xf32>, vector<2x128xf32> -> vector<2x128xf32>
    %292 = arith.addf %291, %67 : vector<2x128xf32>
    %293 = arith.negf %292 : vector<2x128xf32>
    %294 = math.exp %293 : vector<2x128xf32>
    %cst_68 = arith.constant 1.000000e+00 : f32
    %295 = vector.broadcast %cst_68 : f32 to vector<2x128xf32>
    %296 = arith.addf %295, %294 : vector<2x128xf32>
    %297 = arith.divf %295, %296 : vector<2x128xf32>
    %298 = math.tanh %292 : vector<2x128xf32>
    %299 = arith.select %73, %297, %298 : vector<2x128xi1>, vector<2x128xf32>
    %300 = vector.extract_strided_slice %299 {offsets = [0, 0], sizes = [2, 32], strides = [1, 1]} : vector<2x128xf32> to vector<2x32xf32>
    %301 = vector.extract_strided_slice %299 {offsets = [0, 32], sizes = [2, 32], strides = [1, 1]} : vector<2x128xf32> to vector<2x32xf32>
    %302 = vector.extract_strided_slice %299 {offsets = [0, 64], sizes = [2, 32], strides = [1, 1]} : vector<2x128xf32> to vector<2x32xf32>
    %303 = vector.extract_strided_slice %299 {offsets = [0, 96], sizes = [2, 32], strides = [1, 1]} : vector<2x128xf32> to vector<2x32xf32>
    %304 = arith.mulf %301, %267 : vector<2x32xf32>
    %305 = arith.mulf %300, %302 : vector<2x32xf32>
    %306 = arith.addf %304, %305 : vector<2x32xf32>
    %307 = math.tanh %306 : vector<2x32xf32>
    %308 = arith.mulf %303, %307 : vector<2x32xf32>
    %309 = vector.extract_strided_slice %62 {offsets = [0, 6, 0], sizes = [2, 1, 128], strides = [1, 1, 1]} : vector<2x16x128xf32> to vector<2x1x128xf32>
    %310 = vector.shape_cast %309 : vector<2x1x128xf32> to vector<2x128xf32>
    %cst_69 = arith.constant dense<0.000000e+00> : vector<2x128xf32>
    %311 = tpu.matmul %289, %63, %cst_69 {dimension_numbers = #tpu.dot_dimension_numbers<[1], [0], [0], [1], [0, 0, 1, 1], [], []>} : vector<2x32xf32>, vector<32x128xf32>, vector<2x128xf32> -> vector<2x128xf32>
    %312 = arith.addf %310, %311 : vector<2x128xf32>
    %313 = arith.negf %312 : vector<2x128xf32>
    %314 = math.exp %313 : vector<2x128xf32>
    %cst_70 = arith.constant 1.000000e+00 : f32
    %315 = vector.broadcast %cst_70 : f32 to vector<2x128xf32>
    %316 = arith.addf %315, %314 : vector<2x128xf32>
    %317 = arith.divf %315, %316 : vector<2x128xf32>
    %318 = math.tanh %312 : vector<2x128xf32>
    %319 = arith.select %73, %317, %318 : vector<2x128xi1>, vector<2x128xf32>
    %320 = vector.extract_strided_slice %319 {offsets = [0, 0], sizes = [2, 32], strides = [1, 1]} : vector<2x128xf32> to vector<2x32xf32>
    %321 = vector.extract_strided_slice %319 {offsets = [0, 32], sizes = [2, 32], strides = [1, 1]} : vector<2x128xf32> to vector<2x32xf32>
    %322 = vector.extract_strided_slice %319 {offsets = [0, 64], sizes = [2, 32], strides = [1, 1]} : vector<2x128xf32> to vector<2x32xf32>
    %323 = vector.extract_strided_slice %319 {offsets = [0, 96], sizes = [2, 32], strides = [1, 1]} : vector<2x128xf32> to vector<2x32xf32>
    %324 = arith.mulf %321, %287 : vector<2x32xf32>
    %325 = arith.mulf %320, %322 : vector<2x32xf32>
    %326 = arith.addf %324, %325 : vector<2x32xf32>
    %327 = math.tanh %326 : vector<2x32xf32>
    %328 = arith.mulf %323, %327 : vector<2x32xf32>
    %329 = tpu.concatenate %328, %308 in 1 : vector<2x32xf32>, vector<2x32xf32> -> vector<2x64xf32>
    %cst_71 = arith.constant dense<0.000000e+00> : vector<2x128xf32>
    %330 = tpu.matmul %329, %64, %cst_71 {dimension_numbers = #tpu.dot_dimension_numbers<[1], [0], [0], [1], [0, 0, 1, 1], [], []>} : vector<2x64xf32>, vector<64x128xf32>, vector<2x128xf32> -> vector<2x128xf32>
    %331 = arith.addf %330, %67 : vector<2x128xf32>
    %332 = arith.negf %331 : vector<2x128xf32>
    %333 = math.exp %332 : vector<2x128xf32>
    %cst_72 = arith.constant 1.000000e+00 : f32
    %334 = vector.broadcast %cst_72 : f32 to vector<2x128xf32>
    %335 = arith.addf %334, %333 : vector<2x128xf32>
    %336 = arith.divf %334, %335 : vector<2x128xf32>
    %337 = math.tanh %331 : vector<2x128xf32>
    %338 = arith.select %73, %336, %337 : vector<2x128xi1>, vector<2x128xf32>
    %339 = vector.extract_strided_slice %338 {offsets = [0, 0], sizes = [2, 32], strides = [1, 1]} : vector<2x128xf32> to vector<2x32xf32>
    %340 = vector.extract_strided_slice %338 {offsets = [0, 32], sizes = [2, 32], strides = [1, 1]} : vector<2x128xf32> to vector<2x32xf32>
    %341 = vector.extract_strided_slice %338 {offsets = [0, 64], sizes = [2, 32], strides = [1, 1]} : vector<2x128xf32> to vector<2x32xf32>
    %342 = vector.extract_strided_slice %338 {offsets = [0, 96], sizes = [2, 32], strides = [1, 1]} : vector<2x128xf32> to vector<2x32xf32>
    %343 = arith.mulf %340, %306 : vector<2x32xf32>
    %344 = arith.mulf %339, %341 : vector<2x32xf32>
    %345 = arith.addf %343, %344 : vector<2x32xf32>
    %346 = math.tanh %345 : vector<2x32xf32>
    %347 = arith.mulf %342, %346 : vector<2x32xf32>
    %348 = vector.extract_strided_slice %62 {offsets = [0, 7, 0], sizes = [2, 1, 128], strides = [1, 1, 1]} : vector<2x16x128xf32> to vector<2x1x128xf32>
    %349 = vector.shape_cast %348 : vector<2x1x128xf32> to vector<2x128xf32>
    %cst_73 = arith.constant dense<0.000000e+00> : vector<2x128xf32>
    %350 = tpu.matmul %328, %63, %cst_73 {dimension_numbers = #tpu.dot_dimension_numbers<[1], [0], [0], [1], [0, 0, 1, 1], [], []>} : vector<2x32xf32>, vector<32x128xf32>, vector<2x128xf32> -> vector<2x128xf32>
    %351 = arith.addf %349, %350 : vector<2x128xf32>
    %352 = arith.negf %351 : vector<2x128xf32>
    %353 = math.exp %352 : vector<2x128xf32>
    %cst_74 = arith.constant 1.000000e+00 : f32
    %354 = vector.broadcast %cst_74 : f32 to vector<2x128xf32>
    %355 = arith.addf %354, %353 : vector<2x128xf32>
    %356 = arith.divf %354, %355 : vector<2x128xf32>
    %357 = math.tanh %351 : vector<2x128xf32>
    %358 = arith.select %73, %356, %357 : vector<2x128xi1>, vector<2x128xf32>
    %359 = vector.extract_strided_slice %358 {offsets = [0, 0], sizes = [2, 32], strides = [1, 1]} : vector<2x128xf32> to vector<2x32xf32>
    %360 = vector.extract_strided_slice %358 {offsets = [0, 32], sizes = [2, 32], strides = [1, 1]} : vector<2x128xf32> to vector<2x32xf32>
    %361 = vector.extract_strided_slice %358 {offsets = [0, 64], sizes = [2, 32], strides = [1, 1]} : vector<2x128xf32> to vector<2x32xf32>
    %362 = vector.extract_strided_slice %358 {offsets = [0, 96], sizes = [2, 32], strides = [1, 1]} : vector<2x128xf32> to vector<2x32xf32>
    %363 = arith.mulf %360, %326 : vector<2x32xf32>
    %364 = arith.mulf %359, %361 : vector<2x32xf32>
    %365 = arith.addf %363, %364 : vector<2x32xf32>
    %366 = math.tanh %365 : vector<2x32xf32>
    %367 = arith.mulf %362, %366 : vector<2x32xf32>
    %368 = tpu.concatenate %367, %347 in 1 : vector<2x32xf32>, vector<2x32xf32> -> vector<2x64xf32>
    %cst_75 = arith.constant dense<0.000000e+00> : vector<2x128xf32>
    %369 = tpu.matmul %368, %64, %cst_75 {dimension_numbers = #tpu.dot_dimension_numbers<[1], [0], [0], [1], [0, 0, 1, 1], [], []>} : vector<2x64xf32>, vector<64x128xf32>, vector<2x128xf32> -> vector<2x128xf32>
    %370 = arith.addf %369, %67 : vector<2x128xf32>
    %371 = arith.negf %370 : vector<2x128xf32>
    %372 = math.exp %371 : vector<2x128xf32>
    %cst_76 = arith.constant 1.000000e+00 : f32
    %373 = vector.broadcast %cst_76 : f32 to vector<2x128xf32>
    %374 = arith.addf %373, %372 : vector<2x128xf32>
    %375 = arith.divf %373, %374 : vector<2x128xf32>
    %376 = math.tanh %370 : vector<2x128xf32>
    %377 = arith.select %73, %375, %376 : vector<2x128xi1>, vector<2x128xf32>
    %378 = vector.extract_strided_slice %377 {offsets = [0, 0], sizes = [2, 32], strides = [1, 1]} : vector<2x128xf32> to vector<2x32xf32>
    %379 = vector.extract_strided_slice %377 {offsets = [0, 32], sizes = [2, 32], strides = [1, 1]} : vector<2x128xf32> to vector<2x32xf32>
    %380 = vector.extract_strided_slice %377 {offsets = [0, 64], sizes = [2, 32], strides = [1, 1]} : vector<2x128xf32> to vector<2x32xf32>
    %381 = vector.extract_strided_slice %377 {offsets = [0, 96], sizes = [2, 32], strides = [1, 1]} : vector<2x128xf32> to vector<2x32xf32>
    %382 = arith.mulf %379, %345 : vector<2x32xf32>
    %383 = arith.mulf %378, %380 : vector<2x32xf32>
    %384 = arith.addf %382, %383 : vector<2x32xf32>
    %385 = math.tanh %384 : vector<2x32xf32>
    %386 = arith.mulf %381, %385 : vector<2x32xf32>
    %387 = vector.extract_strided_slice %62 {offsets = [0, 8, 0], sizes = [2, 1, 128], strides = [1, 1, 1]} : vector<2x16x128xf32> to vector<2x1x128xf32>
    %388 = vector.shape_cast %387 : vector<2x1x128xf32> to vector<2x128xf32>
    %cst_77 = arith.constant dense<0.000000e+00> : vector<2x128xf32>
    %389 = tpu.matmul %367, %63, %cst_77 {dimension_numbers = #tpu.dot_dimension_numbers<[1], [0], [0], [1], [0, 0, 1, 1], [], []>} : vector<2x32xf32>, vector<32x128xf32>, vector<2x128xf32> -> vector<2x128xf32>
    %390 = arith.addf %388, %389 : vector<2x128xf32>
    %391 = arith.negf %390 : vector<2x128xf32>
    %392 = math.exp %391 : vector<2x128xf32>
    %cst_78 = arith.constant 1.000000e+00 : f32
    %393 = vector.broadcast %cst_78 : f32 to vector<2x128xf32>
    %394 = arith.addf %393, %392 : vector<2x128xf32>
    %395 = arith.divf %393, %394 : vector<2x128xf32>
    %396 = math.tanh %390 : vector<2x128xf32>
    %397 = arith.select %73, %395, %396 : vector<2x128xi1>, vector<2x128xf32>
    %398 = vector.extract_strided_slice %397 {offsets = [0, 0], sizes = [2, 32], strides = [1, 1]} : vector<2x128xf32> to vector<2x32xf32>
    %399 = vector.extract_strided_slice %397 {offsets = [0, 32], sizes = [2, 32], strides = [1, 1]} : vector<2x128xf32> to vector<2x32xf32>
    %400 = vector.extract_strided_slice %397 {offsets = [0, 64], sizes = [2, 32], strides = [1, 1]} : vector<2x128xf32> to vector<2x32xf32>
    %401 = vector.extract_strided_slice %397 {offsets = [0, 96], sizes = [2, 32], strides = [1, 1]} : vector<2x128xf32> to vector<2x32xf32>
    %402 = arith.mulf %399, %365 : vector<2x32xf32>
    %403 = arith.mulf %398, %400 : vector<2x32xf32>
    %404 = arith.addf %402, %403 : vector<2x32xf32>
    %405 = math.tanh %404 : vector<2x32xf32>
    %406 = arith.mulf %401, %405 : vector<2x32xf32>
    %407 = tpu.concatenate %406, %386 in 1 : vector<2x32xf32>, vector<2x32xf32> -> vector<2x64xf32>
    %cst_79 = arith.constant dense<0.000000e+00> : vector<2x128xf32>
    %408 = tpu.matmul %407, %64, %cst_79 {dimension_numbers = #tpu.dot_dimension_numbers<[1], [0], [0], [1], [0, 0, 1, 1], [], []>} : vector<2x64xf32>, vector<64x128xf32>, vector<2x128xf32> -> vector<2x128xf32>
    %409 = arith.addf %408, %67 : vector<2x128xf32>
    %410 = arith.negf %409 : vector<2x128xf32>
    %411 = math.exp %410 : vector<2x128xf32>
    %cst_80 = arith.constant 1.000000e+00 : f32
    %412 = vector.broadcast %cst_80 : f32 to vector<2x128xf32>
    %413 = arith.addf %412, %411 : vector<2x128xf32>
    %414 = arith.divf %412, %413 : vector<2x128xf32>
    %415 = math.tanh %409 : vector<2x128xf32>
    %416 = arith.select %73, %414, %415 : vector<2x128xi1>, vector<2x128xf32>
    %417 = vector.extract_strided_slice %416 {offsets = [0, 0], sizes = [2, 32], strides = [1, 1]} : vector<2x128xf32> to vector<2x32xf32>
    %418 = vector.extract_strided_slice %416 {offsets = [0, 32], sizes = [2, 32], strides = [1, 1]} : vector<2x128xf32> to vector<2x32xf32>
    %419 = vector.extract_strided_slice %416 {offsets = [0, 64], sizes = [2, 32], strides = [1, 1]} : vector<2x128xf32> to vector<2x32xf32>
    %420 = vector.extract_strided_slice %416 {offsets = [0, 96], sizes = [2, 32], strides = [1, 1]} : vector<2x128xf32> to vector<2x32xf32>
    %421 = arith.mulf %418, %384 : vector<2x32xf32>
    %422 = arith.mulf %417, %419 : vector<2x32xf32>
    %423 = arith.addf %421, %422 : vector<2x32xf32>
    %424 = math.tanh %423 : vector<2x32xf32>
    %425 = arith.mulf %420, %424 : vector<2x32xf32>
    %426 = vector.extract_strided_slice %62 {offsets = [0, 9, 0], sizes = [2, 1, 128], strides = [1, 1, 1]} : vector<2x16x128xf32> to vector<2x1x128xf32>
    %427 = vector.shape_cast %426 : vector<2x1x128xf32> to vector<2x128xf32>
    %cst_81 = arith.constant dense<0.000000e+00> : vector<2x128xf32>
    %428 = tpu.matmul %406, %63, %cst_81 {dimension_numbers = #tpu.dot_dimension_numbers<[1], [0], [0], [1], [0, 0, 1, 1], [], []>} : vector<2x32xf32>, vector<32x128xf32>, vector<2x128xf32> -> vector<2x128xf32>
    %429 = arith.addf %427, %428 : vector<2x128xf32>
    %430 = arith.negf %429 : vector<2x128xf32>
    %431 = math.exp %430 : vector<2x128xf32>
    %cst_82 = arith.constant 1.000000e+00 : f32
    %432 = vector.broadcast %cst_82 : f32 to vector<2x128xf32>
    %433 = arith.addf %432, %431 : vector<2x128xf32>
    %434 = arith.divf %432, %433 : vector<2x128xf32>
    %435 = math.tanh %429 : vector<2x128xf32>
    %436 = arith.select %73, %434, %435 : vector<2x128xi1>, vector<2x128xf32>
    %437 = vector.extract_strided_slice %436 {offsets = [0, 0], sizes = [2, 32], strides = [1, 1]} : vector<2x128xf32> to vector<2x32xf32>
    %438 = vector.extract_strided_slice %436 {offsets = [0, 32], sizes = [2, 32], strides = [1, 1]} : vector<2x128xf32> to vector<2x32xf32>
    %439 = vector.extract_strided_slice %436 {offsets = [0, 64], sizes = [2, 32], strides = [1, 1]} : vector<2x128xf32> to vector<2x32xf32>
    %440 = vector.extract_strided_slice %436 {offsets = [0, 96], sizes = [2, 32], strides = [1, 1]} : vector<2x128xf32> to vector<2x32xf32>
    %441 = arith.mulf %438, %404 : vector<2x32xf32>
    %442 = arith.mulf %437, %439 : vector<2x32xf32>
    %443 = arith.addf %441, %442 : vector<2x32xf32>
    %444 = math.tanh %443 : vector<2x32xf32>
    %445 = arith.mulf %440, %444 : vector<2x32xf32>
    %446 = tpu.concatenate %445, %425 in 1 : vector<2x32xf32>, vector<2x32xf32> -> vector<2x64xf32>
    %cst_83 = arith.constant dense<0.000000e+00> : vector<2x128xf32>
    %447 = tpu.matmul %446, %64, %cst_83 {dimension_numbers = #tpu.dot_dimension_numbers<[1], [0], [0], [1], [0, 0, 1, 1], [], []>} : vector<2x64xf32>, vector<64x128xf32>, vector<2x128xf32> -> vector<2x128xf32>
    %448 = arith.addf %447, %67 : vector<2x128xf32>
    %449 = arith.negf %448 : vector<2x128xf32>
    %450 = math.exp %449 : vector<2x128xf32>
    %cst_84 = arith.constant 1.000000e+00 : f32
    %451 = vector.broadcast %cst_84 : f32 to vector<2x128xf32>
    %452 = arith.addf %451, %450 : vector<2x128xf32>
    %453 = arith.divf %451, %452 : vector<2x128xf32>
    %454 = math.tanh %448 : vector<2x128xf32>
    %455 = arith.select %73, %453, %454 : vector<2x128xi1>, vector<2x128xf32>
    %456 = vector.extract_strided_slice %455 {offsets = [0, 0], sizes = [2, 32], strides = [1, 1]} : vector<2x128xf32> to vector<2x32xf32>
    %457 = vector.extract_strided_slice %455 {offsets = [0, 32], sizes = [2, 32], strides = [1, 1]} : vector<2x128xf32> to vector<2x32xf32>
    %458 = vector.extract_strided_slice %455 {offsets = [0, 64], sizes = [2, 32], strides = [1, 1]} : vector<2x128xf32> to vector<2x32xf32>
    %459 = vector.extract_strided_slice %455 {offsets = [0, 96], sizes = [2, 32], strides = [1, 1]} : vector<2x128xf32> to vector<2x32xf32>
    %460 = arith.mulf %457, %423 : vector<2x32xf32>
    %461 = arith.mulf %456, %458 : vector<2x32xf32>
    %462 = arith.addf %460, %461 : vector<2x32xf32>
    %463 = math.tanh %462 : vector<2x32xf32>
    %464 = arith.mulf %459, %463 : vector<2x32xf32>
    %465 = vector.extract_strided_slice %62 {offsets = [0, 10, 0], sizes = [2, 1, 128], strides = [1, 1, 1]} : vector<2x16x128xf32> to vector<2x1x128xf32>
    %466 = vector.shape_cast %465 : vector<2x1x128xf32> to vector<2x128xf32>
    %cst_85 = arith.constant dense<0.000000e+00> : vector<2x128xf32>
    %467 = tpu.matmul %445, %63, %cst_85 {dimension_numbers = #tpu.dot_dimension_numbers<[1], [0], [0], [1], [0, 0, 1, 1], [], []>} : vector<2x32xf32>, vector<32x128xf32>, vector<2x128xf32> -> vector<2x128xf32>
    %468 = arith.addf %466, %467 : vector<2x128xf32>
    %469 = arith.negf %468 : vector<2x128xf32>
    %470 = math.exp %469 : vector<2x128xf32>
    %cst_86 = arith.constant 1.000000e+00 : f32
    %471 = vector.broadcast %cst_86 : f32 to vector<2x128xf32>
    %472 = arith.addf %471, %470 : vector<2x128xf32>
    %473 = arith.divf %471, %472 : vector<2x128xf32>
    %474 = math.tanh %468 : vector<2x128xf32>
    %475 = arith.select %73, %473, %474 : vector<2x128xi1>, vector<2x128xf32>
    %476 = vector.extract_strided_slice %475 {offsets = [0, 0], sizes = [2, 32], strides = [1, 1]} : vector<2x128xf32> to vector<2x32xf32>
    %477 = vector.extract_strided_slice %475 {offsets = [0, 32], sizes = [2, 32], strides = [1, 1]} : vector<2x128xf32> to vector<2x32xf32>
    %478 = vector.extract_strided_slice %475 {offsets = [0, 64], sizes = [2, 32], strides = [1, 1]} : vector<2x128xf32> to vector<2x32xf32>
    %479 = vector.extract_strided_slice %475 {offsets = [0, 96], sizes = [2, 32], strides = [1, 1]} : vector<2x128xf32> to vector<2x32xf32>
    %480 = arith.mulf %477, %443 : vector<2x32xf32>
    %481 = arith.mulf %476, %478 : vector<2x32xf32>
    %482 = arith.addf %480, %481 : vector<2x32xf32>
    %483 = math.tanh %482 : vector<2x32xf32>
    %484 = arith.mulf %479, %483 : vector<2x32xf32>
    %485 = tpu.concatenate %484, %464 in 1 : vector<2x32xf32>, vector<2x32xf32> -> vector<2x64xf32>
    %cst_87 = arith.constant dense<0.000000e+00> : vector<2x128xf32>
    %486 = tpu.matmul %485, %64, %cst_87 {dimension_numbers = #tpu.dot_dimension_numbers<[1], [0], [0], [1], [0, 0, 1, 1], [], []>} : vector<2x64xf32>, vector<64x128xf32>, vector<2x128xf32> -> vector<2x128xf32>
    %487 = arith.addf %486, %67 : vector<2x128xf32>
    %488 = arith.negf %487 : vector<2x128xf32>
    %489 = math.exp %488 : vector<2x128xf32>
    %cst_88 = arith.constant 1.000000e+00 : f32
    %490 = vector.broadcast %cst_88 : f32 to vector<2x128xf32>
    %491 = arith.addf %490, %489 : vector<2x128xf32>
    %492 = arith.divf %490, %491 : vector<2x128xf32>
    %493 = math.tanh %487 : vector<2x128xf32>
    %494 = arith.select %73, %492, %493 : vector<2x128xi1>, vector<2x128xf32>
    %495 = vector.extract_strided_slice %494 {offsets = [0, 0], sizes = [2, 32], strides = [1, 1]} : vector<2x128xf32> to vector<2x32xf32>
    %496 = vector.extract_strided_slice %494 {offsets = [0, 32], sizes = [2, 32], strides = [1, 1]} : vector<2x128xf32> to vector<2x32xf32>
    %497 = vector.extract_strided_slice %494 {offsets = [0, 64], sizes = [2, 32], strides = [1, 1]} : vector<2x128xf32> to vector<2x32xf32>
    %498 = vector.extract_strided_slice %494 {offsets = [0, 96], sizes = [2, 32], strides = [1, 1]} : vector<2x128xf32> to vector<2x32xf32>
    %499 = arith.mulf %496, %462 : vector<2x32xf32>
    %500 = arith.mulf %495, %497 : vector<2x32xf32>
    %501 = arith.addf %499, %500 : vector<2x32xf32>
    %502 = math.tanh %501 : vector<2x32xf32>
    %503 = arith.mulf %498, %502 : vector<2x32xf32>
    %504 = vector.extract_strided_slice %62 {offsets = [0, 11, 0], sizes = [2, 1, 128], strides = [1, 1, 1]} : vector<2x16x128xf32> to vector<2x1x128xf32>
    %505 = vector.shape_cast %504 : vector<2x1x128xf32> to vector<2x128xf32>
    %cst_89 = arith.constant dense<0.000000e+00> : vector<2x128xf32>
    %506 = tpu.matmul %484, %63, %cst_89 {dimension_numbers = #tpu.dot_dimension_numbers<[1], [0], [0], [1], [0, 0, 1, 1], [], []>} : vector<2x32xf32>, vector<32x128xf32>, vector<2x128xf32> -> vector<2x128xf32>
    %507 = arith.addf %505, %506 : vector<2x128xf32>
    %508 = arith.negf %507 : vector<2x128xf32>
    %509 = math.exp %508 : vector<2x128xf32>
    %cst_90 = arith.constant 1.000000e+00 : f32
    %510 = vector.broadcast %cst_90 : f32 to vector<2x128xf32>
    %511 = arith.addf %510, %509 : vector<2x128xf32>
    %512 = arith.divf %510, %511 : vector<2x128xf32>
    %513 = math.tanh %507 : vector<2x128xf32>
    %514 = arith.select %73, %512, %513 : vector<2x128xi1>, vector<2x128xf32>
    %515 = vector.extract_strided_slice %514 {offsets = [0, 0], sizes = [2, 32], strides = [1, 1]} : vector<2x128xf32> to vector<2x32xf32>
    %516 = vector.extract_strided_slice %514 {offsets = [0, 32], sizes = [2, 32], strides = [1, 1]} : vector<2x128xf32> to vector<2x32xf32>
    %517 = vector.extract_strided_slice %514 {offsets = [0, 64], sizes = [2, 32], strides = [1, 1]} : vector<2x128xf32> to vector<2x32xf32>
    %518 = vector.extract_strided_slice %514 {offsets = [0, 96], sizes = [2, 32], strides = [1, 1]} : vector<2x128xf32> to vector<2x32xf32>
    %519 = arith.mulf %516, %482 : vector<2x32xf32>
    %520 = arith.mulf %515, %517 : vector<2x32xf32>
    %521 = arith.addf %519, %520 : vector<2x32xf32>
    %522 = math.tanh %521 : vector<2x32xf32>
    %523 = arith.mulf %518, %522 : vector<2x32xf32>
    %524 = tpu.concatenate %523, %503 in 1 : vector<2x32xf32>, vector<2x32xf32> -> vector<2x64xf32>
    %cst_91 = arith.constant dense<0.000000e+00> : vector<2x128xf32>
    %525 = tpu.matmul %524, %64, %cst_91 {dimension_numbers = #tpu.dot_dimension_numbers<[1], [0], [0], [1], [0, 0, 1, 1], [], []>} : vector<2x64xf32>, vector<64x128xf32>, vector<2x128xf32> -> vector<2x128xf32>
    %526 = arith.addf %525, %67 : vector<2x128xf32>
    %527 = arith.negf %526 : vector<2x128xf32>
    %528 = math.exp %527 : vector<2x128xf32>
    %cst_92 = arith.constant 1.000000e+00 : f32
    %529 = vector.broadcast %cst_92 : f32 to vector<2x128xf32>
    %530 = arith.addf %529, %528 : vector<2x128xf32>
    %531 = arith.divf %529, %530 : vector<2x128xf32>
    %532 = math.tanh %526 : vector<2x128xf32>
    %533 = arith.select %73, %531, %532 : vector<2x128xi1>, vector<2x128xf32>
    %534 = vector.extract_strided_slice %533 {offsets = [0, 0], sizes = [2, 32], strides = [1, 1]} : vector<2x128xf32> to vector<2x32xf32>
    %535 = vector.extract_strided_slice %533 {offsets = [0, 32], sizes = [2, 32], strides = [1, 1]} : vector<2x128xf32> to vector<2x32xf32>
    %536 = vector.extract_strided_slice %533 {offsets = [0, 64], sizes = [2, 32], strides = [1, 1]} : vector<2x128xf32> to vector<2x32xf32>
    %537 = vector.extract_strided_slice %533 {offsets = [0, 96], sizes = [2, 32], strides = [1, 1]} : vector<2x128xf32> to vector<2x32xf32>
    %538 = arith.mulf %535, %501 : vector<2x32xf32>
    %539 = arith.mulf %534, %536 : vector<2x32xf32>
    %540 = arith.addf %538, %539 : vector<2x32xf32>
    %541 = math.tanh %540 : vector<2x32xf32>
    %542 = arith.mulf %537, %541 : vector<2x32xf32>
    %543 = vector.extract_strided_slice %62 {offsets = [0, 12, 0], sizes = [2, 1, 128], strides = [1, 1, 1]} : vector<2x16x128xf32> to vector<2x1x128xf32>
    %544 = vector.shape_cast %543 : vector<2x1x128xf32> to vector<2x128xf32>
    %cst_93 = arith.constant dense<0.000000e+00> : vector<2x128xf32>
    %545 = tpu.matmul %523, %63, %cst_93 {dimension_numbers = #tpu.dot_dimension_numbers<[1], [0], [0], [1], [0, 0, 1, 1], [], []>} : vector<2x32xf32>, vector<32x128xf32>, vector<2x128xf32> -> vector<2x128xf32>
    %546 = arith.addf %544, %545 : vector<2x128xf32>
    %547 = arith.negf %546 : vector<2x128xf32>
    %548 = math.exp %547 : vector<2x128xf32>
    %cst_94 = arith.constant 1.000000e+00 : f32
    %549 = vector.broadcast %cst_94 : f32 to vector<2x128xf32>
    %550 = arith.addf %549, %548 : vector<2x128xf32>
    %551 = arith.divf %549, %550 : vector<2x128xf32>
    %552 = math.tanh %546 : vector<2x128xf32>
    %553 = arith.select %73, %551, %552 : vector<2x128xi1>, vector<2x128xf32>
    %554 = vector.extract_strided_slice %553 {offsets = [0, 0], sizes = [2, 32], strides = [1, 1]} : vector<2x128xf32> to vector<2x32xf32>
    %555 = vector.extract_strided_slice %553 {offsets = [0, 32], sizes = [2, 32], strides = [1, 1]} : vector<2x128xf32> to vector<2x32xf32>
    %556 = vector.extract_strided_slice %553 {offsets = [0, 64], sizes = [2, 32], strides = [1, 1]} : vector<2x128xf32> to vector<2x32xf32>
    %557 = vector.extract_strided_slice %553 {offsets = [0, 96], sizes = [2, 32], strides = [1, 1]} : vector<2x128xf32> to vector<2x32xf32>
    %558 = arith.mulf %555, %521 : vector<2x32xf32>
    %559 = arith.mulf %554, %556 : vector<2x32xf32>
    %560 = arith.addf %558, %559 : vector<2x32xf32>
    %561 = math.tanh %560 : vector<2x32xf32>
    %562 = arith.mulf %557, %561 : vector<2x32xf32>
    %563 = tpu.concatenate %562, %542 in 1 : vector<2x32xf32>, vector<2x32xf32> -> vector<2x64xf32>
    %cst_95 = arith.constant dense<0.000000e+00> : vector<2x128xf32>
    %564 = tpu.matmul %563, %64, %cst_95 {dimension_numbers = #tpu.dot_dimension_numbers<[1], [0], [0], [1], [0, 0, 1, 1], [], []>} : vector<2x64xf32>, vector<64x128xf32>, vector<2x128xf32> -> vector<2x128xf32>
    %565 = arith.addf %564, %67 : vector<2x128xf32>
    %566 = arith.negf %565 : vector<2x128xf32>
    %567 = math.exp %566 : vector<2x128xf32>
    %cst_96 = arith.constant 1.000000e+00 : f32
    %568 = vector.broadcast %cst_96 : f32 to vector<2x128xf32>
    %569 = arith.addf %568, %567 : vector<2x128xf32>
    %570 = arith.divf %568, %569 : vector<2x128xf32>
    %571 = math.tanh %565 : vector<2x128xf32>
    %572 = arith.select %73, %570, %571 : vector<2x128xi1>, vector<2x128xf32>
    %573 = vector.extract_strided_slice %572 {offsets = [0, 0], sizes = [2, 32], strides = [1, 1]} : vector<2x128xf32> to vector<2x32xf32>
    %574 = vector.extract_strided_slice %572 {offsets = [0, 32], sizes = [2, 32], strides = [1, 1]} : vector<2x128xf32> to vector<2x32xf32>
    %575 = vector.extract_strided_slice %572 {offsets = [0, 64], sizes = [2, 32], strides = [1, 1]} : vector<2x128xf32> to vector<2x32xf32>
    %576 = vector.extract_strided_slice %572 {offsets = [0, 96], sizes = [2, 32], strides = [1, 1]} : vector<2x128xf32> to vector<2x32xf32>
    %577 = arith.mulf %574, %540 : vector<2x32xf32>
    %578 = arith.mulf %573, %575 : vector<2x32xf32>
    %579 = arith.addf %577, %578 : vector<2x32xf32>
    %580 = math.tanh %579 : vector<2x32xf32>
    %581 = arith.mulf %576, %580 : vector<2x32xf32>
    %582 = vector.extract_strided_slice %62 {offsets = [0, 13, 0], sizes = [2, 1, 128], strides = [1, 1, 1]} : vector<2x16x128xf32> to vector<2x1x128xf32>
    %583 = vector.shape_cast %582 : vector<2x1x128xf32> to vector<2x128xf32>
    %cst_97 = arith.constant dense<0.000000e+00> : vector<2x128xf32>
    %584 = tpu.matmul %562, %63, %cst_97 {dimension_numbers = #tpu.dot_dimension_numbers<[1], [0], [0], [1], [0, 0, 1, 1], [], []>} : vector<2x32xf32>, vector<32x128xf32>, vector<2x128xf32> -> vector<2x128xf32>
    %585 = arith.addf %583, %584 : vector<2x128xf32>
    %586 = arith.negf %585 : vector<2x128xf32>
    %587 = math.exp %586 : vector<2x128xf32>
    %cst_98 = arith.constant 1.000000e+00 : f32
    %588 = vector.broadcast %cst_98 : f32 to vector<2x128xf32>
    %589 = arith.addf %588, %587 : vector<2x128xf32>
    %590 = arith.divf %588, %589 : vector<2x128xf32>
    %591 = math.tanh %585 : vector<2x128xf32>
    %592 = arith.select %73, %590, %591 : vector<2x128xi1>, vector<2x128xf32>
    %593 = vector.extract_strided_slice %592 {offsets = [0, 0], sizes = [2, 32], strides = [1, 1]} : vector<2x128xf32> to vector<2x32xf32>
    %594 = vector.extract_strided_slice %592 {offsets = [0, 32], sizes = [2, 32], strides = [1, 1]} : vector<2x128xf32> to vector<2x32xf32>
    %595 = vector.extract_strided_slice %592 {offsets = [0, 64], sizes = [2, 32], strides = [1, 1]} : vector<2x128xf32> to vector<2x32xf32>
    %596 = vector.extract_strided_slice %592 {offsets = [0, 96], sizes = [2, 32], strides = [1, 1]} : vector<2x128xf32> to vector<2x32xf32>
    %597 = arith.mulf %594, %560 : vector<2x32xf32>
    %598 = arith.mulf %593, %595 : vector<2x32xf32>
    %599 = arith.addf %597, %598 : vector<2x32xf32>
    %600 = math.tanh %599 : vector<2x32xf32>
    %601 = arith.mulf %596, %600 : vector<2x32xf32>
    %602 = tpu.concatenate %601, %581 in 1 : vector<2x32xf32>, vector<2x32xf32> -> vector<2x64xf32>
    %cst_99 = arith.constant dense<0.000000e+00> : vector<2x128xf32>
    %603 = tpu.matmul %602, %64, %cst_99 {dimension_numbers = #tpu.dot_dimension_numbers<[1], [0], [0], [1], [0, 0, 1, 1], [], []>} : vector<2x64xf32>, vector<64x128xf32>, vector<2x128xf32> -> vector<2x128xf32>
    %604 = arith.addf %603, %67 : vector<2x128xf32>
    %605 = arith.negf %604 : vector<2x128xf32>
    %606 = math.exp %605 : vector<2x128xf32>
    %cst_100 = arith.constant 1.000000e+00 : f32
    %607 = vector.broadcast %cst_100 : f32 to vector<2x128xf32>
    %608 = arith.addf %607, %606 : vector<2x128xf32>
    %609 = arith.divf %607, %608 : vector<2x128xf32>
    %610 = math.tanh %604 : vector<2x128xf32>
    %611 = arith.select %73, %609, %610 : vector<2x128xi1>, vector<2x128xf32>
    %612 = vector.extract_strided_slice %611 {offsets = [0, 0], sizes = [2, 32], strides = [1, 1]} : vector<2x128xf32> to vector<2x32xf32>
    %613 = vector.extract_strided_slice %611 {offsets = [0, 32], sizes = [2, 32], strides = [1, 1]} : vector<2x128xf32> to vector<2x32xf32>
    %614 = vector.extract_strided_slice %611 {offsets = [0, 64], sizes = [2, 32], strides = [1, 1]} : vector<2x128xf32> to vector<2x32xf32>
    %615 = vector.extract_strided_slice %611 {offsets = [0, 96], sizes = [2, 32], strides = [1, 1]} : vector<2x128xf32> to vector<2x32xf32>
    %616 = arith.mulf %613, %579 : vector<2x32xf32>
    %617 = arith.mulf %612, %614 : vector<2x32xf32>
    %618 = arith.addf %616, %617 : vector<2x32xf32>
    %619 = math.tanh %618 : vector<2x32xf32>
    %620 = arith.mulf %615, %619 : vector<2x32xf32>
    %621 = vector.extract_strided_slice %62 {offsets = [0, 14, 0], sizes = [2, 1, 128], strides = [1, 1, 1]} : vector<2x16x128xf32> to vector<2x1x128xf32>
    %622 = vector.shape_cast %621 : vector<2x1x128xf32> to vector<2x128xf32>
    %cst_101 = arith.constant dense<0.000000e+00> : vector<2x128xf32>
    %623 = tpu.matmul %601, %63, %cst_101 {dimension_numbers = #tpu.dot_dimension_numbers<[1], [0], [0], [1], [0, 0, 1, 1], [], []>} : vector<2x32xf32>, vector<32x128xf32>, vector<2x128xf32> -> vector<2x128xf32>
    %624 = arith.addf %622, %623 : vector<2x128xf32>
    %625 = arith.negf %624 : vector<2x128xf32>
    %626 = math.exp %625 : vector<2x128xf32>
    %cst_102 = arith.constant 1.000000e+00 : f32
    %627 = vector.broadcast %cst_102 : f32 to vector<2x128xf32>
    %628 = arith.addf %627, %626 : vector<2x128xf32>
    %629 = arith.divf %627, %628 : vector<2x128xf32>
    %630 = math.tanh %624 : vector<2x128xf32>
    %631 = arith.select %73, %629, %630 : vector<2x128xi1>, vector<2x128xf32>
    %632 = vector.extract_strided_slice %631 {offsets = [0, 0], sizes = [2, 32], strides = [1, 1]} : vector<2x128xf32> to vector<2x32xf32>
    %633 = vector.extract_strided_slice %631 {offsets = [0, 32], sizes = [2, 32], strides = [1, 1]} : vector<2x128xf32> to vector<2x32xf32>
    %634 = vector.extract_strided_slice %631 {offsets = [0, 64], sizes = [2, 32], strides = [1, 1]} : vector<2x128xf32> to vector<2x32xf32>
    %635 = vector.extract_strided_slice %631 {offsets = [0, 96], sizes = [2, 32], strides = [1, 1]} : vector<2x128xf32> to vector<2x32xf32>
    %636 = arith.mulf %633, %599 : vector<2x32xf32>
    %637 = arith.mulf %632, %634 : vector<2x32xf32>
    %638 = arith.addf %636, %637 : vector<2x32xf32>
    %639 = math.tanh %638 : vector<2x32xf32>
    %640 = arith.mulf %635, %639 : vector<2x32xf32>
    %641 = tpu.concatenate %640, %620 in 1 : vector<2x32xf32>, vector<2x32xf32> -> vector<2x64xf32>
    %cst_103 = arith.constant dense<0.000000e+00> : vector<2x128xf32>
    %642 = tpu.matmul %641, %64, %cst_103 {dimension_numbers = #tpu.dot_dimension_numbers<[1], [0], [0], [1], [0, 0, 1, 1], [], []>} : vector<2x64xf32>, vector<64x128xf32>, vector<2x128xf32> -> vector<2x128xf32>
    %643 = arith.addf %642, %67 : vector<2x128xf32>
    %644 = arith.negf %643 : vector<2x128xf32>
    %645 = math.exp %644 : vector<2x128xf32>
    %cst_104 = arith.constant 1.000000e+00 : f32
    %646 = vector.broadcast %cst_104 : f32 to vector<2x128xf32>
    %647 = arith.addf %646, %645 : vector<2x128xf32>
    %648 = arith.divf %646, %647 : vector<2x128xf32>
    %649 = math.tanh %643 : vector<2x128xf32>
    %650 = arith.select %73, %648, %649 : vector<2x128xi1>, vector<2x128xf32>
    %651 = vector.extract_strided_slice %650 {offsets = [0, 0], sizes = [2, 32], strides = [1, 1]} : vector<2x128xf32> to vector<2x32xf32>
    %652 = vector.extract_strided_slice %650 {offsets = [0, 32], sizes = [2, 32], strides = [1, 1]} : vector<2x128xf32> to vector<2x32xf32>
    %653 = vector.extract_strided_slice %650 {offsets = [0, 64], sizes = [2, 32], strides = [1, 1]} : vector<2x128xf32> to vector<2x32xf32>
    %654 = vector.extract_strided_slice %650 {offsets = [0, 96], sizes = [2, 32], strides = [1, 1]} : vector<2x128xf32> to vector<2x32xf32>
    %655 = arith.mulf %652, %618 : vector<2x32xf32>
    %656 = arith.mulf %651, %653 : vector<2x32xf32>
    %657 = arith.addf %655, %656 : vector<2x32xf32>
    %658 = math.tanh %657 : vector<2x32xf32>
    %659 = arith.mulf %654, %658 : vector<2x32xf32>
    %660 = vector.extract_strided_slice %62 {offsets = [0, 15, 0], sizes = [2, 1, 128], strides = [1, 1, 1]} : vector<2x16x128xf32> to vector<2x1x128xf32>
    %661 = vector.shape_cast %660 : vector<2x1x128xf32> to vector<2x128xf32>
    %cst_105 = arith.constant dense<0.000000e+00> : vector<2x128xf32>
    %662 = tpu.matmul %640, %63, %cst_105 {dimension_numbers = #tpu.dot_dimension_numbers<[1], [0], [0], [1], [0, 0, 1, 1], [], []>} : vector<2x32xf32>, vector<32x128xf32>, vector<2x128xf32> -> vector<2x128xf32>
    %663 = arith.addf %661, %662 : vector<2x128xf32>
    %664 = arith.negf %663 : vector<2x128xf32>
    %665 = math.exp %664 : vector<2x128xf32>
    %cst_106 = arith.constant 1.000000e+00 : f32
    %666 = vector.broadcast %cst_106 : f32 to vector<2x128xf32>
    %667 = arith.addf %666, %665 : vector<2x128xf32>
    %668 = arith.divf %666, %667 : vector<2x128xf32>
    %669 = math.tanh %663 : vector<2x128xf32>
    %670 = arith.select %73, %668, %669 : vector<2x128xi1>, vector<2x128xf32>
    %671 = vector.extract_strided_slice %670 {offsets = [0, 0], sizes = [2, 32], strides = [1, 1]} : vector<2x128xf32> to vector<2x32xf32>
    %672 = vector.extract_strided_slice %670 {offsets = [0, 32], sizes = [2, 32], strides = [1, 1]} : vector<2x128xf32> to vector<2x32xf32>
    %673 = vector.extract_strided_slice %670 {offsets = [0, 64], sizes = [2, 32], strides = [1, 1]} : vector<2x128xf32> to vector<2x32xf32>
    %674 = vector.extract_strided_slice %670 {offsets = [0, 96], sizes = [2, 32], strides = [1, 1]} : vector<2x128xf32> to vector<2x32xf32>
    %675 = arith.mulf %672, %638 : vector<2x32xf32>
    %676 = arith.mulf %671, %673 : vector<2x32xf32>
    %677 = arith.addf %675, %676 : vector<2x32xf32>
    %678 = math.tanh %677 : vector<2x32xf32>
    %679 = arith.mulf %674, %678 : vector<2x32xf32>
    %680 = tpu.concatenate %679, %659 in 1 : vector<2x32xf32>, vector<2x32xf32> -> vector<2x64xf32>
    %cst_107 = arith.constant dense<0.000000e+00> : vector<2x128xf32>
    %681 = tpu.matmul %680, %64, %cst_107 {dimension_numbers = #tpu.dot_dimension_numbers<[1], [0], [0], [1], [0, 0, 1, 1], [], []>} : vector<2x64xf32>, vector<64x128xf32>, vector<2x128xf32> -> vector<2x128xf32>
    %682 = arith.addf %681, %67 : vector<2x128xf32>
    %683 = arith.negf %682 : vector<2x128xf32>
    %684 = math.exp %683 : vector<2x128xf32>
    %cst_108 = arith.constant 1.000000e+00 : f32
    %685 = vector.broadcast %cst_108 : f32 to vector<2x128xf32>
    %686 = arith.addf %685, %684 : vector<2x128xf32>
    %687 = arith.divf %685, %686 : vector<2x128xf32>
    %688 = math.tanh %682 : vector<2x128xf32>
    %689 = arith.select %73, %687, %688 : vector<2x128xi1>, vector<2x128xf32>
    %690 = vector.extract_strided_slice %689 {offsets = [0, 0], sizes = [2, 32], strides = [1, 1]} : vector<2x128xf32> to vector<2x32xf32>
    %691 = vector.extract_strided_slice %689 {offsets = [0, 32], sizes = [2, 32], strides = [1, 1]} : vector<2x128xf32> to vector<2x32xf32>
    %692 = vector.extract_strided_slice %689 {offsets = [0, 64], sizes = [2, 32], strides = [1, 1]} : vector<2x128xf32> to vector<2x32xf32>
    %693 = vector.extract_strided_slice %689 {offsets = [0, 96], sizes = [2, 32], strides = [1, 1]} : vector<2x128xf32> to vector<2x32xf32>
    %694 = arith.mulf %691, %657 : vector<2x32xf32>
    %695 = arith.mulf %690, %692 : vector<2x32xf32>
    %696 = arith.addf %694, %695 : vector<2x32xf32>
    %697 = math.tanh %696 : vector<2x32xf32>
    %698 = arith.mulf %693, %697 : vector<2x32xf32>
    %c0_109 = arith.constant 0 : index
    %c0_110 = arith.constant 0 : index
    %699 = vector.load %arg15[%c0_109, %c0_110] : memref<32x16xf32, #tpu.memory_space<vmem>>, vector<32x16xf32>
    %cst_111 = arith.constant dense<0.000000e+00> : vector<2x16xf32>
    %700 = tpu.matmul %698, %699, %cst_111 {dimension_numbers = #tpu.dot_dimension_numbers<[1], [0], [0], [1], [0, 0, 1, 1], [], []>} : vector<2x32xf32>, vector<32x16xf32>, vector<2x16xf32> -> vector<2x16xf32>
    %c0_112 = arith.constant 0 : index
    %c0_113 = arith.constant 0 : index
    %701 = vector.load %arg16[%c0_112, %c0_113] : memref<1x16xf32, #tpu.memory_space<vmem>>, vector<1x16xf32>
    %702 = vector.broadcast %701 : vector<1x16xf32> to vector<2x16xf32>
    %703 = arith.addf %700, %702 : vector<2x16xf32>
    %cst_114 = arith.constant 0.000000e+00 : f32
    %704 = vector.broadcast %cst_114 : f32 to vector<2x16xf32>
    %705 = arith.maximumf %703, %704 : vector<2x16xf32>
    %cst_115 = arith.constant dense<0.000000e+00> : vector<2xf32>
    %706 = vector.multi_reduction <add>, %705, %cst_115 [1] : vector<2x16xf32> to vector<2xf32>
    %707 = vector.shape_cast %706 : vector<2xf32> to vector<2x1xf32>
    %cst_116 = arith.constant 1.600000e+01 : f32
    %708 = vector.broadcast %cst_116 : f32 to vector<2x1xf32>
    %709 = arith.divf %707, %708 : vector<2x1xf32>
    %710 = vector.broadcast %709 : vector<2x1xf32> to vector<2x16xf32>
    %711 = arith.subf %705, %710 : vector<2x16xf32>
    %712 = arith.mulf %711, %711 : vector<2x16xf32>
    %cst_117 = arith.constant dense<0.000000e+00> : vector<2xf32>
    %713 = vector.multi_reduction <add>, %712, %cst_117 [1] : vector<2x16xf32> to vector<2xf32>
    %714 = vector.shape_cast %713 : vector<2xf32> to vector<2x1xf32>
    %cst_118 = arith.constant 1.600000e+01 : f32
    %715 = vector.broadcast %cst_118 : f32 to vector<2x1xf32>
    %716 = arith.divf %714, %715 : vector<2x1xf32>
    %717 = vector.broadcast %709 : vector<2x1xf32> to vector<2x16xf32>
    %718 = arith.subf %705, %717 : vector<2x16xf32>
    %cst_119 = arith.constant 9.99999974E-6 : f32
    %719 = vector.broadcast %cst_119 : f32 to vector<2x1xf32>
    %720 = arith.addf %716, %719 : vector<2x1xf32>
    %721 = math.rsqrt %720 : vector<2x1xf32>
    %722 = vector.broadcast %721 : vector<2x1xf32> to vector<2x16xf32>
    %723 = arith.mulf %718, %722 : vector<2x16xf32>
    %c0_120 = arith.constant 0 : index
    %c0_121 = arith.constant 0 : index
    %724 = vector.load %arg17[%c0_120, %c0_121] : memref<1x16xf32, #tpu.memory_space<vmem>>, vector<1x16xf32>
    %725 = vector.broadcast %724 : vector<1x16xf32> to vector<2x16xf32>
    %726 = arith.mulf %723, %725 : vector<2x16xf32>
    %c0_122 = arith.constant 0 : index
    %c0_123 = arith.constant 0 : index
    %727 = vector.load %arg18[%c0_122, %c0_123] : memref<1x16xf32, #tpu.memory_space<vmem>>, vector<1x16xf32>
    %728 = vector.broadcast %727 : vector<1x16xf32> to vector<2x16xf32>
    %729 = arith.addf %726, %728 : vector<2x16xf32>
    %c0_124 = arith.constant 0 : index
    %c0_125 = arith.constant 0 : index
    %730 = vector.load %arg19[%c0_124, %c0_125] : memref<16x128xf32, #tpu.memory_space<vmem>>, vector<16x128xf32>
    %cst_126 = arith.constant dense<0.000000e+00> : vector<2x128xf32>
    %731 = tpu.matmul %729, %730, %cst_126 {dimension_numbers = #tpu.dot_dimension_numbers<[1], [0], [0], [1], [0, 0, 1, 1], [], []>} : vector<2x16xf32>, vector<16x128xf32>, vector<2x128xf32> -> vector<2x128xf32>
    %c0_127 = arith.constant 0 : index
    %c0_128 = arith.constant 0 : index
    %732 = vector.load %arg20[%c0_127, %c0_128] : memref<1x128xf32, #tpu.memory_space<vmem>>, vector<1x128xf32>
    %733 = vector.broadcast %732 : vector<1x128xf32> to vector<2x128xf32>
    %734 = arith.addf %731, %733 : vector<2x128xf32>
    %c0_129 = arith.constant 0 : index
    %c0_130 = arith.constant 0 : index
    %735 = vector.load %arg21[%c0_129, %c0_130] : memref<2x128xf32, #tpu.memory_space<vmem>>, vector<2x128xf32>
    tpu.vector_store %arg21[%c0_129, %c0_130], %734 {strides = array<i32>} : memref<2x128xf32, #tpu.memory_space<vmem>>, vector<2x128xf32>,
    return
  }
}

</mosaic_0001>

<bundles_post_ra>
// kernel: forward.1
= control target key start
LH: loop header
LB: loop body
LE: loop exit
PB: predicated region body
PF: predicated region fallthrough
CT: control target
= control target key end

     0   :  { %s7783_s0 = inlined_call_operand.vmem [shape: f32[2,18,4], index: 0, kind: input, shape index: {}]   ;;  %s7784_s1 = inlined_call_operand.vmem [shape: bf16[12,8], index: 1, kind: input, shape index: {}]   ;;  %s7785_s2 = inlined_call_operand.vmem [shape: f32[1,1,8], index: 2, kind: input, shape index: {}]   ;;  %s7786_s3 = inlined_call_operand.vmem [shape: f32[1,1,8], index: 3, kind: input, shape index: {}]   ;;  %s7787_s4 = inlined_call_operand.vmem [shape: bf16[40,16], index: 4, kind: input, shape index: {}]   ;;  %s7788_s5 = inlined_call_operand.vmem [shape: f32[1,1,16], index: 5, kind: input, shape index: {}]   ;;  %s7789_s6 = inlined_call_operand.vmem [shape: f32[1,1,16], index: 6, kind: input, shape index: {}]   ;;  %s7790_s7 = inlined_call_operand.vmem [shape: bf16[112,32], index: 7, kind: input, shape index: {}]   ;;  %s7791_s8 = inlined_call_operand.vmem [shape: f32[1,1,32], index: 8, kind: input, shape index: {}]   ;;  %s7792_s9 = inlined_call_operand.vmem [shape: f32[1,1,32], index: 9, kind: input, shape index: {}]   ;;  %s7793_s10 = inlined_call_operand.vmem [shape: bf16[32,128], index: 10, kind: input, shape index: {}]   ;;  %s7794_s11 = inlined_call_operand.vmem [shape: f32[1,128], index: 11, kind: input, shape index: {}]   ;;  %s7795_s12 = inlined_call_operand.vmem [shape: f32[32,128], index: 12, kind: input, shape index: {}]   ;;  %s7796_s13 = inlined_call_operand.vmem [shape: f32[64,128], index: 13, kind: input, shape index: {}]   ;;  %s7797_s14 = inlined_call_operand.vmem [shape: f32[1,128], index: 14, kind: input, shape index: {}]   ;;  %s7798_s15 = inlined_call_operand.vmem [shape: f32[32,16], index: 15, kind: input, shape index: {}]   ;;  %s7799_s16 = inlined_call_operand.vmem [shape: f32[1,16], index: 16, kind: input, shape index: {}]   ;;  %s7800_s17 = inlined_call_operand.vmem [shape: f32[1,16], index: 17, kind: input, shape index: {}]   ;;  %s7801_s18 = inlined_call_operand.vmem [shape: f32[1,16], index: 18, kind: input, shape index: {}]   ;;  %s7802_s19 = inlined_call_operand.vmem [shape: f32[16,128], index: 19, kind: input, shape index: {}]   ;;  %s7803_s20 = inlined_call_operand.vmem [shape: f32[1,128], index: 20, kind: input, shape index: {}]   ;;  %s7804_s21 = inlined_call_operand.hbm [shape: f32[2,128], index: 21, kind: output, shape index: {}]  }
   0x1   :  { %7807 = sst [smem:[#allocation5_spill]] %s7783_s0 }
   0x2   :  { %7808 = sst [smem:[#allocation6_spill]] %s7784_s1 }
   0x3   :  { %7809 = sst [smem:[#allocation7_spill]] %s7785_s2 }
   0x4   :  { %7810 = sst [smem:[#allocation8_spill]] %s7786_s3 }
   0x5   :  { %7811 = sst [smem:[#allocation9_spill]] %s7787_s4 }
   0x6   :  { %7812 = sst [smem:[#allocation10_spill]] %s7788_s5 }
   0x7   :  { %s7813_s26 = sld [smem:[#allocation5_spill]]  ;;  %vm82_vm0 = vcmask 1046528   ;;  %vm105_vm1 = vcmask 1045504   ;;  %s6239_s25 = smov 4  }
   0x8   :  { %s7814_s2 = sld [smem:[#allocation6_spill]] }
   0xd   :  { %v70_v0 = vld [vmem:[%s7813_s26] sm:$0xff]  ;;  %v71_v1 = vld [vmem:[%s7813_s26 + $0x8] sm:$0xff]  ;;  %v72_v2 = vld [vmem:[%s7813_s26 + $0x10] sm:$0x3] }
   0xe   :  { %v83_v3 = vrot.slane %v70_v0, 1  ;;  %v84_v4 = vrot.slane %v71_v1, 1  ;;  %v86_v5 = vrot.slane %v72_v2, 1  ;;  %v73_v6 = vld [vmem:[%s7813_s26 + $0x18] sm:$0xff]  ;;  %v106_v7 = vrot.slane %v70_v0, 2  ;;  %v74_v10 = vld [vmem:[%s7813_s26 + $0x20] sm:$0xff] }
   0xf   :  { %v107_v8 = vrot.slane %v71_v1, 2  ;;  %v109_v9 = vrot.slane %v72_v2, 2  ;;  %v75_v11 = vld [vmem:[%s7813_s26 + $0x28] sm:$0x3]  ;;  %v88_v14 = vrot.slane %v73_v6, 1  ;;  %v89_v15 = vrot.slane %v74_v10, 1 }
  0x10   :  { %v85_v12 = vsel %vm82_vm0, %v83_v3, %v84_v4  ;;  %v87_v13 = vsel %vm82_vm0, %v84_v4, %v86_v5  ;;  %v91_v19 = vrot.slane %v75_v11, 1  ;;  %v5824_v20 = vld [vmem:[%s7814_s2] sm:$0x3f]   ;;  %v111_v23 = vrot.slane %v73_v6, 2  ;;  %s6240_s26 = smov 8  }
  0x11   :  { %v5704_v16 = vpack.i.bf16 %v87_v13, %v85_v12  ;;  %v108_v17 = vsel %vm105_vm1, %v106_v7, %v107_v8  ;;  %v110_v18 = vsel %vm105_vm1, %v107_v8, %v109_v9  ;;  %v90_v22 = vsel %vm82_vm0, %v88_v14, %v89_v15  ;;  %5690 = vmatprep.subr.msk.bf16.mxu0 %vm105_vm1, %v5824_v20 }
  0x12   :  { %v5714_v21 = vpack.i.bf16 %v110_v18, %v108_v17  ;;  %v112_v24 = vrot.slane %v74_v10, 2  ;;  %v92_v25 = vsel %vm82_vm0, %v89_v15, %v91_v19  ;;  %v114_v26 = vrot.slane %v75_v11, 2 }
  0x13   :  { %5705 = vrot.lane.b32.xlu0 %v5704_v16, %s6239_s25  ;;  %v5709_v27 = vpack.i.bf16 %v92_v25, %v90_v22  ;;  %v155_v29 = vsel %vm105_vm1, %v5824_v20, 0 }
  0x14   :  { %5715 = vrot.lane.b32.xlu1 %v5714_v21, %s6240_s26  ;;  %v113_v28 = vsel %vm105_vm1, %v111_v23, %v112_v24  ;;  %v115_v30 = vsel %vm105_vm1, %v112_v24, %v114_v26  ;;  %5151 = vmatpush3.bf16.msra.mxu0 %v155_v29 }
  0x15   :  { %v5719_v31 = vpack.i.bf16 %v115_v30, %v113_v28 }
  0x17   :  { %5710 = vrot.lane.b32.xlu0 %v5709_v27, %s6239_s25 }
  0x18   :  { %5720 = vrot.lane.b32.xlu1 %v5719_v31, %s6240_s26 }
  0x19   :  { %26 = vsyncpa [#allocation3], 0  ;;  %vm128_vm2 = vcmask 31744   ;;  %vm133_vm3 = vcmask 64512   ;;  %vm147_vm4 = vcmask 97280   ;;  %s7815_s28 = sld [smem:[#allocation7_spill]] }
  0x1a   :  { %s7816_s4 = sld [smem:[#allocation8_spill]]  ;;  %vm236_vm5 = vcmask 1041408   ;;  %vm301_vm6 = vcmask 1044480   ;;  %vm324_vm7 = vcmask 1043456   ;;  %s6241_s24 = smov 16   ;;  %vm351_vm8 = vcmask 130048  }
  0x1b   :  { %s7817_s22 = sld [smem:[#allocation9_spill]]  ;;  %s6243_s27 = smov 32   ;;  %vm356_vm9 = vcmask 195584   ;;  %vm361_vm10 = vcmask 261120   ;;  %vm388_vm11 = vcmask 326656   ;;  %vm477_vm12 = vcmask 1042432  }
  0x1c   :  { %s7818_s29 = sld [smem:[#allocation10_spill]]  ;;  %s6244_s3 = smov 48   ;;  %vm638_vm13 = vcmask 392192   ;;  %vm643_vm14 = vcmask 523264   ;;  %vm648_vm15 = vcmask 654336  }
  0x1d   :  { %s6245_s30 = smov 64   ;;  %s6247_s5 = smov 96  }
  0x1e   :  { %s6250_s2 = smov [#allocation2]  }
  0x1f   :  { %v4786_v54 = vld [vmem:[%s7815_s28] ss:$0 sm:$0xff]  ;;  %s4775_s25 = sshll.u32 %s6250_s2, 4  ;;  %s4776_s25 = int_to_ptr.vmem [resolvable:$true] %s4775_s25 }
  0x20   :  { %v4787_v56 = vld [vmem:[%s7816_s4] ss:$0 sm:$0xff]  ;;  %p6222_p1 = scmp.lt.s32.totalorder %s4776_s25, %s4776_s25 }
  0x21   :  { %v5825_v31 = vld [vmem:[%s7817_s22 + $0x10] ss:$0 sps:$4 sm:$0xff]  }
  0x22   :  { %5691 = vmatprep.subr.msk.bf16.mxu1 %vm324_vm7, %v5825_v31 }
  0x85   :  { %v5706_v32 = vpop.permute.xlu0 %5705 }
  0x86   :  { %v5708_v33 = vunpack.i.h.bf16 %v5706_v32  ;;  %v5707_v34 = vunpack.i.l.bf16 %v5706_v32  ;;  %v5716_v35 = vpop.permute.xlu1 %5715 }
  0x87   :  { %v5718_v36 = vunpack.i.h.bf16 %v5716_v35  ;;  %v5717_v37 = vunpack.i.l.bf16 %v5716_v35 }
  0x88   :  { %v129_v38 = vsel %vm128_vm2, %v70_v0, %v5707_v34  ;;  %v130_v39 = vsel %vm128_vm2, %v71_v1, %v5708_v33 }
  0x89   :  { %v5711_v40 = vpop.permute.xlu0 %5710  ;;  %v134_v41 = vsel %vm133_vm3, %v129_v38, %v5717_v37  ;;  %v135_v42 = vsel %vm133_vm3, %v130_v39, %v5718_v36 }
  0x8a   :  { %v5713_v43 = vunpack.i.h.bf16 %v5711_v40  ;;  %v5712_v44 = vunpack.i.l.bf16 %v5711_v40  ;;  %v5721_v45 = vpop.permute.xlu1 %5720  ;;  %v138_v46 = vpack.c.bf16 %v135_v42, %v134_v41 }
  0x8b   :  { %v5723_v47 = vunpack.i.h.bf16 %v5721_v45  ;;  %v5722_v48 = vunpack.i.l.bf16 %v5721_v45 }
  0x8c   :  { %v132_v49 = vsel %vm128_vm2, %v74_v10, %v5713_v43  ;;  %v131_v50 = vsel %vm128_vm2, %v73_v6, %v5712_v44  ;;  %5152 = vmatprep.mubr.msk.bf16.mxu0 %vm147_vm4, %v138_v46  ;;  %vm6249_vm2 = vmmov 0  }
  0x8d   :  { %v136_v51 = vsel %vm133_vm3, %v131_v50, %v5722_v48  ;;  %v137_v52 = vsel %vm133_vm3, %v132_v49, %v5723_v47  ;;  %v5826_v49 = vld [vmem:[%s7817_s22 + $0x8] sm:$0xff]  }
  0x8e   :  { %v139_v53 = vpack.c.bf16 %v137_v52, %v136_v51 }
  0x90   :  { %5153 = vmatmul.mubr.msk.bf16.vlgmr.msra.gmra.mxu0 %vm147_vm4, %v139_v53  ;;  %v396_v53 = vsel %vm324_vm7, %v5825_v31, 0 }
  0x91   :  { %5157 = vmatpush3.bf16.msra.mxu1 %v396_v53 }
  0x92   :  { %5158 = vmatprep.subr.bf16.mxu1 %v5826_v49 }
  0x95   :  { %5159 = vmatpush3.bf16.msra.mxu1 %v5826_v49 }
 0x150   :  { %v5154_v55 = vpop.f32.mrf.mxu0 }
 0x151   :  { %v215_v57 = vmul.f32 %v5154_v55, %v4786_v54 }
 0x152   :  { %v191_v58 = vpop.f32.mrf.mxu0 }
 0x153   :  { %v226_v59 = vadd.f32 %v4787_v56, %v215_v57  ;;  %v213_v60 = vmul.f32 %v4786_v54, %v191_v58 }
 0x154   :  { %v5155_v61 = vpop.f32.mrf.mxu0 }
 0x155   :  { %v230_v62 = vmax.f32 %v226_v59, 0.0  ;;  %v224_v63 = vadd.f32 %v4787_v56, %v213_v60  ;;  %v216_v0 = vmul.f32 %v5155_v61, %v4786_v54  ;;  %v5827_v61 = vld [vmem:[%s7817_s22] sm:$0xff]  }
 0x156   :  { %v194_v1 = vpop.f32.mrf.mxu0  ;;  %5160 = vmatprep.subr.bf16.mxu1 %v5827_v61 }
 0x157   :  { %v240_v2 = vrot.slane %v230_v62, 6  ;;  %v228_v3 = vmax.f32 %v224_v63, 0.0  ;;  %v227_v4 = vadd.f32 %v4787_v56, %v216_v0  ;;  %v214_v5 = vmul.f32 %v4786_v54, %v194_v1  ;;  %5161 = vmatpush3.bf16.msra.mxu1 %v5827_v61 }
 0x159   :  { %v6409_v6 = vsel %vm236_vm5, 0.0, %v240_v2  ;;  %v237_v7 = vrot.slane %v228_v3, 6  ;;  %v231_v8 = vmax.f32 %v227_v4, 0.0  ;;  %v225_v9 = vadd.f32 %v4787_v56, %v214_v5 }
 0x15a   :  { %v262_v13 = vrot.slane %v6409_v6, 1  ;;  %v284_v14 = vrot.slane %v6409_v6, 2  ;;  %v307_v41 = vrot.slane %v6409_v6, 3  ;;  %v330_v55 = vrot.slane %v6409_v6, 4 }
 0x15b   :  { %v6412_v10 = vsel %vm236_vm5, 0.0, %v237_v7  ;;  %v241_v11 = vrot.slane %v231_v8, 6  ;;  %v229_v12 = vmax.f32 %v225_v9, 0.0 }
 0x15c   :  { %v257_v18 = vrot.slane %v6412_v10, 1  ;;  %v279_v25 = vrot.slane %v6412_v10, 2  ;;  %v302_v48 = vrot.slane %v6412_v10, 3  ;;  %v325_v0 = vrot.slane %v6412_v10, 4 }
 0x15d   :  { %v6417_v15 = vsel %vm236_vm5, %v240_v2, %v241_v11  ;;  %v252_v16 = vsel %vm236_vm5, %v241_v11, 0.0  ;;  %v238_v17 = vrot.slane %v229_v12, 6 }
 0x15e   :  { %v263_v19 = vrot.slane %v6417_v15, 1  ;;  %v265_v20 = vrot.slane %v252_v16, 1  ;;  %v285_v21 = vrot.slane %v6417_v15, 2  ;;  %v287_v22 = vrot.slane %v252_v16, 2 }
 0x15f   :  { %v6424_v23 = vsel %vm236_vm5, %v237_v7, %v238_v17  ;;  %v251_v24 = vsel %vm236_vm5, %v238_v17, 0.0  ;;  %v308_v26 = vrot.slane %v6417_v15, 3  ;;  %v310_v35 = vrot.slane %v252_v16, 3 }
 0x160   :  { %v264_v27 = vsel %vm82_vm0, %v262_v13, %v263_v19  ;;  %v266_v28 = vsel %vm82_vm0, %v263_v19, %v265_v20  ;;  %v258_v29 = vrot.slane %v6424_v23, 1  ;;  %v260_v30 = vrot.slane %v251_v24, 1 }
 0x161   :  { %v5724_v32 = vpack.i.bf16 %v266_v28, %v264_v27  ;;  %v286_v33 = vsel %vm105_vm1, %v284_v14, %v285_v21  ;;  %v280_v34 = vrot.slane %v6424_v23, 2  ;;  %v288_v38 = vsel %vm105_vm1, %v285_v21, %v287_v22 }
 0x162   :  { %v259_v36 = vsel %vm82_vm0, %v257_v18, %v258_v29  ;;  %v261_v37 = vsel %vm82_vm0, %v258_v29, %v260_v30  ;;  %v282_v39 = vrot.slane %v251_v24, 2  ;;  %v303_v44 = vrot.slane %v6424_v23, 3 }
 0x163   :  { %5725 = vrot.lane.b32.xlu1 %v5724_v32, %s6240_s26  ;;  %v5739_v40 = vpack.i.bf16 %v261_v37, %v259_v36  ;;  %v281_v42 = vsel %vm105_vm1, %v279_v25, %v280_v34  ;;  %v305_v45 = vrot.slane %v251_v24, 3  ;;  %v5729_v46 = vpack.i.bf16 %v288_v38, %v286_v33 }
 0x164   :  { %v283_v43 = vsel %vm105_vm1, %v280_v34, %v282_v39  ;;  %v309_v47 = vsel %vm301_vm6, %v307_v41, %v308_v26  ;;  %v311_v50 = vsel %vm301_vm6, %v308_v26, %v310_v35  ;;  %v331_v51 = vrot.slane %v6417_v15, 4 }
 0x165   :  { %5740 = vrot.lane.b32.xlu0 %v5739_v40, %s6240_s26  ;;  %v333_v52 = vrot.slane %v252_v16, 4  ;;  %v5744_v54 = vpack.i.bf16 %v283_v43, %v281_v42  ;;  %v304_v56 = vsel %vm301_vm6, %v302_v48, %v303_v44  ;;  %v306_v57 = vsel %vm301_vm6, %v303_v44, %v305_v45  ;;  %s6242_s26 = smov 24   ;;  %v4793_v48 = vld [vmem:[%s7818_s29] ss:$0 sm:$0xff] }
 0x166   :  { %v326_v58 = vrot.slane %v6424_v23, 4  ;;  %v328_v59 = vrot.slane %v251_v24, 4  ;;  %v5734_v60 = vpack.i.bf16 %v311_v50, %v309_v47  ;;  %v332_v62 = vsel %vm324_vm7, %v330_v55, %v331_v51  ;;  %v4794_v50 = vld [vmem:[%s7789_s6] ss:$0 sm:$0xff] }
 0x167   :  { %5730 = vrot.lane.b32.xlu1 %v5729_v46, %s6241_s24  ;;  %v334_v63 = vsel %vm324_vm7, %v331_v51, %v333_v52  ;;  %v5749_v1 = vpack.i.bf16 %v306_v57, %v304_v56 }
 0x168   :  { %v327_v2 = vsel %vm324_vm7, %v325_v0, %v326_v58  ;;  %v329_v3 = vsel %vm324_vm7, %v326_v58, %v328_v59  ;;  %v5759_v4 = vpack.i.bf16 %v334_v63, %v332_v62  ;;  %v5828_v0 = vld [vmem:[%s7790_s7 + $0x30] sm:$0xff]  }
 0x169   :  { %5745 = vrot.lane.b32.xlu0 %v5744_v54, %s6241_s24  ;;  %v5754_v5 = vpack.i.bf16 %v329_v3, %v327_v2  ;;  %5166 = vmatprep.subr.bf16.mxu0 %v5828_v0 }
 0x16a   :  { %5167 = vmatpush3.bf16.msra.mxu0 %v5828_v0 }
 0x16b   :  { %5735 = vrot.lane.b32.xlu1 %v5734_v60, %s6242_s26 }
 0x16d   :  { %5750 = vrot.lane.b32.xlu0 %v5749_v1, %s6242_s26 }
 0x16f   :  { %5760 = vrot.lane.b32.xlu1 %v5759_v4, %s6243_s27 }
 0x171   :  { %5755 = vrot.lane.b32.xlu0 %v5754_v5, %s6243_s27 }
 0x1d5   :  { %v5726_v7 = vpop.permute.xlu1 %5725 }
 0x1d6   :  { %v5728_v12 = vunpack.i.h.bf16 %v5726_v7  ;;  %v5727_v13 = vunpack.i.l.bf16 %v5726_v7 }
 0x1d7   :  { %v5741_v8 = vpop.permute.xlu0 %5740 }
 0x1d8   :  { %v5743_v16 = vunpack.i.h.bf16 %v5741_v8  ;;  %v5742_v17 = vunpack.i.l.bf16 %v5741_v8  ;;  %v350_v26 = vsel %vm133_vm3, %v6417_v15, %v5728_v12  ;;  %v349_v27 = vsel %vm133_vm3, %v6409_v6, %v5727_v13  ;;  %v5829_v12 = vld [vmem:[%s7790_s7 + $0x28] sm:$0xff]  }
 0x1d9   :  { %v5731_v9 = vpop.permute.xlu1 %5730  ;;  %5168 = vmatprep.subr.bf16.mxu0 %v5829_v12 }
 0x1da   :  { %v5733_v18 = vunpack.i.h.bf16 %v5731_v9  ;;  %v5732_v19 = vunpack.i.l.bf16 %v5731_v9  ;;  %v348_v31 = vsel %vm133_vm3, %v6424_v23, %v5743_v16  ;;  %v347_v32 = vsel %vm133_vm3, %v6412_v10, %v5742_v17  ;;  %5169 = vmatpush3.bf16.msra.mxu0 %v5829_v12 }
 0x1db   :  { %v5746_v11 = vpop.permute.xlu0 %5745 }
 0x1dc   :  { %v5748_v20 = vunpack.i.h.bf16 %v5746_v11  ;;  %v5747_v21 = vunpack.i.l.bf16 %v5746_v11  ;;  %v354_v35 = vsel %vm351_vm8, %v349_v27, %v5732_v19  ;;  %v355_v36 = vsel %vm351_vm8, %v350_v26, %v5733_v18 }
 0x1dd   :  { %v5736_v14 = vpop.permute.xlu1 %5735 }
 0x1de   :  { %v5738_v24 = vunpack.i.h.bf16 %v5736_v14  ;;  %v5737_v25 = vunpack.i.l.bf16 %v5736_v14  ;;  %v352_v15 = vsel %vm351_vm8, %v347_v32, %v5747_v21  ;;  %v353_v6 = vsel %vm351_vm8, %v348_v31, %v5748_v20  ;;  %v5830_v31 = vld [vmem:[%s7790_s7 + $0x20] sm:$0xff]  }
 0x1df   :  { %v5751_v22 = vpop.permute.xlu0 %5750  ;;  %5170 = vmatprep.subr.bf16.mxu0 %v5830_v31 }
 0x1e0   :  { %v5753_v28 = vunpack.i.h.bf16 %v5751_v22  ;;  %v5752_v29 = vunpack.i.l.bf16 %v5751_v22  ;;  %v359_v38 = vsel %vm356_vm9, %v354_v35, %v5737_v25  ;;  %v360_v39 = vsel %vm356_vm9, %v355_v36, %v5738_v24  ;;  %5171 = vmatpush3.bf16.msra.mxu0 %v5830_v31 }
 0x1e1   :  { %v5761_v30 = vpop.permute.xlu1 %5760 }
 0x1e2   :  { %v5763_v33 = vunpack.i.h.bf16 %v5761_v30  ;;  %v5762_v34 = vunpack.i.l.bf16 %v5761_v30  ;;  %v357_v42 = vsel %vm356_vm9, %v352_v15, %v5752_v29  ;;  %v358_v43 = vsel %vm356_vm9, %v353_v6, %v5753_v28 }
 0x1e3   :  { %v5756_v37 = vpop.permute.xlu0 %5755 }
 0x1e4   :  { %v5758_v40 = vunpack.i.h.bf16 %v5756_v37  ;;  %v5757_v23 = vunpack.i.l.bf16 %v5756_v37  ;;  %v364_v41 = vsel %vm361_vm10, %v359_v38, %v5762_v34  ;;  %v365_v10 = vsel %vm361_vm10, %v360_v39, %v5763_v33 }
 0x1e5   :  { %v367_v47 = vpack.c.bf16 %v365_v10, %v364_v41 }
 0x1e6   :  { %v362_v44 = vsel %vm361_vm10, %v357_v42, %v5757_v23  ;;  %v363_v45 = vsel %vm361_vm10, %v358_v43, %v5758_v40  ;;  %v5831_v42 = vld [vmem:[%s7790_s7 + $0x18] sm:$0xff]  }
 0x1e7   :  { %v366_v46 = vpack.c.bf16 %v363_v45, %v362_v44  ;;  %5172 = vmatprep.subr.bf16.mxu0 %v5831_v42 }
 0x1e8   :  { %5173 = vmatpush3.bf16.msra.mxu0 %v5831_v42 }
 0x1e9   :  { %5162 = vmatprep.mubr.msk.bf16.mxu1 %vm388_vm11, %v366_v46 }
 0x1ea   :  { %5163 = vmatmul.mubr.msk.bf16.vlgmr.msra.gmra.mxu1 %vm388_vm11, %v367_v47 }
 0x2aa   :  { %v5164_v49 = vpop.f32.mrf.mxu1 }
 0x2ab   :  { %v456_v51 = vmul.f32 %v5164_v49, %v4793_v48 }
 0x2ac   :  { %v432_v52 = vpop.f32.mrf.mxu1 }
 0x2ad   :  { %v467_v53 = vadd.f32 %v4794_v50, %v456_v51  ;;  %v454_v54 = vmul.f32 %v4793_v48, %v432_v52 }
 0x2ae   :  { %v5165_v55 = vpop.f32.mrf.mxu1 }
 0x2af   :  { %v471_v56 = vmax.f32 %v467_v53, 0.0  ;;  %v465_v57 = vadd.f32 %v4794_v50, %v454_v54  ;;  %v457_v58 = vmul.f32 %v5165_v55, %v4793_v48  ;;  %v5832_v55 = vld [vmem:[%s7790_s7 + $0x10] sm:$0xff]  }
 0x2b0   :  { %v435_v59 = vpop.f32.mrf.mxu1  ;;  %5174 = vmatprep.subr.bf16.mxu0 %v5832_v55 }
 0x2b1   :  { %v481_v60 = vrot.slane %v471_v56, 5  ;;  %v469_v61 = vmax.f32 %v465_v57, 0.0  ;;  %v468_v62 = vadd.f32 %v4794_v50, %v457_v58  ;;  %v455_v63 = vmul.f32 %v4793_v48, %v435_v59  ;;  %5175 = vmatpush3.bf16.msra.mxu0 %v5832_v55 }
 0x2b3   :  { %v6501_v1 = vsel %vm477_vm12, 0.0, %v481_v60  ;;  %v478_v2 = vrot.slane %v469_v61, 5  ;;  %v472_v3 = vmax.f32 %v468_v62, 0.0  ;;  %v466_v4 = vadd.f32 %v4794_v50, %v455_v63 }
 0x2b4   :  { %v503_v9 = vrot.slane %v6501_v1, 1  ;;  %v525_v11 = vrot.slane %v6501_v1, 2  ;;  %v547_v39 = vrot.slane %v6501_v1, 3  ;;  %v569_v50 = vrot.slane %v6501_v1, 4 }
 0x2b5   :  { %v6504_v5 = vsel %vm477_vm12, 0.0, %v478_v2  ;;  %v482_v7 = vrot.slane %v472_v3, 5  ;;  %v470_v8 = vmax.f32 %v466_v4, 0.0  ;;  %v591_v63 = vrot.slane %v6501_v1, 5 }
 0x2b6   :  { %v498_v17 = vrot.slane %v6504_v5, 1  ;;  %v520_v25 = vrot.slane %v6504_v5, 2  ;;  %v542_v44 = vrot.slane %v6504_v5, 3  ;;  %v564_v57 = vrot.slane %v6504_v5, 4 }
 0x2b7   :  { %v6512_v13 = vsel %vm477_vm12, %v481_v60, %v482_v7  ;;  %v6515_v14 = vsel %vm477_vm12, %v482_v7, 0.0  ;;  %v479_v16 = vrot.slane %v470_v8, 5  ;;  %v586_v8 = vrot.slane %v6504_v5, 5 }
 0x2b8   :  { %v504_v18 = vrot.slane %v6512_v13, 1  ;;  %v506_v19 = vrot.slane %v6515_v14, 1  ;;  %v526_v20 = vrot.slane %v6512_v13, 2  ;;  %v528_v21 = vrot.slane %v6515_v14, 2 }
 0x2b9   :  { %v6523_v22 = vsel %vm477_vm12, %v478_v2, %v479_v16  ;;  %v6526_v24 = vsel %vm477_vm12, %v479_v16, 0.0  ;;  %v548_v26 = vrot.slane %v6512_v13, 3  ;;  %v550_v35 = vrot.slane %v6515_v14, 3 }
 0x2ba   :  { %v505_v27 = vsel %vm82_vm0, %v503_v9, %v504_v18  ;;  %v507_v28 = vsel %vm82_vm0, %v504_v18, %v506_v19  ;;  %v499_v29 = vrot.slane %v6523_v22, 1  ;;  %v501_v30 = vrot.slane %v6526_v24, 1  ;;  %v5833_v9 = vld [vmem:[%s7790_s7 + $0x8] sm:$0xff]   ;;  %v5834_v18 = vld [vmem:[%s7790_s7] sm:$0xff]   ;;  %s6246_s7 = smov 80  }
 0x2bb   :  { %v5764_v32 = vpack.i.bf16 %v507_v28, %v505_v27  ;;  %v527_v33 = vsel %vm105_vm1, %v525_v11, %v526_v20  ;;  %v521_v34 = vrot.slane %v6523_v22, 2  ;;  %v529_v15 = vsel %vm105_vm1, %v526_v20, %v528_v21  ;;  %5176 = vmatprep.subr.bf16.mxu0 %v5833_v9 }
 0x2bc   :  { %v500_v36 = vsel %vm82_vm0, %v498_v17, %v499_v29  ;;  %v502_v37 = vsel %vm82_vm0, %v499_v29, %v501_v30  ;;  %v523_v6 = vrot.slane %v6526_v24, 2  ;;  %v543_v41 = vrot.slane %v6523_v22, 3  ;;  %5177 = vmatpush3.bf16.msra.mxu0 %v5833_v9 }
 0x2bd   :  { %5765 = vrot.lane.b32.xlu1 %v5764_v32, %s6241_s24  ;;  %v5789_v38 = vpack.i.bf16 %v502_v37, %v500_v36  ;;  %v522_v40 = vsel %vm105_vm1, %v520_v25, %v521_v34  ;;  %v545_v10 = vrot.slane %v6526_v24, 3  ;;  %v5769_v43 = vpack.i.bf16 %v529_v15, %v527_v33  ;;  %5178 = vmatprep.subr.bf16.mxu0 %v5834_v18 }
 0x2be   :  { %v524_v23 = vsel %vm105_vm1, %v521_v34, %v523_v6  ;;  %v549_v45 = vsel %vm301_vm6, %v547_v39, %v548_v26  ;;  %v551_v46 = vsel %vm301_vm6, %v548_v26, %v550_v35  ;;  %v570_v47 = vrot.slane %v6512_v13, 4 }
 0x2bf   :  { %5790 = vrot.lane.b32.xlu0 %v5789_v38, %s6241_s24  ;;  %v572_v48 = vrot.slane %v6515_v14, 4  ;;  %v5794_v49 = vpack.i.bf16 %v524_v23, %v522_v40  ;;  %v544_v51 = vsel %vm301_vm6, %v542_v44, %v543_v41  ;;  %v546_v52 = vsel %vm301_vm6, %v543_v41, %v545_v10 }
 0x2c0   :  { %v565_v53 = vrot.slane %v6523_v22, 4  ;;  %v567_v54 = vrot.slane %v6526_v24, 4  ;;  %v5774_v56 = vpack.i.bf16 %v551_v46, %v549_v45  ;;  %v571_v58 = vsel %vm324_vm7, %v569_v50, %v570_v47  ;;  %5179 = vmatpush3.bf16.msra.mxu0 %v5834_v18 }
 0x2c1   :  { %5770 = vrot.lane.b32.xlu1 %v5769_v43, %s6243_s27  ;;  %v573_v59 = vsel %vm324_vm7, %v570_v47, %v572_v48  ;;  %v592_v60 = vrot.slane %v6512_v13, 5  ;;  %v594_v61 = vrot.slane %v6515_v14, 5  ;;  %v5799_v62 = vpack.i.bf16 %v546_v52, %v544_v51 }
 0x2c2   :  { %v566_v0 = vsel %vm324_vm7, %v564_v57, %v565_v53  ;;  %v568_v2 = vsel %vm324_vm7, %v565_v53, %v567_v54  ;;  %v587_v3 = vrot.slane %v6523_v22, 5  ;;  %v589_v4 = vrot.slane %v6526_v24, 5 }
 0x2c3   :  { %5795 = vrot.lane.b32.xlu0 %v5794_v49, %s6243_s27  ;;  %v5779_v7 = vpack.i.bf16 %v573_v59, %v571_v58  ;;  %v593_v11 = vsel %vm477_vm12, %v591_v63, %v592_v60  ;;  %v595_v12 = vsel %vm477_vm12, %v592_v60, %v594_v61  ;;  %v614_v16 = vrot.slane %v6512_v13, 6 }
 0x2c4   :  { %v616_v17 = vrot.slane %v6515_v14, 6  ;;  %v5804_v19 = vpack.i.bf16 %v568_v2, %v566_v0  ;;  %v613_v20 = vrot.slane %v6501_v1, 6  ;;  %v588_v21 = vsel %vm477_vm12, %v586_v8, %v587_v3 }
 0x2c5   :  { %5775 = vrot.lane.b32.xlu1 %v5774_v56, %s6244_s3  ;;  %v590_v25 = vsel %vm477_vm12, %v587_v3, %v589_v4  ;;  %v609_v26 = vrot.slane %v6523_v22, 6  ;;  %v611_v27 = vrot.slane %v6526_v24, 6  ;;  %v5784_v14 = vpack.i.bf16 %v595_v12, %v593_v11 }
 0x2c6   :  { %v615_v28 = vsel %vm236_vm5, %v613_v20, %v614_v16  ;;  %v617_v29 = vsel %vm236_vm5, %v614_v16, %v616_v17  ;;  %v608_v30 = vrot.slane %v6504_v5, 6  ;;  %v5809_v31 = vpack.i.bf16 %v590_v25, %v588_v21 }
 0x2c7   :  { %5800 = vrot.lane.b32.xlu0 %v5799_v62, %s6244_s3  ;;  %v612_v33 = vsel %vm236_vm5, %v609_v26, %v611_v27  ;;  %v5819_v24 = vpack.i.bf16 %v617_v29, %v615_v28  ;;  %vm653_vm0 = vcmask 785408   ;;  %vm716_vm1 = vcmask 916480  }
 0x2c8   :  { %v610_v32 = vsel %vm236_vm5, %v608_v30, %v609_v26  ;;  %vm998_vm5 = vcmask 1041409   ;;  %vm4655_vm7 = vcmask 123904  }
 0x2c9   :  { %5780 = vrot.lane.b32.xlu1 %v5779_v7, %s6245_s30  ;;  %v5814_v34 = vpack.i.bf16 %v612_v33, %v610_v32 }
 0x2cb   :  { %5805 = vrot.lane.b32.xlu0 %v5804_v19, %s6245_s30 }
 0x2cd   :  { %5785 = vrot.lane.b32.xlu1 %v5784_v14, %s6246_s7 }
 0x2cf   :  { %5810 = vrot.lane.b32.xlu0 %v5809_v31, %s6246_s7 }
 0x2d1   :  { %5820 = vrot.lane.b32.xlu1 %v5819_v24, %s6247_s5  ;;  %v5835_v24 = vld [vmem:[%s7793_s10 + $0x8] sm:$0xff]  }
 0x2d2   :  { %5184 = vmatprep.subr.bf16.mxu1 %v5835_v24 }
 0x2d3   :  { %5815 = vrot.lane.b32.xlu0 %v5814_v34, %s6247_s5  ;;  %v5836_v34 = vld [vmem:[%s7793_s10] sm:$0xff]   ;;  %5185 = vmatpush3.bf16.msra.mxu1 %v5835_v24  ;;  %v6718_v24 = vld [vmem:[%s7796_s13 + $0x38] sm:$0xff] }
 0x2d4   :  { %5186 = vmatprep.subr.bf16.mxu1 %v5836_v34 }
 0x2d7   :  { %5187 = vmatpush3.bf16.msra.mxu1 %v5836_v34  ;;  %v6723_v34 = vld [vmem:[%s7796_s13 + $0x30] sm:$0xff] }
 0x32f   :  { %v5766_v35 = vpop.permute.xlu1 %5765 }
 0x330   :  { %v5768_v39 = vunpack.i.h.bf16 %v5766_v35  ;;  %v5767_v40 = vunpack.i.l.bf16 %v5766_v35  ;;  %v6639_v35 = vld [vmem:[%s7795_s12 + $0x18] sm:$0xff] }
 0x331   :  { %v5791_v36 = vpop.permute.xlu0 %5790 }
 0x332   :  { %v5793_v23 = vunpack.i.h.bf16 %v5791_v36  ;;  %v5792_v41 = vunpack.i.l.bf16 %v5791_v36  ;;  %v633_v45 = vsel %vm351_vm8, %v6512_v13, %v5768_v39  ;;  %v632_v46 = vsel %vm351_vm8, %v6501_v1, %v5767_v40  ;;  %v4804_v39 = vld [vmem:[%s7791_s8] ss:$0 sm:$0xff] }
 0x333   :  { %v5771_v37 = vpop.permute.xlu1 %5770  ;;  %v6248_v36 = vmov 0.0  }
 0x334   :  { %v5773_v42 = vunpack.i.h.bf16 %v5771_v37  ;;  %v5772_v43 = vunpack.i.l.bf16 %v5771_v37  ;;  %v631_v49 = vsel %vm351_vm8, %v6523_v22, %v5793_v23  ;;  %v630_v50 = vsel %vm351_vm8, %v6504_v5, %v5792_v41  ;;  %5222 = vmatprep.subr.mxu0 %v6248_v36  ;;  %v6646_v37 = vld [vmem:[%s7795_s12 + $0x10] sm:$0xff]  ;;  %5192 = vmatprep.subr.mxu1 %v6248_v36 }
 0x335   :  { %v5796_v15 = vpop.permute.xlu0 %5795 }
 0x336   :  { %v5798_v47 = vunpack.i.h.bf16 %v5796_v15  ;;  %v5797_v48 = vunpack.i.l.bf16 %v5796_v15  ;;  %v636_v54 = vsel %vm361_vm10, %v632_v46, %v5772_v43  ;;  %v637_v55 = vsel %vm361_vm10, %v633_v45, %v5773_v42  ;;  %v6653_v15 = vld [vmem:[%s7795_s12 + $0x8] sm:$0xff]  ;;  %v4805_v42 = vld [vmem:[%s7792_s9] ss:$0 sm:$0xff] }
 0x337   :  { %v5776_v6 = vpop.permute.xlu1 %5775 }
 0x338   :  { %v5778_v51 = vunpack.i.h.bf16 %v5776_v6  ;;  %v5777_v52 = vunpack.i.l.bf16 %v5776_v6  ;;  %v634_v61 = vsel %vm361_vm10, %v630_v50, %v5797_v48  ;;  %v635_v22 = vsel %vm361_vm10, %v631_v49, %v5798_v47  ;;  %v6661_v6 = vld [vmem:[%s7795_s12] sm:$0xff] }
 0x339   :  { %v5801_v38 = vpop.permute.xlu0 %5800 }
 0x33a   :  { %v5803_v56 = vunpack.i.h.bf16 %v5801_v38  ;;  %v5802_v13 = vunpack.i.l.bf16 %v5801_v38  ;;  %v641_v63 = vsel %vm638_vm13, %v636_v54, %v5777_v52  ;;  %v642_v0 = vsel %vm638_vm13, %v637_v55, %v5778_v51 }
 0x33b   :  { %v5781_v10 = vpop.permute.xlu1 %5780 }
 0x33c   :  { %v5783_v57 = vunpack.i.h.bf16 %v5781_v10  ;;  %v5782_v58 = vunpack.i.l.bf16 %v5781_v10  ;;  %v639_v7 = vsel %vm638_vm13, %v634_v61, %v5802_v13  ;;  %v640_v8 = vsel %vm638_vm13, %v635_v22, %v5803_v56 }
 0x33d   :  { %v5806_v44 = vpop.permute.xlu0 %5805 }
 0x33e   :  { %v5808_v1 = vunpack.i.h.bf16 %v5806_v44  ;;  %v5807_v59 = vunpack.i.l.bf16 %v5806_v44  ;;  %v646_v12 = vsel %vm643_vm14, %v641_v63, %v5782_v58  ;;  %v647_v16 = vsel %vm643_vm14, %v642_v0, %v5783_v57  ;;  %v4806_v57 = vld [vmem:[%s7794_s11] ss:$0 sm:$0xff] }
 0x33f   :  { %v5786_v53 = vpop.permute.xlu1 %5785 }
 0x340   :  { %v5788_v62 = vunpack.i.h.bf16 %v5786_v53  ;;  %v5787_v5 = vunpack.i.l.bf16 %v5786_v53  ;;  %v644_v17 = vsel %vm643_vm14, %v639_v7, %v5807_v59  ;;  %v645_v18 = vsel %vm643_vm14, %v640_v8, %v5808_v1 }
 0x341   :  { %v5811_v60 = vpop.permute.xlu0 %5810 }
 0x342   :  { %v5813_v2 = vunpack.i.h.bf16 %v5811_v60  ;;  %v5812_v3 = vunpack.i.l.bf16 %v5811_v60  ;;  %v651_v20 = vsel %vm648_vm15, %v646_v12, %v5787_v5  ;;  %v652_v21 = vsel %vm648_vm15, %v647_v16, %v5788_v62 }
 0x343   :  { %v5821_v4 = vpop.permute.xlu1 %5820  ;;  %v897_v12 = vlaneseq }
 0x344   :  { %v5823_v9 = vunpack.i.h.bf16 %v5821_v4  ;;  %v5822_v11 = vunpack.i.l.bf16 %v5821_v4  ;;  %v649_v27 = vsel %vm648_vm15, %v644_v17, %v5812_v3  ;;  %v650_v14 = vsel %vm648_vm15, %v645_v18, %v5813_v2 }
 0x345   :  { %v5816_v19 = vpop.permute.xlu0 %5815  ;;  %v898_v16 = vand.u32 127, %v897_v12 }
 0x346   :  { %v5818_v25 = vunpack.i.h.bf16 %v5816_v19  ;;  %v5817_v26 = vunpack.i.l.bf16 %v5816_v19  ;;  %v656_v28 = vsel %vm653_vm0, %v651_v20, %v5822_v11  ;;  %v657_v29 = vsel %vm653_vm0, %v652_v21, %v5823_v9  ;;  %v4569_v21 = vld [vmem:[%s7798_s15 + $0x8] sm:$0xff] }
 0x347   :  { %v659_v33 = vpack.c.bf16 %v657_v29, %v656_v28  ;;  %vm899_vm3 = vcmp.lt.s32.totalorder %v898_v16, 64  ;;  %vm900_vm4 = vcmp.ge.s32.totalorder %v898_v16, 96 }
 0x348   :  { %v654_v30 = vsel %vm653_vm0, %v649_v27, %v5817_v26  ;;  %v655_v31 = vsel %vm653_vm0, %v650_v14, %v5818_v25  ;;  %vm6702_vm6 = vmor %vm899_vm3, %vm900_vm4 }
 0x349   :  { %v658_v32 = vpack.c.bf16 %v655_v31, %v654_v30 }
 0x34b   :  { %5180 = vmatprep.mubr.msk.bf16.mxu0 %vm716_vm1, %v658_v32 }
 0x34c   :  { %5181 = vmatmul.mubr.msk.bf16.vlgmr.msra.gmra.mxu0 %vm716_vm1, %v659_v33 }
 0x34d   :  { %5223 = vmatpush3.msra.mxu0 %v6639_v35  ;;  %5230 = vmatprep.mubr.msk.f32.mxu0 %vm6249_vm2, %v6248_v36 }
 0x34e   :  { %5224 = vmatprep.subr.mxu0 %v6248_v36 }
 0x34f   :  { %5225 = vmatpush3.msra.mxu0 %v6646_v37 }
 0x350   :  { %5226 = vmatprep.subr.mxu0 %v6248_v36 }
 0x351   :  { %5227 = vmatpush3.msra.mxu0 %v6653_v15 }
 0x352   :  { %5228 = vmatprep.subr.mxu0 %v6248_v36 }
 0x353   :  { %5229 = vmatpush3.msra.mxu0 %v6661_v6 }
 0x354   :  { %5233 = vmatprep.subr.mxu0 %v6248_v36 }
 0x40c   :  { %v5182_v38 = vpop.f32.mrf.mxu0 }
 0x40d   :  { %v781_v41 = vmul.f32 %v5182_v38, %v4804_v39  ;;  %v6730_v38 = vld [vmem:[%s7796_s13 + $0x28] sm:$0xff] }
 0x40e   :  { %v757_v40 = vpop.f32.mrf.mxu0 }
 0x40f   :  { %v779_v23 = vmul.f32 %v4804_v39, %v757_v40  ;;  %v792_v48 = vadd.f32 %v4805_v42, %v781_v41  ;;  %v6744_v40 = vld [vmem:[%s7796_s13 + $0x18] sm:$0xff] }
 0x410   :  { %v5183_v10 = vpop.f32.mrf.mxu0 }
 0x411   :  { %v782_v43 = vmul.f32 %v5183_v10, %v4804_v39  ;;  %v790_v45 = vadd.f32 %v4805_v42, %v779_v23  ;;  %v796_v53 = vmax.f32 %v792_v48, 0.0  ;;  %v6751_v23 = vld [vmem:[%s7796_s13 + $0x10] sm:$0xff]  ;;  %v6758_v10 = vld [vmem:[%s7796_s13 + $0x8] sm:$0xff] }
 0x412   :  { %v760_v44 = vpop.f32.mrf.mxu0 }
 0x413   :  { %v793_v46 = vadd.f32 %v4805_v42, %v782_v43  ;;  %v780_v47 = vmul.f32 %v4804_v39, %v760_v44  ;;  %v794_v51 = vmax.f32 %v790_v45, 0.0  ;;  %v6737_v39 = vld [vmem:[%s7796_s13 + $0x20] sm:$0xff] }
 0x415   :  { %v791_v49 = vadd.f32 %v4805_v42, %v780_v47  ;;  %v797_v50 = vmax.f32 %v793_v46, 0.0  ;;  %v6768_v42 = vld [vmem:[%s7796_s13] sm:$0xff] }
 0x416   :  { %v6807_v47 = vld [vmem:[%s7797_s14] ss:$0 sm:$0xff] }
 0x417   :  { %v795_v52 = vmax.f32 %v791_v49, 0.0  ;;  %v799_v55 = vpack.c.bf16 %v797_v50, %v796_v53 }
 0x419   :  { %v798_v54 = vpack.c.bf16 %v795_v52, %v794_v51 }
 0x41b   :  { %5188 = vmatprep.mubr.msk.bf16.mxu1 %vm361_vm10, %v798_v54 }
 0x41c   :  { %5189 = vmatmul.mubr.msk.bf16.vlgmr.msra.gmra.mxu1 %vm361_vm10, %v799_v55 }
 0x41d   :  { %5193 = vmatpush3.msra.mxu1 %v6639_v35  ;;  %5200 = vmatprep.mubr.msk.f32.mxu1 %vm6249_vm2, %v6248_v36 }
 0x41e   :  { %5194 = vmatprep.subr.mxu1 %v6248_v36 }
 0x41f   :  { %5195 = vmatpush3.msra.mxu1 %v6646_v37 }
 0x420   :  { %5196 = vmatprep.subr.mxu1 %v6248_v36 }
 0x421   :  { %5197 = vmatpush3.msra.mxu1 %v6653_v15 }
 0x422   :  { %5198 = vmatprep.subr.mxu1 %v6248_v36 }
 0x423   :  { %5199 = vmatpush3.msra.mxu1 %v6661_v6 }
 0x424   :  { %5201 = vmatmul.mubr.f32.vlgmr.msra.gmra.mxu1 %v6248_v36  ;;  %5203 = vmatprep.subr.mxu1 %v6248_v36 }
 0x425   :  { %5219 = vmatprep.mubr.msk.f32.mxu1 %vm6249_vm2, %v6248_v36  ;;  %5204 = vmatpush3.msra.mxu1 %v6718_v24 }
 0x426   :  { %5205 = vmatprep.subr.mxu1 %v6248_v36 }
 0x427   :  { %5206 = vmatpush3.msra.mxu1 %v6723_v34 }
 0x428   :  { %5207 = vmatprep.subr.mxu1 %v6248_v36 }
 0x429   :  { %5208 = vmatpush3.msra.mxu1 %v6730_v38 }
 0x42a   :  { %5209 = vmatprep.subr.mxu1 %v6248_v36 }
 0x42b   :  { %5210 = vmatpush3.msra.mxu1 %v6737_v39 }
 0x42c   :  { %5211 = vmatprep.subr.mxu1 %v6248_v36 }
 0x42d   :  { %5212 = vmatpush3.msra.mxu1 %v6744_v40 }
 0x42e   :  { %5213 = vmatprep.subr.mxu1 %v6248_v36 }
 0x42f   :  { %5214 = vmatpush3.msra.mxu1 %v6751_v23 }
 0x430   :  { %5215 = vmatprep.subr.mxu1 %v6248_v36 }
 0x431   :  { %5216 = vmatpush3.msra.mxu1 %v6758_v10 }
 0x432   :  { %5217 = vmatprep.subr.mxu1 %v6248_v36 }
 0x433   :  { %5218 = vmatpush3.msra.mxu1 %v6768_v42 }
 0x434   :  { %5252 = vmatprep.subr.mxu1 %v6248_v36 }
 0x4dc   :  { %v5190_v56 = vpop.f32.mrf.mxu1 }
 0x4dd   :  { %v6698_v62 = vadd.f32 %v5190_v56, %v4806_v57 }
 0x4de   :  { %v863_v13 = vpop.f32.mrf.mxu1 }
 0x4df   :  { %v6694_v60 = vadd.f32 %v4806_v57, %v863_v13 }
 0x4e0   :  { %v5191_v58 = vpop.f32.mrf.mxu1 }
 0x4e1   :  { %v6692_v1 = vadd.f32 %v5191_v58, %v4806_v57 }
 0x4e2   :  { %v866_v59 = vpop.f32.mrf.mxu1 }
 0x4e3   :  { %v6696_v61 = vadd.f32 %v4806_v57, %v866_v59 }
 0x4e4   :  { %v971_v22 = vpop.f32.mrf.mxu1 }
 0x4e5   :  { %v976_v5 = vrot.slane %v971_v22, 1  ;;  %v979_v63 = vadd.f32 %v971_v22, %v6694_v60 }
 0x4e6   :  { %v5202_v0 = vpop.f32.mrf.mxu1 }
 0x4e7   :  { %v980_v2 = vadd.f32 %v976_v5, %v6698_v62  ;;  %v4812_v3 = vmul.f32 -1.442695, %v979_v63 }
 0x4e9   :  { %5837 = vpow2.f32 %v4812_v3  ;;  %v4813_v4 = vmul.f32 -1.442695, %v980_v2 }
 0x4eb   :  { %5839 = vpow2.f32 %v4813_v4 }
 0x4ec   :  { %5841 = vtanh.f32 %v980_v2 }
 0x4f6   :  { %v5838_v7 = vpop.eup %5837 }
 0x4f7   :  { %v987_v9 = vadd.f32 1.0, %v5838_v7 }
 0x4f8   :  { %v5840_v8 = vpop.eup %5839 }
 0x4f9   :  { %v988_v11 = vadd.f32 1.0, %v5840_v8  ;;  %v5842_v17 = vpop.eup %5841 }
 0x4fa   :  { %v1003_v18 = vrot.slane %v5842_v17, 7 }
 0x4fb   :  { %5843 = vrcp.f32 %v988_v11 }
 0x4fc   :  { %5845 = vtanh.f32 %v979_v63 }
 0x4fd   :  { %5847 = vrcp.f32 %v987_v9 }
 0x508   :  { %v5844_v19 = vpop.eup %5843 }
 0x509   :  { %v5846_v20 = vpop.eup %5845  ;;  %v997_v25 = vrot.slane %v5844_v19, 7 }
 0x50a   :  { %v5848_v26 = vpop.eup %5847  ;;  %v1004_v14 = vsel %vm998_vm5, %v1003_v18, %v5846_v20 }
 0x50b   :  { %v999_v27 = vsel %vm998_vm5, %v997_v25, %v5848_v26 }
 0x50c   :  { %v1006_v28 = vsel %vm6702_vm6, %v999_v27, %v1004_v14 }
 0x50d   :  { %1009 = vrot.lane.b32.xlu0 %v1006_v28, %s6245_s30  ;;  %v1007_v31 = vmul.f32 0.0, %v1006_v28 }
 0x57f   :  { %v1010_v29 = vpop.permute.xlu0 %1009 }
 0x580   :  { %v1012_v30 = vmul.f32 %v1010_v29, %v1006_v28 }
 0x582   :  { %1014 = vrot.lane.b32.xlu1 %v1012_v30, %s6243_s27 }
 0x5f4   :  { %v1015_v32 = vpop.permute.xlu1 %1014 }
 0x5f5   :  { %v6712_v33 = vadd.f32 %v1015_v32, %v1007_v31 }
 0x5f7   :  { %5849 = vtanh.f32 %v6712_v33 }
 0x604   :  { %v5850_v41 = vpop.eup %5849 }
 0x605   :  { %1020 = vrot.lane.b32.xlu0 %v5850_v41, %s6245_s30 }
 0x677   :  { %v1021_v43 = vpop.permute.xlu0 %1020 }
 0x678   :  { %v1023_v44 = vmul.f32 %v1021_v43, %v1006_v28 }
 0x67a   :  { %1025 = vrot.lane.b32.xlu1 %v1023_v44, %s6243_s27 }
 0x6ec   :  { %v1026_v45 = vpop.permute.xlu1 %1025 }
 0x6ed   :  { %v1028_v46 = vsel %vm361_vm10, %v1026_v45, 0.0  ;;  %5231 = vmatmul.mubr.msk.f32.vlgmr.msra.gmra.mxu0 %vm361_vm10, %v1026_v45 }
 0x6ee   :  { %5220 = vmatmul.mubr.msk.f32.vlgmr.msra.gmra.mxu1 %vm643_vm14, %v1028_v46  ;;  %5234 = vmatpush3.msra.mxu0 %v6718_v24 }
 0x6ef   :  { %5235 = vmatprep.subr.mxu0 %v6248_v36  ;;  %5253 = vmatpush3.msra.mxu1 %v6639_v35 }
 0x6f0   :  { %5236 = vmatpush3.msra.mxu0 %v6723_v34  ;;  %5254 = vmatprep.subr.mxu1 %v6248_v36 }
 0x6f1   :  { %5237 = vmatprep.subr.mxu0 %v6248_v36  ;;  %5255 = vmatpush3.msra.mxu1 %v6646_v37 }
 0x6f2   :  { %5238 = vmatpush3.msra.mxu0 %v6730_v38  ;;  %5256 = vmatprep.subr.mxu1 %v6248_v36 }
 0x6f3   :  { %5239 = vmatprep.subr.mxu0 %v6248_v36  ;;  %5257 = vmatpush3.msra.mxu1 %v6653_v15 }
 0x6f4   :  { %5240 = vmatpush3.msra.mxu0 %v6737_v39  ;;  %5258 = vmatprep.subr.mxu1 %v6248_v36 }
 0x6f5   :  { %5241 = vmatprep.subr.mxu0 %v6248_v36  ;;  %5259 = vmatpush3.msra.mxu1 %v6661_v6 }
 0x6f6   :  { %5242 = vmatpush3.msra.mxu0 %v6744_v40  ;;  %5260 = vmatprep.mubr.msk.f32.mxu1 %vm6249_vm2, %v6248_v36 }
 0x6f7   :  { %5243 = vmatprep.subr.mxu0 %v6248_v36  ;;  %5249 = vmatprep.mubr.msk.f32.mxu0 %vm6249_vm2, %v6248_v36 }
 0x6f8   :  { %5244 = vmatpush3.msra.mxu0 %v6751_v23  ;;  %5263 = vmatprep.subr.mxu1 %v6248_v36 }
 0x6f9   :  { %5245 = vmatprep.subr.mxu0 %v6248_v36 }
 0x6fa   :  { %5246 = vmatpush3.msra.mxu0 %v6758_v10 }
 0x6fb   :  { %5247 = vmatprep.subr.mxu0 %v6248_v36 }
 0x6fc   :  { %5248 = vmatpush3.msra.mxu0 %v6768_v42 }
 0x6fd   :  { %5282 = vmatprep.subr.mxu0 %v6248_v36 }
 0x7ad   :  { %v1195_v48 = vpop.f32.mrf.mxu0 }
 0x7ae   :  { %v1200_v49 = vrot.slane %v1195_v48, 7  ;;  %v1204_v50 = vadd.f32 %v1195_v48, %v6698_v62  ;;  %v1098_v51 = vpop.f32.mrf.mxu1 }
 0x7af   :  { %v1099_v52 = vadd.f32 %v6807_v47, %v1098_v51  ;;  %v5232_v53 = vpop.f32.mrf.mxu0 }
 0x7b0   :  { %v1203_v54 = vadd.f32 %v1200_v49, %v6694_v60  ;;  %v4818_v55 = vmul.f32 -1.442695, %v1204_v50  ;;  %v5221_v56 = vpop.f32.mrf.mxu1 }
 0x7b1   :  { %v4815_v13 = vmul.f32 -1.442695, %v1099_v52 }
 0x7b2   :  { %v4817_v57 = vmul.f32 -1.442695, %v1203_v54  ;;  %5851 = vpow2.f32 %v4818_v55 }
 0x7b4   :  { %5853 = vpow2.f32 %v4817_v57 }
 0x7b5   :  { %5855 = vpow2.f32 %v4815_v13 }
 0x7b6   :  { %5857 = vtanh.f32 %v1203_v54 }
 0x7b7   :  { %5859 = vtanh.f32 %v1204_v50 }
 0x7b8   :  { %5861 = vtanh.f32 %v1099_v52 }
 0x7bf   :  { %v5852_v58 = vpop.eup %5851 }
 0x7c0   :  { %v1212_v63 = vadd.f32 1.0, %v5852_v58 }
 0x7c1   :  { %v5854_v59 = vpop.eup %5853 }
 0x7c2   :  { %v5856_v22 = vpop.eup %5855  ;;  %v1211_v5 = vadd.f32 1.0, %v5854_v59 }
 0x7c3   :  { %v1105_v0 = vadd.f32 1.0, %v5856_v22  ;;  %v5858_v2 = vpop.eup %5857 }
 0x7c4   :  { %5863 = vrcp.f32 %v1211_v5  ;;  %v5860_v3 = vpop.eup %5859  ;;  %v1226_v7 = vrot.slane %v5858_v2, 1 }
 0x7c5   :  { %5865 = vrcp.f32 %v1105_v0  ;;  %v5862_v4 = vpop.eup %5861 }
 0x7c6   :  { %5867 = vrcp.f32 %v1212_v63  ;;  %v1227_v18 = vsel %vm998_vm5, %v5860_v3, %v1226_v7 }
 0x7d1   :  { %v5864_v8 = vpop.eup %5863 }
 0x7d2   :  { %v5866_v9 = vpop.eup %5865  ;;  %v1221_v11 = vrot.slane %v5864_v8, 1 }
 0x7d3   :  { %v5868_v12 = vpop.eup %5867  ;;  %v1109_v16 = vsel %vm6702_vm6, %v5866_v9, %v5862_v4 }
 0x7d4   :  { %1112 = vrot.lane.b32.xlu1 %v1109_v16, %s6245_s30  ;;  %v1222_v17 = vsel %vm998_vm5, %v5868_v12, %v1221_v11  ;;  %v1110_v14 = vmul.f32 0.0, %v1109_v16 }
 0x7d5   :  { %v1229_v19 = vsel %vm6702_vm6, %v1222_v17, %v1227_v18 }
 0x7d6   :  { %1232 = vrot.lane.b32.xlu0 %v1229_v19, %s6245_s30  ;;  %v1230_v30 = vmul.f32 %v1229_v19, %v6712_v33 }
 0x846   :  { %v1113_v20 = vpop.permute.xlu1 %1112 }
 0x847   :  { %v1115_v25 = vmul.f32 %v1113_v20, %v1109_v16 }
 0x848   :  { %v1233_v26 = vpop.permute.xlu0 %1232 }
 0x849   :  { %1117 = vrot.lane.b32.xlu1 %v1115_v25, %s6243_s27  ;;  %v1235_v27 = vmul.f32 %v1233_v26, %v1229_v19 }
 0x84b   :  { %1237 = vrot.lane.b32.xlu0 %v1235_v27, %s6243_s27 }
 0x8bb   :  { %v1118_v28 = vpop.permute.xlu1 %1117 }
 0x8bc   :  { %v6822_v29 = vadd.f32 %v1118_v28, %v1110_v14 }
 0x8bd   :  { %v1238_v31 = vpop.permute.xlu0 %1237 }
 0x8be   :  { %5869 = vtanh.f32 %v6822_v29  ;;  %v6826_v32 = vadd.f32 %v1238_v31, %v1230_v30 }
 0x8c0   :  { %5871 = vtanh.f32 %v6826_v32 }
 0x8cb   :  { %v5870_v41 = vpop.eup %5869 }
 0x8cc   :  { %1123 = vrot.lane.b32.xlu1 %v5870_v41, %s6245_s30 }
 0x8cd   :  { %v5872_v43 = vpop.eup %5871 }
 0x8ce   :  { %1243 = vrot.lane.b32.xlu0 %v5872_v43, %s6245_s30 }
 0x93e   :  { %v1124_v44 = vpop.permute.xlu1 %1123 }
 0x93f   :  { %v1126_v45 = vmul.f32 %v1124_v44, %v1109_v16 }
 0x940   :  { %v1244_v46 = vpop.permute.xlu0 %1243 }
 0x941   :  { %1252 = vrot.lane.b32.xlu1 %v1126_v45, %s6245_s30  ;;  %v1246_v48 = vmul.f32 %v1244_v46, %v1229_v19 }
 0x943   :  { %1248 = vrot.lane.b32.xlu0 %v1246_v48, %s6243_s27 }
 0x9b3   :  { %v1253_v33 = vpop.permute.xlu1 %1252 }
 0x9b5   :  { %v1249_v49 = vpop.permute.xlu0 %1248 }
 0x9b6   :  { %v1255_v50 = vsel %vm361_vm10, %v1249_v49, %v1253_v33  ;;  %5261 = vmatmul.mubr.msk.f32.vlgmr.msra.gmra.mxu1 %vm361_vm10, %v1249_v49 }
 0x9b7   :  { %5250 = vmatmul.mubr.msk.f32.vlgmr.msra.gmra.mxu0 %vm643_vm14, %v1255_v50  ;;  %5264 = vmatpush3.msra.mxu1 %v6718_v24 }
 0x9b8   :  { %5265 = vmatprep.subr.mxu1 %v6248_v36  ;;  %5283 = vmatpush3.msra.mxu0 %v6639_v35 }
 0x9b9   :  { %5266 = vmatpush3.msra.mxu1 %v6723_v34  ;;  %5284 = vmatprep.subr.mxu0 %v6248_v36 }
 0x9ba   :  { %5267 = vmatprep.subr.mxu1 %v6248_v36  ;;  %5285 = vmatpush3.msra.mxu0 %v6646_v37 }
 0x9bb   :  { %5268 = vmatpush3.msra.mxu1 %v6730_v38  ;;  %5286 = vmatprep.subr.mxu0 %v6248_v36 }
 0x9bc   :  { %5269 = vmatprep.subr.mxu1 %v6248_v36  ;;  %5287 = vmatpush3.msra.mxu0 %v6653_v15 }
 0x9bd   :  { %5270 = vmatpush3.msra.mxu1 %v6737_v39  ;;  %5288 = vmatprep.subr.mxu0 %v6248_v36 }
 0x9be   :  { %5271 = vmatprep.subr.mxu1 %v6248_v36  ;;  %5289 = vmatpush3.msra.mxu0 %v6661_v6 }
 0x9bf   :  { %5272 = vmatpush3.msra.mxu1 %v6744_v40  ;;  %5290 = vmatprep.mubr.msk.f32.mxu0 %vm6249_vm2, %v6248_v36 }
 0x9c0   :  { %5273 = vmatprep.subr.mxu1 %v6248_v36  ;;  %5279 = vmatprep.mubr.msk.f32.mxu1 %vm6249_vm2, %v6248_v36 }
 0x9c1   :  { %5274 = vmatpush3.msra.mxu1 %v6751_v23  ;;  %5293 = vmatprep.subr.mxu0 %v6248_v36 }
 0x9c2   :  { %5275 = vmatprep.subr.mxu1 %v6248_v36 }
 0x9c3   :  { %5276 = vmatpush3.msra.mxu1 %v6758_v10 }
 0x9c4   :  { %5277 = vmatprep.subr.mxu1 %v6248_v36 }
 0x9c5   :  { %5278 = vmatpush3.msra.mxu1 %v6768_v42 }
 0x9c6   :  { %5312 = vmatprep.subr.mxu1 %v6248_v36 }
 0xa76   :  { %v1422_v51 = vpop.f32.mrf.mxu1 }
 0xa77   :  { %v1427_v52 = vrot.slane %v1422_v51, 6  ;;  %v1428_v53 = vrot.slane %v1422_v51, 7  ;;  %v1325_v54 = vpop.f32.mrf.mxu0 }
 0xa78   :  { %v1326_v55 = vadd.f32 %v6807_v47, %v1325_v54  ;;  %v5262_v56 = vpop.f32.mrf.mxu1 }
 0xa79   :  { %v1431_v13 = vadd.f32 %v1427_v52, %v6694_v60  ;;  %v1432_v57 = vadd.f32 %v1428_v53, %v6698_v62  ;;  %v5251_v58 = vpop.f32.mrf.mxu0 }
 0xa7a   :  { %v4820_v5 = vmul.f32 -1.442695, %v1326_v55 }
 0xa7b   :  { %v4822_v59 = vmul.f32 -1.442695, %v1431_v13  ;;  %v4823_v22 = vmul.f32 -1.442695, %v1432_v57 }
 0xa7d   :  { %5873 = vpow2.f32 %v4822_v59 }
 0xa7e   :  { %5875 = vpow2.f32 %v4823_v22 }
 0xa7f   :  { %5877 = vpow2.f32 %v4820_v5 }
 0xa80   :  { %5879 = vtanh.f32 %v1431_v13 }
 0xa81   :  { %5881 = vtanh.f32 %v1432_v57 }
 0xa82   :  { %5883 = vtanh.f32 %v1326_v55 }
 0xa8a   :  { %v5874_v63 = vpop.eup %5873 }
 0xa8b   :  { %v5876_v0 = vpop.eup %5875  ;;  %v1439_v2 = vadd.f32 1.0, %v5874_v63 }
 0xa8c   :  { %v5878_v3 = vpop.eup %5877  ;;  %v1440_v4 = vadd.f32 1.0, %v5876_v0 }
 0xa8d   :  { %5885 = vrcp.f32 %v1439_v2  ;;  %v1332_v7 = vadd.f32 1.0, %v5878_v3  ;;  %v5880_v8 = vpop.eup %5879 }
 0xa8e   :  { %5887 = vrcp.f32 %v1440_v4  ;;  %v5882_v9 = vpop.eup %5881  ;;  %v1455_v16 = vrot.slane %v5880_v8, 2 }
 0xa8f   :  { %5889 = vrcp.f32 %v1332_v7  ;;  %v5884_v11 = vpop.eup %5883  ;;  %v1456_v17 = vrot.slane %v5882_v9, 1 }
 0xa91   :  { %v1457_v14 = vsel %vm998_vm5, %v1456_v17, %v1455_v16 }
 0xa9a   :  { %v5886_v12 = vpop.eup %5885 }
 0xa9b   :  { %v5888_v18 = vpop.eup %5887  ;;  %v1449_v19 = vrot.slane %v5886_v12, 2 }
 0xa9c   :  { %v5890_v20 = vpop.eup %5889  ;;  %v1450_v25 = vrot.slane %v5888_v18, 1 }
 0xa9d   :  { %v1336_v26 = vsel %vm6702_vm6, %v5890_v20, %v5884_v11 }
 0xa9e   :  { %1339 = vrot.lane.b32.xlu1 %v1336_v26, %s6245_s30  ;;  %v1451_v27 = vsel %vm998_vm5, %v1450_v25, %v1449_v19  ;;  %v1337_v44 = vmul.f32 %v1336_v26, %v6822_v29 }
 0xa9f   :  { %v1459_v28 = vsel %vm6702_vm6, %v1451_v27, %v1457_v14 }
 0xaa0   :  { %1462 = vrot.lane.b32.xlu0 %v1459_v28, %s6245_s30  ;;  %v1460_v48 = vmul.f32 %v1459_v28, %v6826_v32 }
 0xb10   :  { %v1340_v30 = vpop.permute.xlu1 %1339 }
 0xb11   :  { %v1342_v31 = vmul.f32 %v1340_v30, %v1336_v26 }
 0xb12   :  { %v1463_v41 = vpop.permute.xlu0 %1462 }
 0xb13   :  { %1344 = vrot.lane.b32.xlu1 %v1342_v31, %s6243_s27  ;;  %v1465_v43 = vmul.f32 %v1463_v41, %v1459_v28 }
 0xb15   :  { %1467 = vrot.lane.b32.xlu0 %v1465_v43, %s6243_s27 }
 0xb85   :  { %v1345_v45 = vpop.permute.xlu1 %1344 }
 0xb86   :  { %v6878_v46 = vadd.f32 %v1345_v45, %v1337_v44 }
 0xb87   :  { %v1468_v33 = vpop.permute.xlu0 %1467 }
 0xb88   :  { %5891 = vtanh.f32 %v6878_v46  ;;  %v6882_v49 = vadd.f32 %v1468_v33, %v1460_v48 }
 0xb8a   :  { %5893 = vtanh.f32 %v6882_v49 }
 0xb95   :  { %v5892_v50 = vpop.eup %5891 }
 0xb96   :  { %1350 = vrot.lane.b32.xlu1 %v5892_v50, %s6245_s30 }
 0xb97   :  { %v5894_v51 = vpop.eup %5893 }
 0xb98   :  { %1473 = vrot.lane.b32.xlu0 %v5894_v51, %s6245_s30 }
 0xc08   :  { %v1351_v52 = vpop.permute.xlu1 %1350 }
 0xc09   :  { %v1353_v29 = vmul.f32 %v1351_v52, %v1336_v26 }
 0xc0a   :  { %v1474_v53 = vpop.permute.xlu0 %1473 }
 0xc0b   :  { %1482 = vrot.lane.b32.xlu1 %v1353_v29, %s6245_s30  ;;  %v1476_v54 = vmul.f32 %v1474_v53, %v1459_v28 }
 0xc0d   :  { %1478 = vrot.lane.b32.xlu0 %v1476_v54, %s6243_s27 }
 0xc7d   :  { %v1483_v32 = vpop.permute.xlu1 %1482 }
 0xc7f   :  { %v1479_v55 = vpop.permute.xlu0 %1478 }
 0xc80   :  { %v1485_v56 = vsel %vm361_vm10, %v1479_v55, %v1483_v32  ;;  %5291 = vmatmul.mubr.msk.f32.vlgmr.msra.gmra.mxu0 %vm361_vm10, %v1479_v55 }
 0xc81   :  { %5280 = vmatmul.mubr.msk.f32.vlgmr.msra.gmra.mxu1 %vm643_vm14, %v1485_v56  ;;  %5294 = vmatpush3.msra.mxu0 %v6718_v24 }
 0xc82   :  { %5295 = vmatprep.subr.mxu0 %v6248_v36  ;;  %5313 = vmatpush3.msra.mxu1 %v6639_v35 }
 0xc83   :  { %5296 = vmatpush3.msra.mxu0 %v6723_v34  ;;  %5314 = vmatprep.subr.mxu1 %v6248_v36 }
 0xc84   :  { %5297 = vmatprep.subr.mxu0 %v6248_v36  ;;  %5315 = vmatpush3.msra.mxu1 %v6646_v37 }
 0xc85   :  { %5298 = vmatpush3.msra.mxu0 %v6730_v38  ;;  %5316 = vmatprep.subr.mxu1 %v6248_v36 }
 0xc86   :  { %5299 = vmatprep.subr.mxu0 %v6248_v36  ;;  %5317 = vmatpush3.msra.mxu1 %v6653_v15 }
 0xc87   :  { %5300 = vmatpush3.msra.mxu0 %v6737_v39  ;;  %5318 = vmatprep.subr.mxu1 %v6248_v36 }
 0xc88   :  { %5301 = vmatprep.subr.mxu0 %v6248_v36  ;;  %5319 = vmatpush3.msra.mxu1 %v6661_v6 }
 0xc89   :  { %5302 = vmatpush3.msra.mxu0 %v6744_v40  ;;  %5320 = vmatprep.mubr.msk.f32.mxu1 %vm6249_vm2, %v6248_v36 }
 0xc8a   :  { %5303 = vmatprep.subr.mxu0 %v6248_v36  ;;  %5309 = vmatprep.mubr.msk.f32.mxu0 %vm6249_vm2, %v6248_v36 }
 0xc8b   :  { %5304 = vmatpush3.msra.mxu0 %v6751_v23  ;;  %5323 = vmatprep.subr.mxu1 %v6248_v36 }
 0xc8c   :  { %5305 = vmatprep.subr.mxu0 %v6248_v36 }
 0xc8d   :  { %5306 = vmatpush3.msra.mxu0 %v6758_v10 }
 0xc8e   :  { %5307 = vmatprep.subr.mxu0 %v6248_v36 }
 0xc8f   :  { %5308 = vmatpush3.msra.mxu0 %v6768_v42 }
 0xc90   :  { %5342 = vmatprep.subr.mxu0 %v6248_v36 }
 0xd40   :  { %v1652_v13 = vpop.f32.mrf.mxu0 }
 0xd41   :  { %v1657_v57 = vrot.slane %v1652_v13, 5  ;;  %v1658_v58 = vrot.slane %v1652_v13, 6  ;;  %v1555_v59 = vpop.f32.mrf.mxu1 }
 0xd42   :  { %v1556_v22 = vadd.f32 %v6807_v47, %v1555_v59  ;;  %v5292_v5 = vpop.f32.mrf.mxu0 }
 0xd43   :  { %v1661_v63 = vadd.f32 %v1657_v57, %v6694_v60  ;;  %v1662_v0 = vadd.f32 %v1658_v58, %v6698_v62  ;;  %v5281_v2 = vpop.f32.mrf.mxu1 }
 0xd44   :  { %v4825_v7 = vmul.f32 -1.442695, %v1556_v22 }
 0xd45   :  { %v4827_v3 = vmul.f32 -1.442695, %v1661_v63  ;;  %v4828_v4 = vmul.f32 -1.442695, %v1662_v0 }
 0xd47   :  { %5895 = vpow2.f32 %v4827_v3 }
 0xd48   :  { %5897 = vpow2.f32 %v4828_v4 }
 0xd49   :  { %5899 = vpow2.f32 %v4825_v7 }
 0xd4a   :  { %5901 = vtanh.f32 %v1661_v63 }
 0xd4b   :  { %5903 = vtanh.f32 %v1662_v0 }
 0xd4c   :  { %5905 = vtanh.f32 %v1556_v22 }
 0xd54   :  { %v5896_v8 = vpop.eup %5895 }
 0xd55   :  { %v5898_v9 = vpop.eup %5897  ;;  %v1669_v11 = vadd.f32 1.0, %v5896_v8 }
 0xd56   :  { %v5900_v12 = vpop.eup %5899  ;;  %v1670_v16 = vadd.f32 1.0, %v5898_v9 }
 0xd57   :  { %5907 = vrcp.f32 %v1669_v11  ;;  %v1562_v17 = vadd.f32 1.0, %v5900_v12  ;;  %v5902_v18 = vpop.eup %5901 }
 0xd58   :  { %5909 = vrcp.f32 %v1670_v16  ;;  %v5904_v19 = vpop.eup %5903  ;;  %v1685_v26 = vrot.slane %v5902_v18, 3 }
 0xd59   :  { %5911 = vrcp.f32 %v1562_v17  ;;  %v5906_v20 = vpop.eup %5905  ;;  %v1686_v27 = vrot.slane %v5904_v19, 2 }
 0xd5b   :  { %v1687_v44 = vsel %vm998_vm5, %v1686_v27, %v1685_v26 }
 0xd64   :  { %v5908_v25 = vpop.eup %5907 }
 0xd65   :  { %v5910_v14 = vpop.eup %5909  ;;  %v1679_v28 = vrot.slane %v5908_v25, 3 }
 0xd66   :  { %v5912_v30 = vpop.eup %5911  ;;  %v1680_v31 = vrot.slane %v5910_v14, 2 }
 0xd67   :  { %v1566_v41 = vsel %vm6702_vm6, %v5912_v30, %v5906_v20 }
 0xd68   :  { %1569 = vrot.lane.b32.xlu1 %v1566_v41, %s6245_s30  ;;  %v1681_v43 = vsel %vm998_vm5, %v1680_v31, %v1679_v28  ;;  %v1567_v52 = vmul.f32 %v1566_v41, %v6878_v46 }
 0xd69   :  { %v1689_v45 = vsel %vm6702_vm6, %v1681_v43, %v1687_v44 }
 0xd6a   :  { %1692 = vrot.lane.b32.xlu0 %v1689_v45, %s6245_s30  ;;  %v1690_v54 = vmul.f32 %v1689_v45, %v6882_v49 }
 0xdda   :  { %v1570_v48 = vpop.permute.xlu1 %1569 }
 0xddb   :  { %v1572_v33 = vmul.f32 %v1570_v48, %v1566_v41 }
 0xddc   :  { %v1693_v50 = vpop.permute.xlu0 %1692 }
 0xddd   :  { %1574 = vrot.lane.b32.xlu1 %v1572_v33, %s6243_s27  ;;  %v1695_v51 = vmul.f32 %v1693_v50, %v1689_v45 }
 0xddf   :  { %1697 = vrot.lane.b32.xlu0 %v1695_v51, %s6243_s27 }
 0xe4f   :  { %v1575_v29 = vpop.permute.xlu1 %1574 }
 0xe50   :  { %v6934_v53 = vadd.f32 %v1575_v29, %v1567_v52 }
 0xe51   :  { %v1698_v32 = vpop.permute.xlu0 %1697 }
 0xe52   :  { %5913 = vtanh.f32 %v6934_v53  ;;  %v6938_v55 = vadd.f32 %v1698_v32, %v1690_v54 }
 0xe54   :  { %5915 = vtanh.f32 %v6938_v55 }
 0xe5f   :  { %v5914_v56 = vpop.eup %5913 }
 0xe60   :  { %1580 = vrot.lane.b32.xlu1 %v5914_v56, %s6245_s30 }
 0xe61   :  { %v5916_v13 = vpop.eup %5915 }
 0xe62   :  { %1703 = vrot.lane.b32.xlu0 %v5916_v13, %s6245_s30 }
 0xed2   :  { %v1581_v57 = vpop.permute.xlu1 %1580 }
 0xed3   :  { %v1583_v46 = vmul.f32 %v1581_v57, %v1566_v41 }
 0xed4   :  { %v1704_v58 = vpop.permute.xlu0 %1703 }
 0xed5   :  { %1712 = vrot.lane.b32.xlu1 %v1583_v46, %s6245_s30  ;;  %v1706_v59 = vmul.f32 %v1704_v58, %v1689_v45 }
 0xed7   :  { %1708 = vrot.lane.b32.xlu0 %v1706_v59, %s6243_s27 }
 0xf47   :  { %v1713_v49 = vpop.permute.xlu1 %1712 }
 0xf49   :  { %v1709_v22 = vpop.permute.xlu0 %1708 }
 0xf4a   :  { %v1715_v5 = vsel %vm361_vm10, %v1709_v22, %v1713_v49  ;;  %5321 = vmatmul.mubr.msk.f32.vlgmr.msra.gmra.mxu1 %vm361_vm10, %v1709_v22 }
 0xf4b   :  { %5310 = vmatmul.mubr.msk.f32.vlgmr.msra.gmra.mxu0 %vm643_vm14, %v1715_v5  ;;  %5324 = vmatpush3.msra.mxu1 %v6718_v24 }
 0xf4c   :  { %5325 = vmatprep.subr.mxu1 %v6248_v36  ;;  %5343 = vmatpush3.msra.mxu0 %v6639_v35 }
 0xf4d   :  { %5326 = vmatpush3.msra.mxu1 %v6723_v34  ;;  %5344 = vmatprep.subr.mxu0 %v6248_v36 }
 0xf4e   :  { %5327 = vmatprep.subr.mxu1 %v6248_v36  ;;  %5345 = vmatpush3.msra.mxu0 %v6646_v37 }
 0xf4f   :  { %5328 = vmatpush3.msra.mxu1 %v6730_v38  ;;  %5346 = vmatprep.subr.mxu0 %v6248_v36 }
 0xf50   :  { %5329 = vmatprep.subr.mxu1 %v6248_v36  ;;  %5347 = vmatpush3.msra.mxu0 %v6653_v15 }
 0xf51   :  { %5330 = vmatpush3.msra.mxu1 %v6737_v39  ;;  %5348 = vmatprep.subr.mxu0 %v6248_v36 }
 0xf52   :  { %5331 = vmatprep.subr.mxu1 %v6248_v36  ;;  %5349 = vmatpush3.msra.mxu0 %v6661_v6 }
 0xf53   :  { %5332 = vmatpush3.msra.mxu1 %v6744_v40  ;;  %5350 = vmatprep.mubr.msk.f32.mxu0 %vm6249_vm2, %v6248_v36 }
 0xf54   :  { %5333 = vmatprep.subr.mxu1 %v6248_v36  ;;  %5339 = vmatprep.mubr.msk.f32.mxu1 %vm6249_vm2, %v6248_v36 }
 0xf55   :  { %5334 = vmatpush3.msra.mxu1 %v6751_v23  ;;  %5353 = vmatprep.subr.mxu0 %v6248_v36 }
 0xf56   :  { %5335 = vmatprep.subr.mxu1 %v6248_v36 }
 0xf57   :  { %5336 = vmatpush3.msra.mxu1 %v6758_v10 }
 0xf58   :  { %5337 = vmatprep.subr.mxu1 %v6248_v36 }
 0xf59   :  { %5338 = vmatpush3.msra.mxu1 %v6768_v42 }
 0xf5a   :  { %5372 = vmatprep.subr.mxu1 %v6248_v36 }
0x100a   :  { %v1882_v35 = vpop.f32.mrf.mxu1 }
0x100b   :  { %v1887_v37 = vrot.slane %v1882_v35, 4  ;;  %v1888_v15 = vrot.slane %v1882_v35, 5  ;;  %v1785_v6 = vpop.f32.mrf.mxu0 }
0x100c   :  { %v1786_v63 = vadd.f32 %v6807_v47, %v1785_v6  ;;  %v5322_v0 = vpop.f32.mrf.mxu1  ;;  %v7018_v6 = vld [vmem:[%s7795_s12 + $0x10] sm:$0xff] }
0x100d   :  { %v1891_v2 = vadd.f32 %v1887_v37, %v6694_v60  ;;  %v1892_v3 = vadd.f32 %v1888_v15, %v6698_v62  ;;  %v5311_v4 = vpop.f32.mrf.mxu0  ;;  %v7009_v15 = vld [vmem:[%s7795_s12 + $0x18] sm:$0xff] }
0x100e   :  { %v4830_v9 = vmul.f32 -1.442695, %v1786_v63 }
0x100f   :  { %v4832_v7 = vmul.f32 -1.442695, %v1891_v2  ;;  %v4833_v8 = vmul.f32 -1.442695, %v1892_v3 }
0x1011   :  { %5917 = vpow2.f32 %v4832_v7 }
0x1012   :  { %5919 = vpow2.f32 %v4833_v8 }
0x1013   :  { %5921 = vpow2.f32 %v4830_v9 }
0x1014   :  { %5923 = vtanh.f32 %v1891_v2 }
0x1015   :  { %5925 = vtanh.f32 %v1892_v3 }
0x1016   :  { %5927 = vtanh.f32 %v1786_v63 }
0x101e   :  { %v5918_v11 = vpop.eup %5917 }
0x101f   :  { %v5920_v12 = vpop.eup %5919  ;;  %v1899_v16 = vadd.f32 1.0, %v5918_v11 }
0x1020   :  { %v5922_v17 = vpop.eup %5921  ;;  %v1900_v18 = vadd.f32 1.0, %v5920_v12 }
0x1021   :  { %5929 = vrcp.f32 %v1899_v16  ;;  %v1792_v19 = vadd.f32 1.0, %v5922_v17  ;;  %v5924_v20 = vpop.eup %5923 }
0x1022   :  { %5931 = vrcp.f32 %v1900_v18  ;;  %v5926_v25 = vpop.eup %5925  ;;  %v1915_v14 = vrot.slane %v5924_v20, 4 }
0x1023   :  { %5933 = vrcp.f32 %v1792_v19  ;;  %v5928_v26 = vpop.eup %5927  ;;  %v1916_v28 = vrot.slane %v5926_v25, 3 }
0x1025   :  { %v1917_v48 = vsel %vm998_vm5, %v1916_v28, %v1915_v14 }
0x102e   :  { %v5930_v27 = vpop.eup %5929 }
0x102f   :  { %v5932_v30 = vpop.eup %5931  ;;  %v1909_v31 = vrot.slane %v5930_v27, 4 }
0x1030   :  { %v5934_v41 = vpop.eup %5933  ;;  %v1910_v43 = vrot.slane %v5932_v30, 3 }
0x1031   :  { %v1796_v44 = vsel %vm6702_vm6, %v5934_v41, %v5928_v26 }
0x1032   :  { %1799 = vrot.lane.b32.xlu1 %v1796_v44, %s6245_s30  ;;  %v1911_v45 = vsel %vm998_vm5, %v1910_v43, %v1909_v31  ;;  %v1797_v54 = vmul.f32 %v1796_v44, %v6934_v53 }
0x1033   :  { %v1919_v33 = vsel %vm6702_vm6, %v1911_v45, %v1917_v48 }
0x1034   :  { %1922 = vrot.lane.b32.xlu0 %v1919_v33, %s6245_s30  ;;  %v1920_v13 = vmul.f32 %v1919_v33, %v6938_v55 }
0x10a4   :  { %v1800_v50 = vpop.permute.xlu1 %1799 }
0x10a5   :  { %v1802_v51 = vmul.f32 %v1800_v50, %v1796_v44 }
0x10a6   :  { %v1923_v52 = vpop.permute.xlu0 %1922 }
0x10a7   :  { %1804 = vrot.lane.b32.xlu1 %v1802_v51, %s6243_s27  ;;  %v1925_v29 = vmul.f32 %v1923_v52, %v1919_v33 }
0x10a9   :  { %1927 = vrot.lane.b32.xlu0 %v1925_v29, %s6243_s27 }
0x1119   :  { %v1805_v32 = vpop.permute.xlu1 %1804 }
0x111a   :  { %v6990_v56 = vadd.f32 %v1805_v32, %v1797_v54 }
0x111b   :  { %v1928_v57 = vpop.permute.xlu0 %1927 }
0x111c   :  { %5935 = vtanh.f32 %v6990_v56  ;;  %v6994_v46 = vadd.f32 %v1928_v57, %v1920_v13 }
0x111e   :  { %5937 = vtanh.f32 %v6994_v46 }
0x1129   :  { %v5936_v58 = vpop.eup %5935 }
0x112a   :  { %1810 = vrot.lane.b32.xlu1 %v5936_v58, %s6245_s30 }
0x112b   :  { %v5938_v59 = vpop.eup %5937 }
0x112c   :  { %1933 = vrot.lane.b32.xlu0 %v5938_v59, %s6245_s30 }
0x119c   :  { %v1811_v49 = vpop.permute.xlu1 %1810 }
0x119d   :  { %v1813_v53 = vmul.f32 %v1811_v49, %v1796_v44 }
0x119e   :  { %v1934_v22 = vpop.permute.xlu0 %1933 }
0x119f   :  { %1942 = vrot.lane.b32.xlu1 %v1813_v53, %s6245_s30  ;;  %v1936_v5 = vmul.f32 %v1934_v22, %v1919_v33 }
0x11a1   :  { %1938 = vrot.lane.b32.xlu0 %v1936_v5, %s6243_s27 }
0x1211   :  { %v1943_v55 = vpop.permute.xlu1 %1942 }
0x1213   :  { %v1939_v35 = vpop.permute.xlu0 %1938 }
0x1214   :  { %v1945_v37 = vsel %vm361_vm10, %v1939_v35, %v1943_v55  ;;  %5351 = vmatmul.mubr.msk.f32.vlgmr.msra.gmra.mxu0 %vm361_vm10, %v1939_v35  ;;  %v7083_v35 = vld [vmem:[%s7796_s13 + $0x38] sm:$0xff] }
0x1215   :  { %5340 = vmatmul.mubr.msk.f32.vlgmr.msra.gmra.mxu1 %vm643_vm14, %v1945_v37  ;;  %5354 = vmatpush3.msra.mxu0 %v6718_v24  ;;  %v7027_v24 = vld [vmem:[%s7795_s12 + $0x8] sm:$0xff]  ;;  %v7091_v37 = vld [vmem:[%s7796_s13 + $0x30] sm:$0xff] }
0x1216   :  { %5355 = vmatprep.subr.mxu0 %v6248_v36  ;;  %5373 = vmatpush3.msra.mxu1 %v7009_v15 }
0x1217   :  { %5356 = vmatpush3.msra.mxu0 %v6723_v34  ;;  %5374 = vmatprep.subr.mxu1 %v6248_v36  ;;  %v7036_v34 = vld [vmem:[%s7795_s12] sm:$0xff] }
0x1218   :  { %5357 = vmatprep.subr.mxu0 %v6248_v36  ;;  %5375 = vmatpush3.msra.mxu1 %v7018_v6 }
0x1219   :  { %5358 = vmatpush3.msra.mxu0 %v6730_v38  ;;  %5376 = vmatprep.subr.mxu1 %v6248_v36 }
0x121a   :  { %5359 = vmatprep.subr.mxu0 %v6248_v36  ;;  %5377 = vmatpush3.msra.mxu1 %v7027_v24 }
0x121b   :  { %5360 = vmatpush3.msra.mxu0 %v6737_v39  ;;  %5378 = vmatprep.subr.mxu1 %v6248_v36 }
0x121c   :  { %5361 = vmatprep.subr.mxu0 %v6248_v36  ;;  %5379 = vmatpush3.msra.mxu1 %v7036_v34 }
0x121d   :  { %5362 = vmatpush3.msra.mxu0 %v6744_v40  ;;  %5380 = vmatprep.mubr.msk.f32.mxu1 %vm6249_vm2, %v6248_v36 }
0x121e   :  { %5363 = vmatprep.subr.mxu0 %v6248_v36  ;;  %5369 = vmatprep.mubr.msk.f32.mxu0 %vm6249_vm2, %v6248_v36 }
0x121f   :  { %5364 = vmatpush3.msra.mxu0 %v6751_v23  ;;  %5383 = vmatprep.subr.mxu1 %v6248_v36 }
0x1220   :  { %5365 = vmatprep.subr.mxu0 %v6248_v36 }
0x1221   :  { %5366 = vmatpush3.msra.mxu0 %v6758_v10 }
0x1222   :  { %5367 = vmatprep.subr.mxu0 %v6248_v36 }
0x1223   :  { %5368 = vmatpush3.msra.mxu0 %v6768_v42 }
0x1224   :  { %5402 = vmatprep.subr.mxu0 %v6248_v36 }
0x12d4   :  { %v2112_v38 = vpop.f32.mrf.mxu0 }
0x12d5   :  { %v2117_v39 = vrot.slane %v2112_v38, 3  ;;  %v2118_v40 = vrot.slane %v2112_v38, 4  ;;  %v2015_v63 = vpop.f32.mrf.mxu1  ;;  %v7100_v38 = vld [vmem:[%s7796_s13 + $0x28] sm:$0xff] }
0x12d6   :  { %v2016_v0 = vadd.f32 %v6807_v47, %v2015_v63  ;;  %v5352_v2 = vpop.f32.mrf.mxu0  ;;  %v7129_v63 = vld [vmem:[%s7796_s13 + $0x10] sm:$0xff] }
0x12d7   :  { %v2121_v23 = vadd.f32 %v2117_v39, %v6694_v60  ;;  %v2122_v3 = vadd.f32 %v2118_v40, %v6698_v62  ;;  %v5341_v4 = vpop.f32.mrf.mxu1  ;;  %v7109_v39 = vld [vmem:[%s7796_s13 + $0x20] sm:$0xff]  ;;  %v7118_v40 = vld [vmem:[%s7796_s13 + $0x18] sm:$0xff] }
0x12d8   :  { %v4835_v8 = vmul.f32 -1.442695, %v2016_v0  ;;  %v7144_v2 = vld [vmem:[%s7796_s13] sm:$0xff] }
0x12d9   :  { %v4837_v7 = vmul.f32 -1.442695, %v2121_v23  ;;  %v4838_v10 = vmul.f32 -1.442695, %v2122_v3 }
0x12db   :  { %5939 = vpow2.f32 %v4837_v7 }
0x12dc   :  { %5941 = vpow2.f32 %v4838_v10 }
0x12dd   :  { %5943 = vpow2.f32 %v4835_v8 }
0x12de   :  { %5945 = vtanh.f32 %v2121_v23 }
0x12df   :  { %5947 = vtanh.f32 %v2122_v3 }
0x12e0   :  { %5949 = vtanh.f32 %v2016_v0  ;;  %v7137_v0 = vld [vmem:[%s7796_s13 + $0x8] sm:$0xff] }
0x12e8   :  { %v5940_v42 = vpop.eup %5939 }
0x12e9   :  { %v5942_v9 = vpop.eup %5941  ;;  %v2129_v11 = vadd.f32 1.0, %v5940_v42 }
0x12ea   :  { %v5944_v12 = vpop.eup %5943  ;;  %v2130_v16 = vadd.f32 1.0, %v5942_v9 }
0x12eb   :  { %5951 = vrcp.f32 %v2129_v11  ;;  %v2022_v17 = vadd.f32 1.0, %v5944_v12  ;;  %v5946_v18 = vpop.eup %5945 }
0x12ec   :  { %5953 = vrcp.f32 %v2130_v16  ;;  %v5948_v19 = vpop.eup %5947  ;;  %v2145_v26 = vrot.slane %v5946_v18, 5 }
0x12ed   :  { %5955 = vrcp.f32 %v2022_v17  ;;  %v5950_v20 = vpop.eup %5949  ;;  %v2146_v27 = vrot.slane %v5948_v19, 4 }
0x12ef   :  { %v2147_v44 = vsel %vm998_vm5, %v2146_v27, %v2145_v26 }
0x12f8   :  { %v5952_v25 = vpop.eup %5951 }
0x12f9   :  { %v5954_v14 = vpop.eup %5953  ;;  %v2139_v28 = vrot.slane %v5952_v25, 5 }
0x12fa   :  { %v5956_v30 = vpop.eup %5955  ;;  %v2140_v31 = vrot.slane %v5954_v14, 4 }
0x12fb   :  { %v2026_v41 = vsel %vm6702_vm6, %v5956_v30, %v5950_v20 }
0x12fc   :  { %2029 = vrot.lane.b32.xlu1 %v2026_v41, %s6245_s30  ;;  %v2141_v43 = vsel %vm998_vm5, %v2140_v31, %v2139_v28  ;;  %v2027_v52 = vmul.f32 %v2026_v41, %v6990_v56 }
0x12fd   :  { %v2149_v45 = vsel %vm6702_vm6, %v2141_v43, %v2147_v44 }
0x12fe   :  { %2152 = vrot.lane.b32.xlu0 %v2149_v45, %s6245_s30  ;;  %v2150_v32 = vmul.f32 %v2149_v45, %v6994_v46 }
0x136e   :  { %v2030_v48 = vpop.permute.xlu1 %2029 }
0x136f   :  { %v2032_v33 = vmul.f32 %v2030_v48, %v2026_v41 }
0x1370   :  { %v2153_v50 = vpop.permute.xlu0 %2152 }
0x1371   :  { %2034 = vrot.lane.b32.xlu1 %v2032_v33, %s6243_s27  ;;  %v2155_v51 = vmul.f32 %v2153_v50, %v2149_v45 }
0x1373   :  { %2157 = vrot.lane.b32.xlu0 %v2155_v51, %s6243_s27 }
0x13e3   :  { %v2035_v29 = vpop.permute.xlu1 %2034 }
0x13e4   :  { %v7066_v54 = vadd.f32 %v2035_v29, %v2027_v52 }
0x13e5   :  { %v2158_v13 = vpop.permute.xlu0 %2157 }
0x13e6   :  { %5957 = vtanh.f32 %v7066_v54  ;;  %v7070_v57 = vadd.f32 %v2158_v13, %v2150_v32 }
0x13e8   :  { %5959 = vtanh.f32 %v7070_v57 }
0x13f3   :  { %v5958_v58 = vpop.eup %5957 }
0x13f4   :  { %2040 = vrot.lane.b32.xlu1 %v5958_v58, %s6245_s30 }
0x13f5   :  { %v5960_v59 = vpop.eup %5959 }
0x13f6   :  { %2163 = vrot.lane.b32.xlu0 %v5960_v59, %s6245_s30 }
0x1466   :  { %v2041_v49 = vpop.permute.xlu1 %2040 }
0x1467   :  { %v2043_v56 = vmul.f32 %v2041_v49, %v2026_v41 }
0x1468   :  { %v2164_v53 = vpop.permute.xlu0 %2163 }
0x1469   :  { %2172 = vrot.lane.b32.xlu1 %v2043_v56, %s6245_s30  ;;  %v2166_v22 = vmul.f32 %v2164_v53, %v2149_v45 }
0x146b   :  { %2168 = vrot.lane.b32.xlu0 %v2166_v22, %s6243_s27 }
0x14db   :  { %v2173_v46 = vpop.permute.xlu1 %2172 }
0x14dd   :  { %v2169_v5 = vpop.permute.xlu0 %2168 }
0x14de   :  { %v2175_v55 = vsel %vm361_vm10, %v2169_v5, %v2173_v46  ;;  %5381 = vmatmul.mubr.msk.f32.vlgmr.msra.gmra.mxu1 %vm361_vm10, %v2169_v5 }
0x14df   :  { %5370 = vmatmul.mubr.msk.f32.vlgmr.msra.gmra.mxu0 %vm643_vm14, %v2175_v55  ;;  %5384 = vmatpush3.msra.mxu1 %v7083_v35 }
0x14e0   :  { %5385 = vmatprep.subr.mxu1 %v6248_v36  ;;  %5403 = vmatpush3.msra.mxu0 %v7009_v15 }
0x14e1   :  { %5386 = vmatpush3.msra.mxu1 %v7091_v37  ;;  %5404 = vmatprep.subr.mxu0 %v6248_v36 }
0x14e2   :  { %5387 = vmatprep.subr.mxu1 %v6248_v36  ;;  %5405 = vmatpush3.msra.mxu0 %v7018_v6 }
0x14e3   :  { %5388 = vmatpush3.msra.mxu1 %v7100_v38  ;;  %5406 = vmatprep.subr.mxu0 %v6248_v36 }
0x14e4   :  { %5389 = vmatprep.subr.mxu1 %v6248_v36  ;;  %5407 = vmatpush3.msra.mxu0 %v7027_v24 }
0x14e5   :  { %5390 = vmatpush3.msra.mxu1 %v7109_v39  ;;  %5408 = vmatprep.subr.mxu0 %v6248_v36 }
0x14e6   :  { %5391 = vmatprep.subr.mxu1 %v6248_v36  ;;  %5409 = vmatpush3.msra.mxu0 %v7036_v34 }
0x14e7   :  { %5392 = vmatpush3.msra.mxu1 %v7118_v40  ;;  %5410 = vmatprep.mubr.msk.f32.mxu0 %vm6249_vm2, %v6248_v36 }
0x14e8   :  { %5393 = vmatprep.subr.mxu1 %v6248_v36  ;;  %5399 = vmatprep.mubr.msk.f32.mxu1 %vm6249_vm2, %v6248_v36 }
0x14e9   :  { %5394 = vmatpush3.msra.mxu1 %v7129_v63  ;;  %5413 = vmatprep.subr.mxu0 %v6248_v36 }
0x14ea   :  { %5395 = vmatprep.subr.mxu1 %v6248_v36 }
0x14eb   :  { %5396 = vmatpush3.msra.mxu1 %v7137_v0 }
0x14ec   :  { %5397 = vmatprep.subr.mxu1 %v6248_v36 }
0x14ed   :  { %5398 = vmatpush3.msra.mxu1 %v7144_v2 }
0x14ee   :  { %5432 = vmatprep.subr.mxu1 %v6248_v36 }
0x159e   :  { %v2342_v23 = vpop.f32.mrf.mxu1 }
0x159f   :  { %v2347_v3 = vrot.slane %v2342_v23, 2  ;;  %v2348_v4 = vrot.slane %v2342_v23, 3  ;;  %v2245_v7 = vpop.f32.mrf.mxu0 }
0x15a0   :  { %v2246_v10 = vadd.f32 %v6807_v47, %v2245_v7  ;;  %v5382_v8 = vpop.f32.mrf.mxu1 }
0x15a1   :  { %v2351_v42 = vadd.f32 %v2347_v3, %v6694_v60  ;;  %v2352_v9 = vadd.f32 %v2348_v4, %v6698_v62  ;;  %v5371_v11 = vpop.f32.mrf.mxu0 }
0x15a2   :  { %v4840_v17 = vmul.f32 -1.442695, %v2246_v10 }
0x15a3   :  { %v4842_v12 = vmul.f32 -1.442695, %v2351_v42  ;;  %v4843_v16 = vmul.f32 -1.442695, %v2352_v9 }
0x15a5   :  { %5961 = vpow2.f32 %v4842_v12  ;;  %v7207_v12 = vld [vmem:[%s7797_s14] ss:$0 sm:$0xff] }
0x15a6   :  { %5963 = vpow2.f32 %v4843_v16 }
0x15a7   :  { %5965 = vpow2.f32 %v4840_v17 }
0x15a8   :  { %5967 = vtanh.f32 %v2351_v42 }
0x15a9   :  { %5969 = vtanh.f32 %v2352_v9 }
0x15aa   :  { %5971 = vtanh.f32 %v2246_v10 }
0x15b2   :  { %v5962_v18 = vpop.eup %5961 }
0x15b3   :  { %v5964_v19 = vpop.eup %5963  ;;  %v2359_v20 = vadd.f32 1.0, %v5962_v18 }
0x15b4   :  { %v5966_v25 = vpop.eup %5965  ;;  %v2360_v26 = vadd.f32 1.0, %v5964_v19 }
0x15b5   :  { %5973 = vrcp.f32 %v2359_v20  ;;  %v2252_v47 = vadd.f32 1.0, %v5966_v25  ;;  %v5968_v27 = vpop.eup %5967 }
0x15b6   :  { %5975 = vrcp.f32 %v2360_v26  ;;  %v5970_v14 = vpop.eup %5969  ;;  %v2375_v31 = vrot.slane %v5968_v27, 6 }
0x15b7   :  { %5977 = vrcp.f32 %v2252_v47  ;;  %v5972_v28 = vpop.eup %5971  ;;  %v2376_v41 = vrot.slane %v5970_v14, 5 }
0x15b9   :  { %v2377_v51 = vsel %vm998_vm5, %v2376_v41, %v2375_v31 }
0x15c2   :  { %v5974_v30 = vpop.eup %5973 }
0x15c3   :  { %v5976_v43 = vpop.eup %5975  ;;  %v2369_v44 = vrot.slane %v5974_v30, 6 }
0x15c4   :  { %v5978_v45 = vpop.eup %5977  ;;  %v2370_v48 = vrot.slane %v5976_v43, 5 }
0x15c5   :  { %v2256_v33 = vsel %vm6702_vm6, %v5978_v45, %v5972_v28 }
0x15c6   :  { %2259 = vrot.lane.b32.xlu1 %v2256_v33, %s6245_s30  ;;  %v2371_v50 = vsel %vm998_vm5, %v2370_v48, %v2369_v44  ;;  %v2257_v59 = vmul.f32 %v2256_v33, %v7066_v54 }
0x15c7   :  { %v2379_v52 = vsel %vm6702_vm6, %v2371_v50, %v2377_v51 }
0x15c8   :  { %2382 = vrot.lane.b32.xlu0 %v2379_v52, %s6245_s30  ;;  %v2380_v53 = vmul.f32 %v2379_v52, %v7070_v57 }
0x1638   :  { %v2260_v29 = vpop.permute.xlu1 %2259 }
0x1639   :  { %v2262_v32 = vmul.f32 %v2260_v29, %v2256_v33 }
0x163a   :  { %v2383_v13 = vpop.permute.xlu0 %2382 }
0x163b   :  { %2264 = vrot.lane.b32.xlu1 %v2262_v32, %s6243_s27  ;;  %v2385_v58 = vmul.f32 %v2383_v13, %v2379_v52 }
0x163d   :  { %2387 = vrot.lane.b32.xlu0 %v2385_v58, %s6243_s27 }
0x16ad   :  { %v2265_v49 = vpop.permute.xlu1 %2264 }
0x16ae   :  { %v7162_v56 = vadd.f32 %v2265_v49, %v2257_v59 }
0x16af   :  { %v2388_v22 = vpop.permute.xlu0 %2387 }
0x16b0   :  { %5979 = vtanh.f32 %v7162_v56  ;;  %v7166_v46 = vadd.f32 %v2388_v22, %v2380_v53 }
0x16b2   :  { %5981 = vtanh.f32 %v7166_v46 }
0x16bd   :  { %v5980_v5 = vpop.eup %5979 }
0x16be   :  { %2270 = vrot.lane.b32.xlu1 %v5980_v5, %s6245_s30 }
0x16bf   :  { %v5982_v55 = vpop.eup %5981 }
0x16c0   :  { %2393 = vrot.lane.b32.xlu0 %v5982_v55, %s6245_s30 }
0x1730   :  { %v2271_v23 = vpop.permute.xlu1 %2270 }
0x1731   :  { %v2273_v54 = vmul.f32 %v2271_v23, %v2256_v33 }
0x1732   :  { %v2394_v3 = vpop.permute.xlu0 %2393 }
0x1733   :  { %2402 = vrot.lane.b32.xlu1 %v2273_v54, %s6245_s30  ;;  %v2396_v4 = vmul.f32 %v2394_v3, %v2379_v52 }
0x1735   :  { %2398 = vrot.lane.b32.xlu0 %v2396_v4, %s6243_s27 }
0x17a5   :  { %v2403_v57 = vpop.permute.xlu1 %2402 }
0x17a7   :  { %v2399_v7 = vpop.permute.xlu0 %2398 }
0x17a8   :  { %v2405_v10 = vsel %vm361_vm10, %v2399_v7, %v2403_v57  ;;  %5411 = vmatmul.mubr.msk.f32.vlgmr.msra.gmra.mxu0 %vm361_vm10, %v2399_v7 }
0x17a9   :  { %5400 = vmatmul.mubr.msk.f32.vlgmr.msra.gmra.mxu1 %vm643_vm14, %v2405_v10  ;;  %5414 = vmatpush3.msra.mxu0 %v7083_v35 }
0x17aa   :  { %5415 = vmatprep.subr.mxu0 %v6248_v36  ;;  %5433 = vmatpush3.msra.mxu1 %v7009_v15 }
0x17ab   :  { %5416 = vmatpush3.msra.mxu0 %v7091_v37  ;;  %5434 = vmatprep.subr.mxu1 %v6248_v36 }
0x17ac   :  { %5417 = vmatprep.subr.mxu0 %v6248_v36  ;;  %5435 = vmatpush3.msra.mxu1 %v7018_v6 }
0x17ad   :  { %5418 = vmatpush3.msra.mxu0 %v7100_v38  ;;  %5436 = vmatprep.subr.mxu1 %v6248_v36 }
0x17ae   :  { %5419 = vmatprep.subr.mxu0 %v6248_v36  ;;  %5437 = vmatpush3.msra.mxu1 %v7027_v24 }
0x17af   :  { %5420 = vmatpush3.msra.mxu0 %v7109_v39  ;;  %5438 = vmatprep.subr.mxu1 %v6248_v36 }
0x17b0   :  { %5421 = vmatprep.subr.mxu0 %v6248_v36  ;;  %5439 = vmatpush3.msra.mxu1 %v7036_v34 }
0x17b1   :  { %5422 = vmatpush3.msra.mxu0 %v7118_v40  ;;  %5440 = vmatprep.mubr.msk.f32.mxu1 %vm6249_vm2, %v6248_v36 }
0x17b2   :  { %5423 = vmatprep.subr.mxu0 %v6248_v36  ;;  %5429 = vmatprep.mubr.msk.f32.mxu0 %vm6249_vm2, %v6248_v36 }
0x17b3   :  { %5424 = vmatpush3.msra.mxu0 %v7129_v63  ;;  %5443 = vmatprep.subr.mxu1 %v6248_v36 }
0x17b4   :  { %5425 = vmatprep.subr.mxu0 %v6248_v36 }
0x17b5   :  { %5426 = vmatpush3.msra.mxu0 %v7137_v0 }
0x17b6   :  { %5427 = vmatprep.subr.mxu0 %v6248_v36 }
0x17b7   :  { %5428 = vmatpush3.msra.mxu0 %v7144_v2 }
0x17b8   :  { %5462 = vmatprep.subr.mxu0 %v6248_v36 }
0x1868   :  { %v2572_v8 = vpop.f32.mrf.mxu0 }
0x1869   :  { %v2577_v42 = vrot.slane %v2572_v8, 1  ;;  %v2578_v9 = vrot.slane %v2572_v8, 2  ;;  %v2475_v11 = vpop.f32.mrf.mxu1 }
0x186a   :  { %v2476_v16 = vadd.f32 %v7207_v12, %v2475_v11  ;;  %v5412_v17 = vpop.f32.mrf.mxu0 }
0x186b   :  { %v2581_v18 = vadd.f32 %v2577_v42, %v6694_v60  ;;  %v2582_v19 = vadd.f32 %v2578_v9, %v6698_v62  ;;  %v5401_v20 = vpop.f32.mrf.mxu1 }
0x186c   :  { %v4845_v47 = vmul.f32 -1.442695, %v2476_v16 }
0x186d   :  { %v4847_v25 = vmul.f32 -1.442695, %v2581_v18  ;;  %v4848_v26 = vmul.f32 -1.442695, %v2582_v19 }
0x186f   :  { %5983 = vpow2.f32 %v4847_v25 }
0x1870   :  { %5985 = vpow2.f32 %v4848_v26 }
0x1871   :  { %5987 = vpow2.f32 %v4845_v47 }
0x1872   :  { %5989 = vtanh.f32 %v2581_v18 }
0x1873   :  { %5991 = vtanh.f32 %v2582_v19 }
0x1874   :  { %5993 = vtanh.f32 %v2476_v16 }
0x187c   :  { %v5984_v27 = vpop.eup %5983 }
0x187d   :  { %v5986_v14 = vpop.eup %5985  ;;  %v2589_v28 = vadd.f32 1.0, %v5984_v27 }
0x187e   :  { %v5988_v30 = vpop.eup %5987  ;;  %v2590_v31 = vadd.f32 1.0, %v5986_v14 }
0x187f   :  { %5995 = vrcp.f32 %v2589_v28  ;;  %v2482_v41 = vadd.f32 1.0, %v5988_v30  ;;  %v5990_v60 = vpop.eup %5989 }
0x1880   :  { %5997 = vrcp.f32 %v2590_v31  ;;  %v5992_v62 = vpop.eup %5991  ;;  %v2605_v45 = vrot.slane %v5990_v60, 7 }
0x1881   :  { %5999 = vrcp.f32 %v2482_v41  ;;  %v5994_v43 = vpop.eup %5993  ;;  %v2606_v48 = vrot.slane %v5992_v62, 6 }
0x1883   :  { %v2607_v13 = vsel %vm998_vm5, %v2606_v48, %v2605_v45 }
0x188c   :  { %v5996_v44 = vpop.eup %5995 }
0x188d   :  { %v5998_v33 = vpop.eup %5997  ;;  %v2599_v50 = vrot.slane %v5996_v44, 7 }
0x188e   :  { %v6000_v51 = vpop.eup %5999  ;;  %v2600_v52 = vrot.slane %v5998_v33, 6 }
0x188f   :  { %v2486_v29 = vsel %vm6702_vm6, %v6000_v51, %v5994_v43 }
0x1890   :  { %2489 = vrot.lane.b32.xlu1 %v2486_v29, %s6245_s30  ;;  %v2601_v32 = vsel %vm998_vm5, %v2600_v52, %v2599_v50  ;;  %v2487_v5 = vmul.f32 %v2486_v29, %v7162_v56 }
0x1891   :  { %v2609_v58 = vsel %vm6702_vm6, %v2601_v32, %v2607_v13 }
0x1892   :  { %2612 = vrot.lane.b32.xlu0 %v2609_v58, %s6245_s30  ;;  %v2610_v54 = vmul.f32 %v2609_v58, %v7166_v46 }
0x1902   :  { %v2490_v59 = vpop.permute.xlu1 %2489 }
0x1903   :  { %v2492_v49 = vmul.f32 %v2490_v59, %v2486_v29 }
0x1904   :  { %v2613_v53 = vpop.permute.xlu0 %2612 }
0x1905   :  { %2494 = vrot.lane.b32.xlu1 %v2492_v49, %s6243_s27  ;;  %v2615_v22 = vmul.f32 %v2613_v53, %v2609_v58 }
0x1907   :  { %2617 = vrot.lane.b32.xlu0 %v2615_v22, %s6243_s27 }
0x1977   :  { %v2495_v55 = vpop.permute.xlu1 %2494 }
0x1978   :  { %v7223_v23 = vadd.f32 %v2495_v55, %v2487_v5 }
0x1979   :  { %v2618_v3 = vpop.permute.xlu0 %2617 }
0x197a   :  { %6001 = vtanh.f32 %v7223_v23  ;;  %v7227_v4 = vadd.f32 %v2618_v3, %v2610_v54 }
0x197c   :  { %6003 = vtanh.f32 %v7227_v4 }
0x1987   :  { %v6002_v57 = vpop.eup %6001 }
0x1988   :  { %2500 = vrot.lane.b32.xlu1 %v6002_v57, %s6245_s30 }
0x1989   :  { %v6004_v7 = vpop.eup %6003 }
0x198a   :  { %2623 = vrot.lane.b32.xlu0 %v6004_v7, %s6245_s30 }
0x19fa   :  { %v2501_v10 = vpop.permute.xlu1 %2500 }
0x19fb   :  { %v2503_v56 = vmul.f32 %v2501_v10, %v2486_v29 }
0x19fc   :  { %v2624_v8 = vpop.permute.xlu0 %2623 }
0x19fd   :  { %2632 = vrot.lane.b32.xlu1 %v2503_v56, %s6245_s30  ;;  %v2626_v42 = vmul.f32 %v2624_v8, %v2609_v58 }
0x19ff   :  { %2628 = vrot.lane.b32.xlu0 %v2626_v42, %s6243_s27 }
0x1a6f   :  { %v2633_v46 = vpop.permute.xlu1 %2632 }
0x1a71   :  { %v2629_v9 = vpop.permute.xlu0 %2628 }
0x1a72   :  { %v2635_v11 = vsel %vm361_vm10, %v2629_v9, %v2633_v46  ;;  %5441 = vmatmul.mubr.msk.f32.vlgmr.msra.gmra.mxu1 %vm361_vm10, %v2629_v9 }
0x1a73   :  { %5430 = vmatmul.mubr.msk.f32.vlgmr.msra.gmra.mxu0 %vm643_vm14, %v2635_v11  ;;  %5444 = vmatpush3.msra.mxu1 %v7083_v35 }
0x1a74   :  { %5445 = vmatprep.subr.mxu1 %v6248_v36  ;;  %5463 = vmatpush3.msra.mxu0 %v7009_v15 }
0x1a75   :  { %5446 = vmatpush3.msra.mxu1 %v7091_v37  ;;  %5464 = vmatprep.subr.mxu0 %v6248_v36 }
0x1a76   :  { %5447 = vmatprep.subr.mxu1 %v6248_v36  ;;  %5465 = vmatpush3.msra.mxu0 %v7018_v6 }
0x1a77   :  { %5448 = vmatpush3.msra.mxu1 %v7100_v38  ;;  %5466 = vmatprep.subr.mxu0 %v6248_v36 }
0x1a78   :  { %5449 = vmatprep.subr.mxu1 %v6248_v36  ;;  %5467 = vmatpush3.msra.mxu0 %v7027_v24 }
0x1a79   :  { %5450 = vmatpush3.msra.mxu1 %v7109_v39  ;;  %5468 = vmatprep.subr.mxu0 %v6248_v36 }
0x1a7a   :  { %5451 = vmatprep.subr.mxu1 %v6248_v36  ;;  %5469 = vmatpush3.msra.mxu0 %v7036_v34 }
0x1a7b   :  { %5452 = vmatpush3.msra.mxu1 %v7118_v40  ;;  %5470 = vmatprep.mubr.msk.f32.mxu0 %vm6249_vm2, %v6248_v36 }
0x1a7c   :  { %5453 = vmatprep.subr.mxu1 %v6248_v36  ;;  %5459 = vmatprep.mubr.msk.f32.mxu1 %vm6249_vm2, %v6248_v36 }
0x1a7d   :  { %5454 = vmatpush3.msra.mxu1 %v7129_v63  ;;  %5473 = vmatprep.subr.mxu0 %v6248_v36 }
0x1a7e   :  { %5455 = vmatprep.subr.mxu1 %v6248_v36 }
0x1a7f   :  { %5456 = vmatpush3.msra.mxu1 %v7137_v0 }
0x1a80   :  { %5457 = vmatprep.subr.mxu1 %v6248_v36 }
0x1a81   :  { %5458 = vmatpush3.msra.mxu1 %v7144_v2 }
0x1a82   :  { %5492 = vmatprep.subr.mxu1 %v6248_v36 }
0x1b32   :  { %v2802_v16 = vpop.f32.mrf.mxu1 }
0x1b33   :  { %v2807_v17 = vrot.slane %v2802_v16, 1  ;;  %v2810_v18 = vadd.f32 %v2802_v16, %v6696_v61  ;;  %v2705_v19 = vpop.f32.mrf.mxu0 }
0x1b34   :  { %v2706_v20 = vadd.f32 %v7207_v12, %v2705_v19  ;;  %v5442_v25 = vpop.f32.mrf.mxu1 }
0x1b35   :  { %v2811_v26 = vadd.f32 %v2807_v17, %v6692_v1  ;;  %v4852_v47 = vmul.f32 -1.442695, %v2810_v18  ;;  %v5431_v27 = vpop.f32.mrf.mxu0 }
0x1b36   :  { %v4850_v14 = vmul.f32 -1.442695, %v2706_v20 }
0x1b37   :  { %6005 = vpow2.f32 %v4852_v47  ;;  %v4853_v28 = vmul.f32 -1.442695, %v2811_v26 }
0x1b39   :  { %6007 = vpow2.f32 %v4853_v28 }
0x1b3a   :  { %6009 = vpow2.f32 %v4850_v14 }
0x1b3b   :  { %6011 = vtanh.f32 %v2811_v26 }
0x1b3c   :  { %6013 = vtanh.f32 %v2810_v18 }
0x1b3d   :  { %6015 = vtanh.f32 %v2706_v20 }
0x1b44   :  { %v6006_v30 = vpop.eup %6005 }
0x1b45   :  { %v2818_v60 = vadd.f32 1.0, %v6006_v30 }
0x1b46   :  { %v6008_v31 = vpop.eup %6007 }
0x1b47   :  { %v6010_v41 = vpop.eup %6009  ;;  %v2819_v62 = vadd.f32 1.0, %v6008_v31 }
0x1b48   :  { %v2712_v43 = vadd.f32 1.0, %v6010_v41  ;;  %v6012_v44 = vpop.eup %6011 }
0x1b49   :  { %6017 = vrcp.f32 %v2819_v62  ;;  %v6014_v45 = vpop.eup %6013  ;;  %v2833_v33 = vrot.slane %v6012_v44, 7 }
0x1b4a   :  { %6019 = vrcp.f32 %v2712_v43  ;;  %v6016_v48 = vpop.eup %6015 }
0x1b4b   :  { %6021 = vrcp.f32 %v2818_v60  ;;  %v2834_v58 = vsel %vm998_vm5, %v2833_v33, %v6014_v45 }
0x1b56   :  { %v6018_v50 = vpop.eup %6017 }
0x1b57   :  { %v6020_v51 = vpop.eup %6019  ;;  %v2828_v52 = vrot.slane %v6018_v50, 7 }
0x1b58   :  { %v6022_v29 = vpop.eup %6021  ;;  %v2716_v32 = vsel %vm6702_vm6, %v6020_v51, %v6016_v48 }
0x1b59   :  { %2719 = vrot.lane.b32.xlu1 %v2716_v32, %s6245_s30  ;;  %v2829_v13 = vsel %vm998_vm5, %v2828_v52, %v6022_v29  ;;  %v2717_v55 = vmul.f32 %v2716_v32, %v7223_v23 }
0x1b5a   :  { %v2836_v59 = vsel %vm6702_vm6, %v2829_v13, %v2834_v58 }
0x1b5b   :  { %2839 = vrot.lane.b32.xlu0 %v2836_v59, %s6245_s30  ;;  %v2837_v57 = vmul.f32 %v2836_v59, %v7227_v4 }
0x1bcb   :  { %v2720_v49 = vpop.permute.xlu1 %2719 }
0x1bcc   :  { %v2722_v53 = vmul.f32 %v2720_v49, %v2716_v32 }
0x1bcd   :  { %v2840_v22 = vpop.permute.xlu0 %2839 }
0x1bce   :  { %2724 = vrot.lane.b32.xlu1 %v2722_v53, %s6243_s27  ;;  %v2842_v5 = vmul.f32 %v2840_v22, %v2836_v59 }
0x1bd0   :  { %2844 = vrot.lane.b32.xlu0 %v2842_v5, %s6243_s27 }
0x1c40   :  { %v2725_v54 = vpop.permute.xlu1 %2724 }
0x1c41   :  { %v7279_v3 = vadd.f32 %v2725_v54, %v2717_v55 }
0x1c42   :  { %v2845_v7 = vpop.permute.xlu0 %2844 }
0x1c43   :  { %6023 = vtanh.f32 %v7279_v3  ;;  %v7283_v10 = vadd.f32 %v2845_v7, %v2837_v57 }
0x1c45   :  { %6025 = vtanh.f32 %v7283_v10 }
0x1c50   :  { %v6024_v56 = vpop.eup %6023 }
0x1c51   :  { %2730 = vrot.lane.b32.xlu1 %v6024_v56, %s6245_s30 }
0x1c52   :  { %v6026_v8 = vpop.eup %6025 }
0x1c53   :  { %2850 = vrot.lane.b32.xlu0 %v6026_v8, %s6245_s30 }
0x1cc3   :  { %v2731_v42 = vpop.permute.xlu1 %2730 }
0x1cc4   :  { %v2733_v23 = vmul.f32 %v2731_v42, %v2716_v32 }
0x1cc5   :  { %v2851_v46 = vpop.permute.xlu0 %2850 }
0x1cc6   :  { %2859 = vrot.lane.b32.xlu1 %v2733_v23, %s6245_s30  ;;  %v2853_v9 = vmul.f32 %v2851_v46, %v2836_v59 }
0x1cc8   :  { %2855 = vrot.lane.b32.xlu0 %v2853_v9, %s6243_s27 }
0x1d38   :  { %v2860_v4 = vpop.permute.xlu1 %2859 }
0x1d3a   :  { %v2856_v11 = vpop.permute.xlu0 %2855 }
0x1d3b   :  { %v2862_v16 = vsel %vm361_vm10, %v2856_v11, %v2860_v4  ;;  %5471 = vmatmul.mubr.msk.f32.vlgmr.msra.gmra.mxu0 %vm361_vm10, %v2856_v11 }
0x1d3c   :  { %5460 = vmatmul.mubr.msk.f32.vlgmr.msra.gmra.mxu1 %vm643_vm14, %v2862_v16  ;;  %5474 = vmatpush3.msra.mxu0 %v7083_v35 }
0x1d3d   :  { %5475 = vmatprep.subr.mxu0 %v6248_v36  ;;  %5493 = vmatpush3.msra.mxu1 %v7009_v15 }
0x1d3e   :  { %5476 = vmatpush3.msra.mxu0 %v7091_v37  ;;  %5494 = vmatprep.subr.mxu1 %v6248_v36 }
0x1d3f   :  { %5477 = vmatprep.subr.mxu0 %v6248_v36  ;;  %5495 = vmatpush3.msra.mxu1 %v7018_v6 }
0x1d40   :  { %5478 = vmatpush3.msra.mxu0 %v7100_v38  ;;  %5496 = vmatprep.subr.mxu1 %v6248_v36 }
0x1d41   :  { %5479 = vmatprep.subr.mxu0 %v6248_v36  ;;  %5497 = vmatpush3.msra.mxu1 %v7027_v24 }
0x1d42   :  { %5480 = vmatpush3.msra.mxu0 %v7109_v39  ;;  %5498 = vmatprep.subr.mxu1 %v6248_v36 }
0x1d43   :  { %5481 = vmatprep.subr.mxu0 %v6248_v36  ;;  %5499 = vmatpush3.msra.mxu1 %v7036_v34 }
0x1d44   :  { %5482 = vmatpush3.msra.mxu0 %v7118_v40  ;;  %5500 = vmatprep.mubr.msk.f32.mxu1 %vm6249_vm2, %v6248_v36 }
0x1d45   :  { %5483 = vmatprep.subr.mxu0 %v6248_v36  ;;  %5489 = vmatprep.mubr.msk.f32.mxu0 %vm6249_vm2, %v6248_v36 }
0x1d46   :  { %5484 = vmatpush3.msra.mxu0 %v7129_v63  ;;  %5503 = vmatprep.subr.mxu1 %v6248_v36 }
0x1d47   :  { %5485 = vmatprep.subr.mxu0 %v6248_v36 }
0x1d48   :  { %5486 = vmatpush3.msra.mxu0 %v7137_v0 }
0x1d49   :  { %5487 = vmatprep.subr.mxu0 %v6248_v36 }
0x1d4a   :  { %5488 = vmatpush3.msra.mxu0 %v7144_v2 }
0x1d4b   :  { %5522 = vmatprep.subr.mxu0 %v6248_v36 }
0x1dfb   :  { %v3029_v17 = vpop.f32.mrf.mxu0 }
0x1dfc   :  { %v3034_v18 = vrot.slane %v3029_v17, 7  ;;  %v3038_v19 = vadd.f32 %v3029_v17, %v6692_v1  ;;  %v2932_v20 = vpop.f32.mrf.mxu1 }
0x1dfd   :  { %v2933_v25 = vadd.f32 %v7207_v12, %v2932_v20  ;;  %v5472_v26 = vpop.f32.mrf.mxu0 }
0x1dfe   :  { %v3037_v47 = vadd.f32 %v3034_v18, %v6696_v61  ;;  %v4858_v27 = vmul.f32 -1.442695, %v3038_v19  ;;  %v5461_v14 = vpop.f32.mrf.mxu1 }
0x1dff   :  { %v4855_v28 = vmul.f32 -1.442695, %v2933_v25 }
0x1e00   :  { %v4857_v30 = vmul.f32 -1.442695, %v3037_v47  ;;  %6027 = vpow2.f32 %v4858_v27 }
0x1e02   :  { %6029 = vpow2.f32 %v4857_v30 }
0x1e03   :  { %6031 = vpow2.f32 %v4855_v28 }
0x1e04   :  { %6033 = vtanh.f32 %v3037_v47 }
0x1e05   :  { %6035 = vtanh.f32 %v3038_v19 }
0x1e06   :  { %6037 = vtanh.f32 %v2933_v25 }
0x1e0d   :  { %v6028_v31 = vpop.eup %6027 }
0x1e0e   :  { %v3046_v43 = vadd.f32 1.0, %v6028_v31 }
0x1e0f   :  { %v6030_v41 = vpop.eup %6029 }
0x1e10   :  { %v6032_v60 = vpop.eup %6031  ;;  %v3045_v62 = vadd.f32 1.0, %v6030_v41 }
0x1e11   :  { %v2939_v44 = vadd.f32 1.0, %v6032_v60  ;;  %v6034_v45 = vpop.eup %6033 }
0x1e12   :  { %6039 = vrcp.f32 %v3045_v62  ;;  %v6036_v48 = vpop.eup %6035  ;;  %v3060_v50 = vrot.slane %v6034_v45, 1 }
0x1e13   :  { %6041 = vrcp.f32 %v2939_v44  ;;  %v6038_v33 = vpop.eup %6037 }
0x1e14   :  { %6043 = vrcp.f32 %v3046_v43  ;;  %v3061_v59 = vsel %vm998_vm5, %v6036_v48, %v3060_v50 }
0x1e1f   :  { %v6040_v51 = vpop.eup %6039 }
0x1e20   :  { %v6042_v52 = vpop.eup %6041  ;;  %v3055_v29 = vrot.slane %v6040_v51, 1 }
0x1e21   :  { %v6044_v32 = vpop.eup %6043  ;;  %v2943_v13 = vsel %vm6702_vm6, %v6042_v52, %v6038_v33 }
0x1e22   :  { %2946 = vrot.lane.b32.xlu1 %v2943_v13, %s6245_s30  ;;  %v3056_v58 = vsel %vm998_vm5, %v6044_v32, %v3055_v29  ;;  %v2944_v54 = vmul.f32 %v2943_v13, %v7279_v3 }
0x1e23   :  { %v3063_v49 = vsel %vm6702_vm6, %v3056_v58, %v3061_v59 }
0x1e24   :  { %3066 = vrot.lane.b32.xlu0 %v3063_v49, %s6245_s30  ;;  %v3064_v56 = vmul.f32 %v3063_v49, %v7283_v10 }
0x1e94   :  { %v2947_v53 = vpop.permute.xlu1 %2946 }
0x1e95   :  { %v2949_v22 = vmul.f32 %v2947_v53, %v2943_v13 }
0x1e96   :  { %v3067_v5 = vpop.permute.xlu0 %3066 }
0x1e97   :  { %2951 = vrot.lane.b32.xlu1 %v2949_v22, %s6243_s27  ;;  %v3069_v55 = vmul.f32 %v3067_v5, %v3063_v49 }
0x1e99   :  { %3071 = vrot.lane.b32.xlu0 %v3069_v55, %s6243_s27 }
0x1f09   :  { %v2952_v57 = vpop.permute.xlu1 %2951 }
0x1f0a   :  { %v7335_v7 = vadd.f32 %v2952_v57, %v2944_v54 }
0x1f0b   :  { %v3072_v8 = vpop.permute.xlu0 %3071 }
0x1f0c   :  { %6045 = vtanh.f32 %v7335_v7  ;;  %v7339_v42 = vadd.f32 %v3072_v8, %v3064_v56 }
0x1f0e   :  { %6047 = vtanh.f32 %v7339_v42 }
0x1f19   :  { %v6046_v23 = vpop.eup %6045 }
0x1f1a   :  { %2957 = vrot.lane.b32.xlu1 %v6046_v23, %s6245_s30 }
0x1f1b   :  { %v6048_v46 = vpop.eup %6047 }
0x1f1c   :  { %3077 = vrot.lane.b32.xlu0 %v6048_v46, %s6245_s30 }
0x1f8c   :  { %v2958_v9 = vpop.permute.xlu1 %2957 }
0x1f8d   :  { %v2960_v3 = vmul.f32 %v2958_v9, %v2943_v13 }
0x1f8e   :  { %v3078_v4 = vpop.permute.xlu0 %3077 }
0x1f8f   :  { %3086 = vrot.lane.b32.xlu1 %v2960_v3, %s6245_s30  ;;  %v3080_v11 = vmul.f32 %v3078_v4, %v3063_v49 }
0x1f91   :  { %3082 = vrot.lane.b32.xlu0 %v3080_v11, %s6243_s27 }
0x2001   :  { %v3087_v10 = vpop.permute.xlu1 %3086 }
0x2003   :  { %v3083_v16 = vpop.permute.xlu0 %3082 }
0x2004   :  { %v3089_v17 = vsel %vm361_vm10, %v3083_v16, %v3087_v10  ;;  %5501 = vmatmul.mubr.msk.f32.vlgmr.msra.gmra.mxu1 %vm361_vm10, %v3083_v16 }
0x2005   :  { %5490 = vmatmul.mubr.msk.f32.vlgmr.msra.gmra.mxu0 %vm643_vm14, %v3089_v17  ;;  %5504 = vmatpush3.msra.mxu1 %v7083_v35 }
0x2006   :  { %5505 = vmatprep.subr.mxu1 %v6248_v36  ;;  %5523 = vmatpush3.msra.mxu0 %v7009_v15 }
0x2007   :  { %5506 = vmatpush3.msra.mxu1 %v7091_v37  ;;  %5524 = vmatprep.subr.mxu0 %v6248_v36 }
0x2008   :  { %5507 = vmatprep.subr.mxu1 %v6248_v36  ;;  %5525 = vmatpush3.msra.mxu0 %v7018_v6 }
0x2009   :  { %5508 = vmatpush3.msra.mxu1 %v7100_v38  ;;  %5526 = vmatprep.subr.mxu0 %v6248_v36 }
0x200a   :  { %5509 = vmatprep.subr.mxu1 %v6248_v36  ;;  %5527 = vmatpush3.msra.mxu0 %v7027_v24 }
0x200b   :  { %5510 = vmatpush3.msra.mxu1 %v7109_v39  ;;  %5528 = vmatprep.subr.mxu0 %v6248_v36 }
0x200c   :  { %5511 = vmatprep.subr.mxu1 %v6248_v36  ;;  %5529 = vmatpush3.msra.mxu0 %v7036_v34 }
0x200d   :  { %5512 = vmatpush3.msra.mxu1 %v7118_v40  ;;  %5530 = vmatprep.mubr.msk.f32.mxu0 %vm6249_vm2, %v6248_v36 }
0x200e   :  { %5513 = vmatprep.subr.mxu1 %v6248_v36  ;;  %5519 = vmatprep.mubr.msk.f32.mxu1 %vm6249_vm2, %v6248_v36 }
0x200f   :  { %5514 = vmatpush3.msra.mxu1 %v7129_v63  ;;  %5533 = vmatprep.subr.mxu0 %v6248_v36 }
0x2010   :  { %5515 = vmatprep.subr.mxu1 %v6248_v36 }
0x2011   :  { %5516 = vmatpush3.msra.mxu1 %v7137_v0 }
0x2012   :  { %5517 = vmatprep.subr.mxu1 %v6248_v36 }
0x2013   :  { %5518 = vmatpush3.msra.mxu1 %v7144_v2 }
0x2014   :  { %5552 = vmatprep.subr.mxu1 %v6248_v36 }
0x20c4   :  { %v3256_v15 = vpop.f32.mrf.mxu1 }
0x20c5   :  { %v3261_v6 = vrot.slane %v3256_v15, 6  ;;  %v3262_v24 = vrot.slane %v3256_v15, 7  ;;  %v3159_v34 = vpop.f32.mrf.mxu0  ;;  %v7410_v15 = vld [vmem:[%s7795_s12 + $0x18] sm:$0xff] }
0x20c6   :  { %v3160_v18 = vadd.f32 %v7207_v12, %v3159_v34  ;;  %v5502_v19 = vpop.f32.mrf.mxu1 }
0x20c7   :  { %v3265_v20 = vadd.f32 %v3261_v6, %v6696_v61  ;;  %v3266_v25 = vadd.f32 %v3262_v24, %v6692_v1  ;;  %v5491_v26 = vpop.f32.mrf.mxu0  ;;  %v7419_v6 = vld [vmem:[%s7795_s12 + $0x10] sm:$0xff] }
0x20c8   :  { %v4860_v14 = vmul.f32 -1.442695, %v3160_v18 }
0x20c9   :  { %v4862_v47 = vmul.f32 -1.442695, %v3265_v20  ;;  %v4863_v27 = vmul.f32 -1.442695, %v3266_v25 }
0x20cb   :  { %6049 = vpow2.f32 %v4862_v47 }
0x20cc   :  { %6051 = vpow2.f32 %v4863_v27 }
0x20cd   :  { %6053 = vpow2.f32 %v4860_v14 }
0x20ce   :  { %6055 = vtanh.f32 %v3265_v20 }
0x20cf   :  { %6057 = vtanh.f32 %v3266_v25 }
0x20d0   :  { %6059 = vtanh.f32 %v3160_v18 }
0x20d8   :  { %v6050_v28 = vpop.eup %6049 }
0x20d9   :  { %v6052_v30 = vpop.eup %6051  ;;  %v3273_v31 = vadd.f32 1.0, %v6050_v28 }
0x20da   :  { %v6054_v41 = vpop.eup %6053  ;;  %v3274_v60 = vadd.f32 1.0, %v6052_v30 }
0x20db   :  { %6061 = vrcp.f32 %v3273_v31  ;;  %v3166_v62 = vadd.f32 1.0, %v6054_v41  ;;  %v6056_v43 = vpop.eup %6055 }
0x20dc   :  { %6063 = vrcp.f32 %v3274_v60  ;;  %v6058_v44 = vpop.eup %6057  ;;  %v3289_v33 = vrot.slane %v6056_v43, 2 }
0x20dd   :  { %6065 = vrcp.f32 %v3166_v62  ;;  %v6060_v45 = vpop.eup %6059  ;;  %v3290_v50 = vrot.slane %v6058_v44, 1 }
0x20df   :  { %v3291_v59 = vsel %vm998_vm5, %v3290_v50, %v3289_v33 }
0x20e8   :  { %v6062_v48 = vpop.eup %6061 }
0x20e9   :  { %v6064_v51 = vpop.eup %6063  ;;  %v3283_v52 = vrot.slane %v6062_v48, 2 }
0x20ea   :  { %v6066_v29 = vpop.eup %6065  ;;  %v3284_v32 = vrot.slane %v6064_v51, 1 }
0x20eb   :  { %v3170_v13 = vsel %vm6702_vm6, %v6066_v29, %v6060_v45 }
0x20ec   :  { %3173 = vrot.lane.b32.xlu1 %v3170_v13, %s6245_s30  ;;  %v3285_v58 = vsel %vm998_vm5, %v3284_v32, %v3283_v52  ;;  %v3171_v54 = vmul.f32 %v3170_v13, %v7335_v7 }
0x20ed   :  { %v3293_v49 = vsel %vm6702_vm6, %v3285_v58, %v3291_v59 }
0x20ee   :  { %3296 = vrot.lane.b32.xlu0 %v3293_v49, %s6245_s30  ;;  %v3294_v8 = vmul.f32 %v3293_v49, %v7339_v42 }
0x215e   :  { %v3174_v53 = vpop.permute.xlu1 %3173 }
0x215f   :  { %v3176_v22 = vmul.f32 %v3174_v53, %v3170_v13 }
0x2160   :  { %v3297_v5 = vpop.permute.xlu0 %3296 }
0x2161   :  { %3178 = vrot.lane.b32.xlu1 %v3176_v22, %s6243_s27  ;;  %v3299_v55 = vmul.f32 %v3297_v5, %v3293_v49 }
0x2163   :  { %3301 = vrot.lane.b32.xlu0 %v3299_v55, %s6243_s27 }
0x21d3   :  { %v3179_v57 = vpop.permute.xlu1 %3178 }
0x21d4   :  { %v7391_v56 = vadd.f32 %v3179_v57, %v3171_v54 }
0x21d5   :  { %v3302_v23 = vpop.permute.xlu0 %3301 }
0x21d6   :  { %6067 = vtanh.f32 %v7391_v56  ;;  %v7395_v46 = vadd.f32 %v3302_v23, %v3294_v8 }
0x21d8   :  { %6069 = vtanh.f32 %v7395_v46 }
0x21e3   :  { %v6068_v9 = vpop.eup %6067 }
0x21e4   :  { %3184 = vrot.lane.b32.xlu1 %v6068_v9, %s6245_s30 }
0x21e5   :  { %v6070_v3 = vpop.eup %6069 }
0x21e6   :  { %3307 = vrot.lane.b32.xlu0 %v6070_v3, %s6245_s30 }
0x2256   :  { %v3185_v4 = vpop.permute.xlu1 %3184 }
0x2257   :  { %v3187_v7 = vmul.f32 %v3185_v4, %v3170_v13 }
0x2258   :  { %v3308_v11 = vpop.permute.xlu0 %3307 }
0x2259   :  { %3316 = vrot.lane.b32.xlu1 %v3187_v7, %s6245_s30  ;;  %v3310_v10 = vmul.f32 %v3308_v11, %v3293_v49 }
0x225b   :  { %3312 = vrot.lane.b32.xlu0 %v3310_v10, %s6243_s27  ;;  %v7484_v10 = vld [vmem:[%s7796_s13 + $0x38] sm:$0xff] }
0x22cb   :  { %v3317_v42 = vpop.permute.xlu1 %3316 }
0x22cd   :  { %v3313_v16 = vpop.permute.xlu0 %3312 }
0x22ce   :  { %v3319_v17 = vsel %vm361_vm10, %v3313_v16, %v3317_v42  ;;  %5531 = vmatmul.mubr.msk.f32.vlgmr.msra.gmra.mxu0 %vm361_vm10, %v3313_v16  ;;  %v7492_v42 = vld [vmem:[%s7796_s13 + $0x30] sm:$0xff]  ;;  %v7501_v16 = vld [vmem:[%s7796_s13 + $0x28] sm:$0xff] }
0x22cf   :  { %5520 = vmatmul.mubr.msk.f32.vlgmr.msra.gmra.mxu1 %vm643_vm14, %v3319_v17  ;;  %5534 = vmatpush3.msra.mxu0 %v7083_v35  ;;  %v7428_v35 = vld [vmem:[%s7795_s12 + $0x8] sm:$0xff]  ;;  %v7510_v17 = vld [vmem:[%s7796_s13 + $0x20] sm:$0xff] }
0x22d0   :  { %5535 = vmatprep.subr.mxu0 %v6248_v36  ;;  %5553 = vmatpush3.msra.mxu1 %v7410_v15 }
0x22d1   :  { %5536 = vmatpush3.msra.mxu0 %v7091_v37  ;;  %5554 = vmatprep.subr.mxu1 %v6248_v36  ;;  %v7437_v37 = vld [vmem:[%s7795_s12] sm:$0xff] }
0x22d2   :  { %5537 = vmatprep.subr.mxu0 %v6248_v36  ;;  %5555 = vmatpush3.msra.mxu1 %v7419_v6 }
0x22d3   :  { %5538 = vmatpush3.msra.mxu0 %v7100_v38  ;;  %5556 = vmatprep.subr.mxu1 %v6248_v36 }
0x22d4   :  { %5539 = vmatprep.subr.mxu0 %v6248_v36  ;;  %5557 = vmatpush3.msra.mxu1 %v7428_v35 }
0x22d5   :  { %5540 = vmatpush3.msra.mxu0 %v7109_v39  ;;  %5558 = vmatprep.subr.mxu1 %v6248_v36 }
0x22d6   :  { %5541 = vmatprep.subr.mxu0 %v6248_v36  ;;  %5559 = vmatpush3.msra.mxu1 %v7437_v37 }
0x22d7   :  { %5542 = vmatpush3.msra.mxu0 %v7118_v40  ;;  %5560 = vmatprep.mubr.msk.f32.mxu1 %vm6249_vm2, %v6248_v36 }
0x22d8   :  { %5543 = vmatprep.subr.mxu0 %v6248_v36  ;;  %5549 = vmatprep.mubr.msk.f32.mxu0 %vm6249_vm2, %v6248_v36 }
0x22d9   :  { %5544 = vmatpush3.msra.mxu0 %v7129_v63  ;;  %5563 = vmatprep.subr.mxu1 %v6248_v36 }
0x22da   :  { %5545 = vmatprep.subr.mxu0 %v6248_v36 }
0x22db   :  { %5546 = vmatpush3.msra.mxu0 %v7137_v0 }
0x22dc   :  { %5547 = vmatprep.subr.mxu0 %v6248_v36 }
0x22dd   :  { %5548 = vmatpush3.msra.mxu0 %v7144_v2 }
0x22de   :  { %5582 = vmatprep.subr.mxu0 %v6248_v36 }
0x238e   :  { %v3486_v38 = vpop.f32.mrf.mxu0 }
0x238f   :  { %v3491_v39 = vrot.slane %v3486_v38, 5  ;;  %v3492_v40 = vrot.slane %v3486_v38, 6  ;;  %v3389_v24 = vpop.f32.mrf.mxu1  ;;  %v7519_v38 = vld [vmem:[%s7796_s13 + $0x18] sm:$0xff] }
0x2390   :  { %v3390_v34 = vadd.f32 %v7207_v12, %v3389_v24  ;;  %v5532_v18 = vpop.f32.mrf.mxu0  ;;  %v7545_v24 = vld [vmem:[%s7796_s13] sm:$0xff] }
0x2391   :  { %v3495_v63 = vadd.f32 %v3491_v39, %v6696_v61  ;;  %v3496_v19 = vadd.f32 %v3492_v40, %v6692_v1  ;;  %v5521_v20 = vpop.f32.mrf.mxu1  ;;  %v7530_v39 = vld [vmem:[%s7796_s13 + $0x10] sm:$0xff]  ;;  %v7538_v40 = vld [vmem:[%s7796_s13 + $0x8] sm:$0xff] }
0x2392   :  { %v4865_v26 = vmul.f32 -1.442695, %v3390_v34 }
0x2393   :  { %v4867_v25 = vmul.f32 -1.442695, %v3495_v63  ;;  %v4868_v0 = vmul.f32 -1.442695, %v3496_v19 }
0x2395   :  { %6071 = vpow2.f32 %v4867_v25 }
0x2396   :  { %6073 = vpow2.f32 %v4868_v0 }
0x2397   :  { %6075 = vpow2.f32 %v4865_v26 }
0x2398   :  { %6077 = vtanh.f32 %v3495_v63 }
0x2399   :  { %6079 = vtanh.f32 %v3496_v19 }
0x239a   :  { %6081 = vtanh.f32 %v3390_v34 }
0x23a2   :  { %v6072_v2 = vpop.eup %6071 }
0x23a3   :  { %v6074_v47 = vpop.eup %6073  ;;  %v3503_v27 = vadd.f32 1.0, %v6072_v2 }
0x23a4   :  { %v6076_v14 = vpop.eup %6075  ;;  %v3504_v28 = vadd.f32 1.0, %v6074_v47 }
0x23a5   :  { %6083 = vrcp.f32 %v3503_v27  ;;  %v3396_v30 = vadd.f32 1.0, %v6076_v14  ;;  %v6078_v31 = vpop.eup %6077 }
0x23a6   :  { %6085 = vrcp.f32 %v3504_v28  ;;  %v6080_v41 = vpop.eup %6079  ;;  %v3519_v43 = vrot.slane %v6078_v31, 3 }
0x23a7   :  { %6087 = vrcp.f32 %v3396_v30  ;;  %v6082_v60 = vpop.eup %6081  ;;  %v3520_v44 = vrot.slane %v6080_v41, 2 }
0x23a9   :  { %v3521_v29 = vsel %vm998_vm5, %v3520_v44, %v3519_v43 }
0x23b2   :  { %v6084_v62 = vpop.eup %6083 }
0x23b3   :  { %v6086_v45 = vpop.eup %6085  ;;  %v3513_v48 = vrot.slane %v6084_v62, 3 }
0x23b4   :  { %v6088_v33 = vpop.eup %6087  ;;  %v3514_v50 = vrot.slane %v6086_v45, 2 }
0x23b5   :  { %v3400_v51 = vsel %vm6702_vm6, %v6088_v33, %v6082_v60 }
0x23b6   :  { %3403 = vrot.lane.b32.xlu1 %v3400_v51, %s6245_s30  ;;  %v3515_v52 = vsel %vm998_vm5, %v3514_v50, %v3513_v48  ;;  %v3401_v53 = vmul.f32 %v3400_v51, %v7391_v56 }
0x23b7   :  { %v3523_v32 = vsel %vm6702_vm6, %v3515_v52, %v3521_v29 }
0x23b8   :  { %3526 = vrot.lane.b32.xlu0 %v3523_v32, %s6245_s30  ;;  %v3524_v55 = vmul.f32 %v3523_v32, %v7395_v46 }
0x2428   :  { %v3404_v13 = vpop.permute.xlu1 %3403 }
0x2429   :  { %v3406_v58 = vmul.f32 %v3404_v13, %v3400_v51 }
0x242a   :  { %v3527_v59 = vpop.permute.xlu0 %3526 }
0x242b   :  { %3408 = vrot.lane.b32.xlu1 %v3406_v58, %s6243_s27  ;;  %v3529_v49 = vmul.f32 %v3527_v59, %v3523_v32 }
0x242d   :  { %3531 = vrot.lane.b32.xlu0 %v3529_v49, %s6243_s27 }
0x249d   :  { %v3409_v22 = vpop.permute.xlu1 %3408 }
0x249e   :  { %v7467_v5 = vadd.f32 %v3409_v22, %v3401_v53 }
0x249f   :  { %v3532_v54 = vpop.permute.xlu0 %3531 }
0x24a0   :  { %6089 = vtanh.f32 %v7467_v5  ;;  %v7471_v57 = vadd.f32 %v3532_v54, %v3524_v55 }
0x24a2   :  { %6091 = vtanh.f32 %v7471_v57 }
0x24ad   :  { %v6090_v8 = vpop.eup %6089 }
0x24ae   :  { %3414 = vrot.lane.b32.xlu1 %v6090_v8, %s6245_s30 }
0x24af   :  { %v6092_v23 = vpop.eup %6091 }
0x24b0   :  { %3537 = vrot.lane.b32.xlu0 %v6092_v23, %s6245_s30 }
0x2520   :  { %v3415_v9 = vpop.permute.xlu1 %3414 }
0x2521   :  { %v3417_v56 = vmul.f32 %v3415_v9, %v3400_v51 }
0x2522   :  { %v3538_v3 = vpop.permute.xlu0 %3537 }
0x2523   :  { %3546 = vrot.lane.b32.xlu1 %v3417_v56, %s6245_s30  ;;  %v3540_v4 = vmul.f32 %v3538_v3, %v3523_v32 }
0x2525   :  { %3542 = vrot.lane.b32.xlu0 %v3540_v4, %s6243_s27 }
0x2595   :  { %v3547_v46 = vpop.permute.xlu1 %3546 }
0x2597   :  { %v3543_v7 = vpop.permute.xlu0 %3542 }
0x2598   :  { %v3549_v11 = vsel %vm361_vm10, %v3543_v7, %v3547_v46  ;;  %5561 = vmatmul.mubr.msk.f32.vlgmr.msra.gmra.mxu1 %vm361_vm10, %v3543_v7 }
0x2599   :  { %5550 = vmatmul.mubr.msk.f32.vlgmr.msra.gmra.mxu0 %vm643_vm14, %v3549_v11  ;;  %5564 = vmatpush3.msra.mxu1 %v7484_v10 }
0x259a   :  { %5565 = vmatprep.subr.mxu1 %v6248_v36  ;;  %5583 = vmatpush3.msra.mxu0 %v7410_v15 }
0x259b   :  { %5566 = vmatpush3.msra.mxu1 %v7492_v42  ;;  %5584 = vmatprep.subr.mxu0 %v6248_v36 }
0x259c   :  { %5567 = vmatprep.subr.mxu1 %v6248_v36  ;;  %5585 = vmatpush3.msra.mxu0 %v7419_v6 }
0x259d   :  { %5568 = vmatpush3.msra.mxu1 %v7501_v16  ;;  %5586 = vmatprep.subr.mxu0 %v6248_v36 }
0x259e   :  { %5569 = vmatprep.subr.mxu1 %v6248_v36  ;;  %5587 = vmatpush3.msra.mxu0 %v7428_v35 }
0x259f   :  { %5570 = vmatpush3.msra.mxu1 %v7510_v17  ;;  %5588 = vmatprep.subr.mxu0 %v6248_v36 }
0x25a0   :  { %5571 = vmatprep.subr.mxu1 %v6248_v36  ;;  %5589 = vmatpush3.msra.mxu0 %v7437_v37 }
0x25a1   :  { %5572 = vmatpush3.msra.mxu1 %v7519_v38  ;;  %5590 = vmatprep.mubr.msk.f32.mxu0 %vm6249_vm2, %v6248_v36 }
0x25a2   :  { %5573 = vmatprep.subr.mxu1 %v6248_v36  ;;  %5579 = vmatprep.mubr.msk.f32.mxu1 %vm6249_vm2, %v6248_v36 }
0x25a3   :  { %5574 = vmatpush3.msra.mxu1 %v7530_v39  ;;  %5593 = vmatprep.subr.mxu0 %v6248_v36 }
0x25a4   :  { %5575 = vmatprep.subr.mxu1 %v6248_v36 }
0x25a5   :  { %5576 = vmatpush3.msra.mxu1 %v7538_v40 }
0x25a6   :  { %5577 = vmatprep.subr.mxu1 %v6248_v36 }
0x25a7   :  { %5578 = vmatpush3.msra.mxu1 %v7545_v24 }
0x25a8   :  { %5612 = vmatprep.subr.mxu1 %v6248_v36 }
0x2658   :  { %v3716_v34 = vpop.f32.mrf.mxu1 }
0x2659   :  { %v3721_v18 = vrot.slane %v3716_v34, 4  ;;  %v3722_v63 = vrot.slane %v3716_v34, 5  ;;  %v3619_v19 = vpop.f32.mrf.mxu0 }
0x265a   :  { %v3620_v20 = vadd.f32 %v7207_v12, %v3619_v19  ;;  %v5562_v25 = vpop.f32.mrf.mxu1 }
0x265b   :  { %v3725_v0 = vadd.f32 %v3721_v18, %v6696_v61  ;;  %v3726_v26 = vadd.f32 %v3722_v63, %v6692_v1  ;;  %v5551_v2 = vpop.f32.mrf.mxu0 }
0x265c   :  { %v4870_v14 = vmul.f32 -1.442695, %v3620_v20 }
0x265d   :  { %v4872_v47 = vmul.f32 -1.442695, %v3725_v0  ;;  %v4873_v27 = vmul.f32 -1.442695, %v3726_v26 }
0x265f   :  { %6093 = vpow2.f32 %v4872_v47 }
0x2660   :  { %6095 = vpow2.f32 %v4873_v27 }
0x2661   :  { %6097 = vpow2.f32 %v4870_v14 }
0x2662   :  { %6099 = vtanh.f32 %v3725_v0 }
0x2663   :  { %6101 = vtanh.f32 %v3726_v26  ;;  %v7608_v26 = vld [vmem:[%s7797_s14] ss:$0 sm:$0xff] }
0x2664   :  { %6103 = vtanh.f32 %v3620_v20 }
0x266c   :  { %v6094_v28 = vpop.eup %6093 }
0x266d   :  { %v6096_v30 = vpop.eup %6095  ;;  %v3733_v31 = vadd.f32 1.0, %v6094_v28 }
0x266e   :  { %v6098_v41 = vpop.eup %6097  ;;  %v3734_v60 = vadd.f32 1.0, %v6096_v30 }
0x266f   :  { %6105 = vrcp.f32 %v3733_v31  ;;  %v3626_v12 = vadd.f32 1.0, %v6098_v41  ;;  %v6100_v62 = vpop.eup %6099 }
0x2670   :  { %6107 = vrcp.f32 %v3734_v60  ;;  %v6102_v43 = vpop.eup %6101  ;;  %v3749_v48 = vrot.slane %v6100_v62, 4 }
0x2671   :  { %6109 = vrcp.f32 %v3626_v12  ;;  %v6104_v44 = vpop.eup %6103  ;;  %v3750_v33 = vrot.slane %v6102_v43, 3 }
0x2673   :  { %v3751_v58 = vsel %vm998_vm5, %v3750_v33, %v3749_v48 }
0x267c   :  { %v6106_v45 = vpop.eup %6105 }
0x267d   :  { %v6108_v50 = vpop.eup %6107  ;;  %v3743_v51 = vrot.slane %v6106_v45, 4 }
0x267e   :  { %v6110_v52 = vpop.eup %6109  ;;  %v3744_v29 = vrot.slane %v6108_v50, 3 }
0x267f   :  { %v3630_v32 = vsel %vm6702_vm6, %v6110_v52, %v6104_v44 }
0x2680   :  { %3633 = vrot.lane.b32.xlu1 %v3630_v32, %s6245_s30  ;;  %v3745_v13 = vsel %vm998_vm5, %v3744_v29, %v3743_v51  ;;  %v3631_v54 = vmul.f32 %v3630_v32, %v7467_v5 }
0x2681   :  { %v3753_v59 = vsel %vm6702_vm6, %v3745_v13, %v3751_v58 }
0x2682   :  { %3756 = vrot.lane.b32.xlu0 %v3753_v59, %s6245_s30  ;;  %v3754_v9 = vmul.f32 %v3753_v59, %v7471_v57 }
0x26f2   :  { %v3634_v49 = vpop.permute.xlu1 %3633 }
0x26f3   :  { %v3636_v53 = vmul.f32 %v3634_v49, %v3630_v32 }
0x26f4   :  { %v3757_v22 = vpop.permute.xlu0 %3756 }
0x26f5   :  { %3638 = vrot.lane.b32.xlu1 %v3636_v53, %s6243_s27  ;;  %v3759_v55 = vmul.f32 %v3757_v22, %v3753_v59 }
0x26f7   :  { %3761 = vrot.lane.b32.xlu0 %v3759_v55, %s6243_s27 }
0x2767   :  { %v3639_v8 = vpop.permute.xlu1 %3638 }
0x2768   :  { %v7563_v23 = vadd.f32 %v3639_v8, %v3631_v54 }
0x2769   :  { %v3762_v56 = vpop.permute.xlu0 %3761 }
0x276a   :  { %6111 = vtanh.f32 %v7563_v23  ;;  %v7567_v3 = vadd.f32 %v3762_v56, %v3754_v9 }
0x276c   :  { %6113 = vtanh.f32 %v7567_v3 }
0x2777   :  { %v6112_v4 = vpop.eup %6111 }
0x2778   :  { %3644 = vrot.lane.b32.xlu1 %v6112_v4, %s6245_s30 }
0x2779   :  { %v6114_v46 = vpop.eup %6113 }
0x277a   :  { %3767 = vrot.lane.b32.xlu0 %v6114_v46, %s6245_s30 }
0x27ea   :  { %v3645_v7 = vpop.permute.xlu1 %3644 }
0x27eb   :  { %v3647_v5 = vmul.f32 %v3645_v7, %v3630_v32 }
0x27ec   :  { %v3768_v11 = vpop.permute.xlu0 %3767 }
0x27ed   :  { %3776 = vrot.lane.b32.xlu1 %v3647_v5, %s6245_s30  ;;  %v3770_v34 = vmul.f32 %v3768_v11, %v3753_v59 }
0x27ef   :  { %3772 = vrot.lane.b32.xlu0 %v3770_v34, %s6243_s27 }
0x285f   :  { %v3777_v57 = vpop.permute.xlu1 %3776 }
0x2861   :  { %v3773_v18 = vpop.permute.xlu0 %3772 }
0x2862   :  { %v3779_v63 = vsel %vm361_vm10, %v3773_v18, %v3777_v57  ;;  %5591 = vmatmul.mubr.msk.f32.vlgmr.msra.gmra.mxu0 %vm361_vm10, %v3773_v18 }
0x2863   :  { %5580 = vmatmul.mubr.msk.f32.vlgmr.msra.gmra.mxu1 %vm643_vm14, %v3779_v63  ;;  %5594 = vmatpush3.msra.mxu0 %v7484_v10 }
0x2864   :  { %5595 = vmatprep.subr.mxu0 %v6248_v36  ;;  %5613 = vmatpush3.msra.mxu1 %v7410_v15 }
0x2865   :  { %5596 = vmatpush3.msra.mxu0 %v7492_v42  ;;  %5614 = vmatprep.subr.mxu1 %v6248_v36 }
0x2866   :  { %5597 = vmatprep.subr.mxu0 %v6248_v36  ;;  %5615 = vmatpush3.msra.mxu1 %v7419_v6 }
0x2867   :  { %5598 = vmatpush3.msra.mxu0 %v7501_v16  ;;  %5616 = vmatprep.subr.mxu1 %v6248_v36 }
0x2868   :  { %5599 = vmatprep.subr.mxu0 %v6248_v36  ;;  %5617 = vmatpush3.msra.mxu1 %v7428_v35 }
0x2869   :  { %5600 = vmatpush3.msra.mxu0 %v7510_v17  ;;  %5618 = vmatprep.subr.mxu1 %v6248_v36 }
0x286a   :  { %5601 = vmatprep.subr.mxu0 %v6248_v36  ;;  %5619 = vmatpush3.msra.mxu1 %v7437_v37 }
0x286b   :  { %5602 = vmatpush3.msra.mxu0 %v7519_v38  ;;  %5620 = vmatprep.mubr.msk.f32.mxu1 %vm6249_vm2, %v6248_v36 }
0x286c   :  { %5603 = vmatprep.subr.mxu0 %v6248_v36  ;;  %5609 = vmatprep.mubr.msk.f32.mxu0 %vm6249_vm2, %v6248_v36 }
0x286d   :  { %5604 = vmatpush3.msra.mxu0 %v7530_v39  ;;  %5623 = vmatprep.subr.mxu1 %v6248_v36 }
0x286e   :  { %5605 = vmatprep.subr.mxu0 %v6248_v36 }
0x286f   :  { %5606 = vmatpush3.msra.mxu0 %v7538_v40 }
0x2870   :  { %5607 = vmatprep.subr.mxu0 %v6248_v36 }
0x2871   :  { %5608 = vmatpush3.msra.mxu0 %v7545_v24 }
0x2872   :  { %5642 = vmatprep.subr.mxu0 %v6248_v36 }
0x2922   :  { %v3946_v19 = vpop.f32.mrf.mxu0 }
0x2923   :  { %v3951_v20 = vrot.slane %v3946_v19, 3  ;;  %v3952_v25 = vrot.slane %v3946_v19, 4  ;;  %v3849_v0 = vpop.f32.mrf.mxu1 }
0x2924   :  { %v3850_v2 = vadd.f32 %v7608_v26, %v3849_v0  ;;  %v5592_v47 = vpop.f32.mrf.mxu0 }
0x2925   :  { %v3955_v27 = vadd.f32 %v3951_v20, %v6696_v61  ;;  %v3956_v14 = vadd.f32 %v3952_v25, %v6692_v1  ;;  %v5581_v28 = vpop.f32.mrf.mxu1 }
0x2926   :  { %v4875_v41 = vmul.f32 -1.442695, %v3850_v2 }
0x2927   :  { %v4877_v30 = vmul.f32 -1.442695, %v3955_v27  ;;  %v4878_v31 = vmul.f32 -1.442695, %v3956_v14 }
0x2929   :  { %6115 = vpow2.f32 %v4877_v30 }
0x292a   :  { %6117 = vpow2.f32 %v4878_v31 }
0x292b   :  { %6119 = vpow2.f32 %v4875_v41 }
0x292c   :  { %6121 = vtanh.f32 %v3955_v27 }
0x292d   :  { %6123 = vtanh.f32 %v3956_v14 }
0x292e   :  { %6125 = vtanh.f32 %v3850_v2 }
0x2936   :  { %v6116_v60 = vpop.eup %6115 }
0x2937   :  { %v6118_v12 = vpop.eup %6117  ;;  %v3963_v62 = vadd.f32 1.0, %v6116_v60 }
0x2938   :  { %v6120_v43 = vpop.eup %6119  ;;  %v3964_v44 = vadd.f32 1.0, %v6118_v12 }
0x2939   :  { %6127 = vrcp.f32 %v3963_v62  ;;  %v3856_v45 = vadd.f32 1.0, %v6120_v43  ;;  %v6122_v48 = vpop.eup %6121 }
0x293a   :  { %6129 = vrcp.f32 %v3964_v44  ;;  %v6124_v33 = vpop.eup %6123  ;;  %v3979_v52 = vrot.slane %v6122_v48, 5 }
0x293b   :  { %6131 = vrcp.f32 %v3856_v45  ;;  %v6126_v50 = vpop.eup %6125  ;;  %v3980_v29 = vrot.slane %v6124_v33, 4 }
0x293d   :  { %v3981_v22 = vsel %vm998_vm5, %v3980_v29, %v3979_v52 }
0x2946   :  { %v6128_v51 = vpop.eup %6127 }
0x2947   :  { %v6130_v32 = vpop.eup %6129  ;;  %v3973_v13 = vrot.slane %v6128_v51, 5 }
0x2948   :  { %v6132_v58 = vpop.eup %6131  ;;  %v3974_v59 = vrot.slane %v6130_v32, 4 }
0x2949   :  { %v3860_v49 = vsel %vm6702_vm6, %v6132_v58, %v6126_v50 }
0x294a   :  { %3863 = vrot.lane.b32.xlu1 %v3860_v49, %s6245_s30  ;;  %v3975_v53 = vsel %vm998_vm5, %v3974_v59, %v3973_v13  ;;  %v3861_v4 = vmul.f32 %v3860_v49, %v7563_v23 }
0x294b   :  { %v3983_v55 = vsel %vm6702_vm6, %v3975_v53, %v3981_v22 }
0x294c   :  { %3986 = vrot.lane.b32.xlu0 %v3983_v55, %s6245_s30  ;;  %v3984_v5 = vmul.f32 %v3983_v55, %v7567_v3 }
0x29bc   :  { %v3864_v54 = vpop.permute.xlu1 %3863 }
0x29bd   :  { %v3866_v8 = vmul.f32 %v3864_v54, %v3860_v49 }
0x29be   :  { %v3987_v9 = vpop.permute.xlu0 %3986 }
0x29bf   :  { %3868 = vrot.lane.b32.xlu1 %v3866_v8, %s6243_s27  ;;  %v3989_v56 = vmul.f32 %v3987_v9, %v3983_v55 }
0x29c1   :  { %3991 = vrot.lane.b32.xlu0 %v3989_v56, %s6243_s27 }
0x2a31   :  { %v3869_v46 = vpop.permute.xlu1 %3868 }
0x2a32   :  { %v7624_v7 = vadd.f32 %v3869_v46, %v3861_v4 }
0x2a33   :  { %v3992_v11 = vpop.permute.xlu0 %3991 }
0x2a34   :  { %6133 = vtanh.f32 %v7624_v7  ;;  %v7628_v34 = vadd.f32 %v3992_v11, %v3984_v5 }
0x2a36   :  { %6135 = vtanh.f32 %v7628_v34 }
0x2a41   :  { %v6134_v57 = vpop.eup %6133 }
0x2a42   :  { %3874 = vrot.lane.b32.xlu1 %v6134_v57, %s6245_s30 }
0x2a43   :  { %v6136_v18 = vpop.eup %6135 }
0x2a44   :  { %3997 = vrot.lane.b32.xlu0 %v6136_v18, %s6245_s30 }
0x2ab4   :  { %v3875_v63 = vpop.permute.xlu1 %3874 }
0x2ab5   :  { %v3877_v23 = vmul.f32 %v3875_v63, %v3860_v49 }
0x2ab6   :  { %v3998_v19 = vpop.permute.xlu0 %3997 }
0x2ab7   :  { %4006 = vrot.lane.b32.xlu1 %v3877_v23, %s6245_s30  ;;  %v4000_v20 = vmul.f32 %v3998_v19, %v3983_v55 }
0x2ab9   :  { %4002 = vrot.lane.b32.xlu0 %v4000_v20, %s6243_s27 }
0x2b29   :  { %v4007_v3 = vpop.permute.xlu1 %4006 }
0x2b2b   :  { %v4003_v25 = vpop.permute.xlu0 %4002 }
0x2b2c   :  { %v4009_v0 = vsel %vm361_vm10, %v4003_v25, %v4007_v3  ;;  %5621 = vmatmul.mubr.msk.f32.vlgmr.msra.gmra.mxu1 %vm361_vm10, %v4003_v25 }
0x2b2d   :  { %5610 = vmatmul.mubr.msk.f32.vlgmr.msra.gmra.mxu0 %vm643_vm14, %v4009_v0  ;;  %5624 = vmatpush3.msra.mxu1 %v7484_v10 }
0x2b2e   :  { %5625 = vmatprep.subr.mxu1 %v6248_v36  ;;  %5643 = vmatpush3.msra.mxu0 %v7410_v15 }
0x2b2f   :  { %5626 = vmatpush3.msra.mxu1 %v7492_v42  ;;  %5644 = vmatprep.subr.mxu0 %v6248_v36 }
0x2b30   :  { %5627 = vmatprep.subr.mxu1 %v6248_v36  ;;  %5645 = vmatpush3.msra.mxu0 %v7419_v6 }
0x2b31   :  { %5628 = vmatpush3.msra.mxu1 %v7501_v16  ;;  %5646 = vmatprep.subr.mxu0 %v6248_v36 }
0x2b32   :  { %5629 = vmatprep.subr.mxu1 %v6248_v36  ;;  %5647 = vmatpush3.msra.mxu0 %v7428_v35 }
0x2b33   :  { %5630 = vmatpush3.msra.mxu1 %v7510_v17  ;;  %5648 = vmatprep.subr.mxu0 %v6248_v36 }
0x2b34   :  { %5631 = vmatprep.subr.mxu1 %v6248_v36  ;;  %5649 = vmatpush3.msra.mxu0 %v7437_v37 }
0x2b35   :  { %5632 = vmatpush3.msra.mxu1 %v7519_v38  ;;  %5650 = vmatprep.mubr.msk.f32.mxu0 %vm6249_vm2, %v6248_v36 }
0x2b36   :  { %5633 = vmatprep.subr.mxu1 %v6248_v36  ;;  %5639 = vmatprep.mubr.msk.f32.mxu1 %vm6249_vm2, %v6248_v36 }
0x2b37   :  { %5634 = vmatpush3.msra.mxu1 %v7530_v39  ;;  %5653 = vmatprep.subr.mxu0 %v6248_v36 }
0x2b38   :  { %5635 = vmatprep.subr.mxu1 %v6248_v36 }
0x2b39   :  { %5636 = vmatpush3.msra.mxu1 %v7538_v40 }
0x2b3a   :  { %5637 = vmatprep.subr.mxu1 %v6248_v36 }
0x2b3b   :  { %5638 = vmatpush3.msra.mxu1 %v7545_v24 }
0x2b3c   :  { %5672 = vmatprep.subr.mxu1 %v6248_v36 }
0x2bec   :  { %v4176_v15 = vpop.f32.mrf.mxu1 }
0x2bed   :  { %v4181_v6 = vrot.slane %v4176_v15, 2  ;;  %v4182_v35 = vrot.slane %v4176_v15, 3  ;;  %v4079_v37 = vpop.f32.mrf.mxu0 }
0x2bee   :  { %v4080_v2 = vadd.f32 %v7608_v26, %v4079_v37  ;;  %v5622_v47 = vpop.f32.mrf.mxu1 }
0x2bef   :  { %v4185_v27 = vadd.f32 %v4181_v6, %v6696_v61  ;;  %v4186_v14 = vadd.f32 %v4182_v35, %v6692_v1  ;;  %v5611_v28 = vpop.f32.mrf.mxu0 }
0x2bf0   :  { %v4880_v41 = vmul.f32 -1.442695, %v4080_v2 }
0x2bf1   :  { %v4882_v30 = vmul.f32 -1.442695, %v4185_v27  ;;  %v4883_v31 = vmul.f32 -1.442695, %v4186_v14 }
0x2bf3   :  { %6137 = vpow2.f32 %v4882_v30 }
0x2bf4   :  { %6139 = vpow2.f32 %v4883_v31 }
0x2bf5   :  { %6141 = vpow2.f32 %v4880_v41 }
0x2bf6   :  { %6143 = vtanh.f32 %v4185_v27 }
0x2bf7   :  { %6145 = vtanh.f32 %v4186_v14 }
0x2bf8   :  { %6147 = vtanh.f32 %v4080_v2 }
0x2c00   :  { %v6138_v60 = vpop.eup %6137 }
0x2c01   :  { %v6140_v12 = vpop.eup %6139  ;;  %v4193_v62 = vadd.f32 1.0, %v6138_v60 }
0x2c02   :  { %v6142_v43 = vpop.eup %6141  ;;  %v4194_v44 = vadd.f32 1.0, %v6140_v12 }
0x2c03   :  { %6149 = vrcp.f32 %v4193_v62  ;;  %v4086_v45 = vadd.f32 1.0, %v6142_v43  ;;  %v6144_v48 = vpop.eup %6143 }
0x2c04   :  { %6151 = vrcp.f32 %v4194_v44  ;;  %v6146_v33 = vpop.eup %6145  ;;  %v4209_v52 = vrot.slane %v6144_v48, 6 }
0x2c05   :  { %6153 = vrcp.f32 %v4086_v45  ;;  %v6148_v50 = vpop.eup %6147  ;;  %v4210_v29 = vrot.slane %v6146_v33, 5 }
0x2c07   :  { %v4211_v22 = vsel %vm998_vm5, %v4210_v29, %v4209_v52 }
0x2c10   :  { %v6150_v51 = vpop.eup %6149 }
0x2c11   :  { %v6152_v32 = vpop.eup %6151  ;;  %v4203_v13 = vrot.slane %v6150_v51, 6 }
0x2c12   :  { %v6154_v58 = vpop.eup %6153  ;;  %v4204_v59 = vrot.slane %v6152_v32, 5 }
0x2c13   :  { %v4090_v49 = vsel %vm6702_vm6, %v6154_v58, %v6148_v50 }
0x2c14   :  { %4093 = vrot.lane.b32.xlu1 %v4090_v49, %s6245_s30  ;;  %v4205_v53 = vsel %vm998_vm5, %v4204_v59, %v4203_v13  ;;  %v4091_v4 = vmul.f32 %v4090_v49, %v7624_v7 }
0x2c15   :  { %v4213_v55 = vsel %vm6702_vm6, %v4205_v53, %v4211_v22 }
0x2c16   :  { %4216 = vrot.lane.b32.xlu0 %v4213_v55, %s6245_s30  ;;  %v4214_v11 = vmul.f32 %v4213_v55, %v7628_v34 }
0x2c86   :  { %v4094_v54 = vpop.permute.xlu1 %4093 }
0x2c87   :  { %v4096_v8 = vmul.f32 %v4094_v54, %v4090_v49 }
0x2c88   :  { %v4217_v9 = vpop.permute.xlu0 %4216 }
0x2c89   :  { %4098 = vrot.lane.b32.xlu1 %v4096_v8, %s6243_s27  ;;  %v4219_v56 = vmul.f32 %v4217_v9, %v4213_v55 }
0x2c8b   :  { %4221 = vrot.lane.b32.xlu0 %v4219_v56, %s6243_s27 }
0x2cfb   :  { %v4099_v46 = vpop.permute.xlu1 %4098 }
0x2cfc   :  { %v7680_v5 = vadd.f32 %v4099_v46, %v4091_v4 }
0x2cfd   :  { %v4222_v57 = vpop.permute.xlu0 %4221 }
0x2cfe   :  { %6155 = vtanh.f32 %v7680_v5  ;;  %v7684_v18 = vadd.f32 %v4222_v57, %v4214_v11 }
0x2d00   :  { %6157 = vtanh.f32 %v7684_v18 }
0x2d0b   :  { %v6156_v63 = vpop.eup %6155 }
0x2d0c   :  { %4104 = vrot.lane.b32.xlu1 %v6156_v63, %s6245_s30 }
0x2d0d   :  { %v6158_v23 = vpop.eup %6157 }
0x2d0e   :  { %4227 = vrot.lane.b32.xlu0 %v6158_v23, %s6245_s30 }
0x2d7e   :  { %v4105_v19 = vpop.permute.xlu1 %4104 }
0x2d7f   :  { %v4107_v7 = vmul.f32 %v4105_v19, %v4090_v49 }
0x2d80   :  { %v4228_v20 = vpop.permute.xlu0 %4227 }
0x2d81   :  { %4236 = vrot.lane.b32.xlu1 %v4107_v7, %s6245_s30  ;;  %v4230_v3 = vmul.f32 %v4228_v20, %v4213_v55 }
0x2d83   :  { %4232 = vrot.lane.b32.xlu0 %v4230_v3, %s6243_s27 }
0x2df3   :  { %v4237_v34 = vpop.permute.xlu1 %4236 }
0x2df5   :  { %v4233_v25 = vpop.permute.xlu0 %4232 }
0x2df6   :  { %v4239_v0 = vsel %vm361_vm10, %v4233_v25, %v4237_v34  ;;  %5651 = vmatmul.mubr.msk.f32.vlgmr.msra.gmra.mxu0 %vm361_vm10, %v4233_v25 }
0x2df7   :  { %5640 = vmatmul.mubr.msk.f32.vlgmr.msra.gmra.mxu1 %vm643_vm14, %v4239_v0  ;;  %5654 = vmatpush3.msra.mxu0 %v7484_v10 }
0x2df8   :  { %5655 = vmatprep.subr.mxu0 %v6248_v36  ;;  %5669 = vmatprep.mubr.msk.f32.mxu0 %vm6249_vm2, %v6248_v36 }
0x2df9   :  { %5656 = vmatpush3.msra.mxu0 %v7492_v42  ;;  %5680 = vmatprep.mubr.msk.f32.mxu1 %vm6249_vm2, %v6248_v36 }
0x2dfa   :  { %5657 = vmatprep.subr.mxu0 %v6248_v36 }
0x2dfb   :  { %5658 = vmatpush3.msra.mxu0 %v7501_v16 }
0x2dfc   :  { %5659 = vmatprep.subr.mxu0 %v6248_v36 }
0x2dfd   :  { %5660 = vmatpush3.msra.mxu0 %v7510_v17 }
0x2dfe   :  { %5661 = vmatprep.subr.mxu0 %v6248_v36 }
0x2dff   :  { %5662 = vmatpush3.msra.mxu0 %v7519_v38 }
0x2e00   :  { %5663 = vmatprep.subr.mxu0 %v6248_v36 }
0x2e01   :  { %5664 = vmatpush3.msra.mxu0 %v7530_v39 }
0x2e02   :  { %5665 = vmatprep.subr.mxu0 %v6248_v36 }
0x2e03   :  { %5666 = vmatpush3.msra.mxu0 %v7538_v40 }
0x2e04   :  { %5667 = vmatprep.subr.mxu0 %v6248_v36 }
0x2e05   :  { %5668 = vmatpush3.msra.mxu0 %v7545_v24 }
0x2eb6   :  { %v4406_v10 = vpop.f32.mrf.mxu0 }
0x2eb7   :  { %v4411_v42 = vrot.slane %v4406_v10, 1  ;;  %v4412_v16 = vrot.slane %v4406_v10, 2  ;;  %v4309_v17 = vpop.f32.mrf.mxu1 }
0x2eb8   :  { %v4310_v15 = vadd.f32 %v7608_v26, %v4309_v17  ;;  %v5652_v6 = vpop.f32.mrf.mxu0  ;;  %v4571_v17 = vld [vmem:[%s7798_s15 + $0x18] sm:$0xff] }
0x2eb9   :  { %v4415_v38 = vadd.f32 %v4411_v42, %v6696_v61  ;;  %v4416_v35 = vadd.f32 %v4412_v16, %v6692_v1  ;;  %v5641_v39 = vpop.f32.mrf.mxu1  ;;  %5673 = vmatpush3.msra.mxu1 %v4571_v17  ;;  %v4568_v6 = vld [vmem:[%s7798_s15] sm:$0xff] }
0x2eba   :  { %v4885_v47 = vmul.f32 -1.442695, %v4310_v15  ;;  %5674 = vmatprep.subr.mxu1 %v6248_v36 }
0x2ebb   :  { %v4887_v37 = vmul.f32 -1.442695, %v4415_v38  ;;  %v4888_v2 = vmul.f32 -1.442695, %v4416_v35 }
0x2ebd   :  { %6159 = vpow2.f32 %v4887_v37 }
0x2ebe   :  { %6161 = vpow2.f32 %v4888_v2  ;;  %v4891_v2 = vld [vmem:[%s7799_s16] ss:$0 sm:$0xff] }
0x2ebf   :  { %6163 = vpow2.f32 %v4885_v47 }
0x2ec0   :  { %6165 = vtanh.f32 %v4415_v38 }
0x2ec1   :  { %6167 = vtanh.f32 %v4416_v35 }
0x2ec2   :  { %6169 = vtanh.f32 %v4310_v15  ;;  %v4570_v15 = vld [vmem:[%s7798_s15 + $0x10] sm:$0xff] }
0x2ec3   :  { %5675 = vmatpush3.msra.mxu1 %v4570_v15 }
0x2ec4   :  { %5676 = vmatprep.subr.mxu1 %v6248_v36 }
0x2ec5   :  { %5677 = vmatpush3.msra.mxu1 %v4569_v21 }
0x2ec6   :  { %5678 = vmatprep.subr.mxu1 %v6248_v36 }
0x2ec7   :  { %5679 = vmatpush3.msra.mxu1 %v4568_v6 }
0x2ec8   :  { %5683 = vmatprep.subr.mxu1 %v6248_v36 }
0x2eca   :  { %v6160_v40 = vpop.eup %6159 }
0x2ecb   :  { %v6162_v24 = vpop.eup %6161  ;;  %v4423_v27 = vadd.f32 1.0, %v6160_v40 }
0x2ecc   :  { %v6164_v14 = vpop.eup %6163  ;;  %v4424_v28 = vadd.f32 1.0, %v6162_v24 }
0x2ecd   :  { %6171 = vrcp.f32 %v4423_v27  ;;  %v4316_v30 = vadd.f32 1.0, %v6164_v14  ;;  %v6166_v1 = vpop.eup %6165 }
0x2ece   :  { %6173 = vrcp.f32 %v4424_v28  ;;  %v6168_v61 = vpop.eup %6167  ;;  %v4439_v60 = vrot.slane %v6166_v1, 7 }
0x2ecf   :  { %6175 = vrcp.f32 %v4316_v30  ;;  %v6170_v31 = vpop.eup %6169  ;;  %v4440_v12 = vrot.slane %v6168_v61, 6 }
0x2ed1   :  { %v4441_v50 = vsel %vm998_vm5, %v4440_v12, %v4439_v60  ;;  %v4686_v60 = vld [vmem:[%s7802_s19] sm:$0xff] }
0x2eda   :  { %v6172_v41 = vpop.eup %6171 }
0x2edb   :  { %v6174_v62 = vpop.eup %6173  ;;  %v4433_v43 = vrot.slane %v6172_v41, 7  ;;  %v4687_v41 = vld [vmem:[%s7802_s19 + $0x8] sm:$0xff] }
0x2edc   :  { %v6176_v44 = vpop.eup %6175  ;;  %v4434_v45 = vrot.slane %v6174_v62, 6 }
0x2edd   :  { %v4320_v48 = vsel %vm6702_vm6, %v6176_v44, %v6170_v31 }
0x2ede   :  { %4323 = vrot.lane.b32.xlu0 %v4320_v48, %s6245_s30  ;;  %v4435_v33 = vsel %vm998_vm5, %v4434_v45, %v4433_v43  ;;  %v4321_v58 = vmul.f32 %v4320_v48, %v7680_v5  ;;  %v4893_v45 = vld [vmem:[%s7800_s17] ss:$0 sm:$0xff]  ;;  %s6217_s17 = scalar_lea.vmem %s4776_s25, 32 }
0x2edf   :  { %v4443_v51 = vsel %vm6702_vm6, %v4435_v33, %v4441_v50  ;;  %v4894_v33 = vld [vmem:[%s7801_s18] ss:$0 sm:$0xff]  ;;  %p6218_p0 = scmp.ne.s32.totalorder %s4776_s25, %s6217_s17  ;;  %p6223_p2 = scmp.lt.s32.totalorder %s6217_s17, %s6217_s17 }
0x2ee0   :  { %4446 = vrot.lane.b32.xlu1 %v4443_v51, %s6245_s30  ;;  %v4444_v53 = vmul.f32 %v4443_v51, %v7684_v18 }
0x2ee1   :  { %p6224_p3 = por %p6223_p2, %p6222_p1 }
0x2ee3   :  { %p6225_p4 = pnand %p6224_p3, %p6218_p0 }
0x2f50   :  { %v4324_v52 = vpop.permute.xlu0 %4323 }
0x2f51   :  { %v4326_v29 = vmul.f32 %v4324_v52, %v4320_v48 }
0x2f52   :  { %v4447_v32 = vpop.permute.xlu1 %4446 }
0x2f53   :  { %4328 = vrot.lane.b32.xlu0 %v4326_v29, %s6243_s27  ;;  %v4449_v13 = vmul.f32 %v4447_v32, %v4443_v51 }
0x2f55   :  { %4451 = vrot.lane.b32.xlu1 %v4449_v13, %s6243_s27 }
0x2fc5   :  { %v4329_v59 = vpop.permute.xlu0 %4328 }
0x2fc6   :  { %v4331_v49 = vadd.f32 %v4329_v59, %v4321_v58 }
0x2fc7   :  { %v4452_v22 = vpop.permute.xlu1 %4451 }
0x2fc8   :  { %6177 = vtanh.f32 %v4331_v49  ;;  %v4454_v55 = vadd.f32 %v4452_v22, %v4444_v53 }
0x2fca   :  { %6179 = vtanh.f32 %v4454_v55 }
0x2fd5   :  { %v6178_v54 = vpop.eup %6177 }
0x2fd6   :  { %4334 = vrot.lane.b32.xlu0 %v6178_v54, %s6245_s30 }
0x2fd7   :  { %v6180_v8 = vpop.eup %6179 }
0x2fd8   :  { %4457 = vrot.lane.b32.xlu1 %v6180_v8, %s6245_s30 }
0x3048   :  { %v4335_v9 = vpop.permute.xlu0 %4334 }
0x3049   :  { %v4337_v56 = vmul.f32 %v4335_v9, %v4320_v48 }
0x304a   :  { %v4458_v4 = vpop.permute.xlu1 %4457 }
0x304b   :  { %4466 = vrot.lane.b32.xlu1 %v4337_v56, %s6245_s30  ;;  %v4460_v46 = vmul.f32 %v4458_v4, %v4443_v51 }
0x304d   :  { %4462 = vrot.lane.b32.xlu0 %v4460_v46, %s6243_s27 }
0x30bd   :  { %v4467_v5 = vpop.permute.xlu1 %4466 }
0x30bf   :  { %v4463_v11 = vpop.permute.xlu0 %4462 }
0x30c0   :  { %v4469_v57 = vsel %vm361_vm10, %v4463_v11, %v4467_v5 }
0x30c1   :  { %5670 = vmatmul.mubr.msk.f32.vlgmr.msra.gmra.mxu0 %vm643_vm14, %v4469_v57 }
0x3181   :  { %v4539_v18 = vpop.f32.mrf.mxu0 }
0x3182   :  { %v4540_v63 = vadd.f32 %v7608_v26, %v4539_v18 }
0x3183   :  { %v5671_v23 = vpop.f32.mrf.mxu0 }
0x3184   :  { %v4890_v19 = vmul.f32 -1.442695, %v4540_v63 }
0x3186   :  { %6181 = vpow2.f32 %v4890_v19 }
0x3187   :  { %6183 = vtanh.f32 %v4540_v63 }
0x3193   :  { %v6182_v7 = vpop.eup %6181 }
0x3194   :  { %v4546_v20 = vadd.f32 1.0, %v6182_v7  ;;  %v6184_v3 = vpop.eup %6183 }
0x3196   :  { %6185 = vrcp.f32 %v4546_v20 }
0x31a3   :  { %v6186_v34 = vpop.eup %6185 }
0x31a4   :  { %v4550_v25 = vsel %vm6702_vm6, %v6186_v34, %v6184_v3 }
0x31a5   :  { %4553 = vrot.lane.b32.xlu0 %v4550_v25, %s6245_s30  ;;  %v4551_v42 = vmul.f32 %v4550_v25, %v4331_v49 }
0x3217   :  { %v4554_v0 = vpop.permute.xlu0 %4553 }
0x3218   :  { %v4556_v10 = vmul.f32 %v4554_v0, %v4550_v25 }
0x321a   :  { %4558 = vrot.lane.b32.xlu1 %v4556_v10, %s6243_s27 }
0x328c   :  { %v4559_v26 = vpop.permute.xlu1 %4558 }
0x328d   :  { %v4561_v16 = vadd.f32 %v4559_v26, %v4551_v42 }
0x328f   :  { %6187 = vtanh.f32 %v4561_v16 }
0x329c   :  { %v6188_v38 = vpop.eup %6187 }
0x329d   :  { %4564 = vrot.lane.b32.xlu0 %v6188_v38, %s6245_s30 }
0x330f   :  { %v4565_v35 = vpop.permute.xlu0 %4564 }
0x3310   :  { %v4567_v39 = vmul.f32 %v4565_v35, %v4550_v25 }
0x3312   :  { %4580 = vrot.lane.b32.xlu1 %v4567_v39, %s6243_s27 }
0x3384   :  { %v4581_v37 = vpop.permute.xlu1 %4580 }
0x3385   :  { %5681 = vmatmul.mubr.msk.f32.vlgmr.msra.gmra.mxu1 %vm361_vm10, %v4581_v37 }
0x3386   :  { %5687 = vmatprep.mubr.msk.f32.mxu1 %vm6249_vm2, %v6248_v36  ;;  %5684 = vmatpush3.msra.mxu1 %v4687_v41 }
0x3387   :  { %5685 = vmatprep.subr.mxu1 %v6248_v36  ;;  %v4895_v36 = vld [vmem:[%s7803_s20] ss:$0 sm:$0xff] }
0x3388   :  { %5686 = vmatpush3.msra.mxu1 %v4686_v60 }
0x3445   :  { %v4650_v47 = vpop.f32.mrf.mxu1 }
0x3446   :  { %v4651_v40 = vadd.f32 %v4891_v2, %v4650_v47 }
0x3447   :  { %v5682_v24 = vpop.f32.mrf.mxu1 }
0x3448   :  { %v4654_v27 = vmax.f32 %v4651_v40, 0.0 }
0x344a   :  { %v4656_v14 = vsel %vm4655_vm7, %v4654_v27, 0.0 }
0x344b   :  { %4657 = vadd.xlane.f32.xlu0 %v4656_v14 }
0x34d4   :  { %v4658_v28 = vpop.xlane.xlu0 %4657 }
0x34d5   :  { %v4660_v30 = vmul.f32 0.0625, %v4658_v28 }
0x34d7   :  { %v4661_v1 = vsub.f32 %v4654_v27, %v4660_v30 }
0x34d9   :  { %v4662_v61 = vmul.f32 %v4661_v1, %v4661_v1 }
0x34db   :  { %v4663_v31 = vsel %vm4655_vm7, %v4662_v61, 0.0 }
0x34dc   :  { %4664 = vadd.xlane.f32.xlu1 %v4663_v31 }
0x3565   :  { %v4665_v12 = vpop.xlane.xlu1 %4664 }
0x3566   :  { %v4666_v62 = vmul.f32 0.0625, %v4665_v12 }
0x3568   :  { %v4667_v43 = vadd.f32 1e-05, %v4666_v62 }
0x356a   :  { %6189 = vrsqrt.f32 %v4667_v43 }
0x3577   :  { %v6190_v44 = vpop.eup %6189 }
0x3578   :  { %v4669_v48 = vmul.f32 %v6190_v44, %v4661_v1 }
0x357a   :  { %v4677_v50 = vmul.f32 %v4893_v45, %v4669_v48 }
0x357c   :  { %v4685_v51 = vadd.f32 %v4894_v33, %v4677_v50 }
0x357e   :  { %5688 = vmatmul.mubr.msk.f32.vlgmr.msra.gmra.mxu1 %vm351_vm8, %v4685_v51 }
0x363e   :  { %v4764_v52 = vpop.f32.mrf.mxu1 }
0x363f   :  { %v4765_v29 = vadd.f32 %v4895_v36, %v4764_v52 }
0x3640   :  { %v5689_v32 = vpop.f32.mrf.mxu1 }
0x3641   :  { %4768 = vst [vmem:[#allocation2] sm:$0x3] %v4765_v29 }
0x3642   :  { %6228 = shalt.err (!%p6225_p4)
}
0x3643   :  { %4778 = dma.vmem_to_hbm [thread:$0]  %s4776_s25, 32, %s7804_s21, [#allocation3]  }
0x3644   :  { %6237 = dma.done.wait [#allocation3], 32  }
0x3645   :  { %6238 = vsyncadd [#allocation3], 4294967264 }
0x3646   :  { %4782 = vsyncpa [#allocation3], 1 }

</bundles_post_ra>
